<compile_context>
chip_gen: v7x
topology: tpu7x:2x2x1
jax: 0.10.0
libtpu: 0.0.40
codegen_flags: <defaults>
</compile_context>

<pallas_src>
import math

import jax
import jax.numpy as jnp
from jax import lax
from jax.experimental import pallas as pl
from jax.experimental.pallas import tpu as pltpu

# ---- small config consistent with GPTModel (emb_dim % n_heads == 0) ----
B   = 2           # batch
T   = 8           # tokens per sequence
CTX = 16          # context_length (positional-embedding table rows)
D   = 128         # emb_dim   (multiple of 128 -> lane-dense residual stream)
H   = 4           # n_heads
HD  = D // H      # head dim = 32
L   = 2           # n_layers
V   = 256         # vocab size (multiple of 128 -> lane-dense logits)
FF  = 4 * D       # feed-forward hidden dim
BT  = B * T


def _layer_norm(x, w, b, eps=1e-5):
    """weight * (x - mean) / sqrt(var + eps) + bias   (unbiased=False, like the module)."""
    mean = jnp.mean(x, axis=-1, keepdims=True)
    cen = x - mean
    var = jnp.mean(cen * cen, axis=-1, keepdims=True)
    return w * cen * lax.rsqrt(var + eps) + b


def _gelu(x):
    c = math.sqrt(2.0 / math.pi)
    return 0.5 * x * (1.0 + jnp.tanh(c * (x + 0.044715 * x * x * x)))


def gpt_kernel(ids_ref,                                            # scalar prefetch (SMEM)
               tok_emb_hbm, pos_ref,                               # embeddings
               ln1_w_ref, ln1_b_ref, wqkv_ref, wo_ref, bo_ref,     # per-layer (streamed)
               ln2_w_ref, ln2_b_ref, w1_ref, b1_ref, w2_ref, b2_ref,
               lnf_w_ref, lnf_b_ref, w_head_ref,                   # layer-invariant
               logits_ref,                                         # output
               x_ref, ctx_ref, dma_sem):                           # scratch
    f32, bf16 = jnp.float32, jnp.bfloat16
    b = pl.program_id(0)          # batch   (parallel)
    l = pl.program_id(1)          # layer   (arbitrary / sequential)

    # ---- layer 0: gather token-embedding rows via HBM row DMA (no one-hot matmul) ----
    @pl.when(l == 0)
    def _():
        base = b * T
        copies = []
        for i in range(T):        # T is tiny here; production: tile rows + overlap with compute
            tid = ids_ref[base + i]
            cp = pltpu.make_async_copy(tok_emb_hbm.at[tid], x_ref.at[i], dma_sem.at[i])
            cp.start()
            copies.append(cp)
        for cp in copies:
            cp.wait()
        x_ref[...] = x_ref[...] + pos_ref[...]        # pos emb: direct (T, D) add

    x = x_ref[...]

    # causal mask as an additive bias, built once per step (adds instead of per-head selects)
    r = lax.broadcasted_iota(jnp.int32, (T, T), 0)
    c = lax.broadcasted_iota(jnp.int32, (T, T), 1)
    attn_bias = jnp.where(c <= r, 0.0, -1e30).astype(f32)

    # ---------------- attention sub-block ----------------
    h = _layer_norm(x, ln1_w_ref[0], ln1_b_ref[0])
    qkv = jnp.dot(h.astype(bf16), wqkv_ref[0], preferred_element_type=f32)    # (T, 3D)
    q = qkv[:, 0:D].astype(bf16)          # W_query already carries the 1/sqrt(HD) scale
    k = qkv[:, D:2 * D].astype(bf16)
    v = qkv[:, 2 * D:3 * D].astype(bf16)

    for hh in range(H):                   # static unroll over heads
        sl = slice(hh * HD, (hh + 1) * HD)
        s = lax.dot_general(q[:, sl], k[:, sl], (((1,), (1,)), ((), ())),
                            preferred_element_type=f32)                      # (T, T)
        s = s + attn_bias
        m = jnp.max(s, axis=-1, keepdims=True)
        e = jnp.exp(s - m)
        p = e * pl.reciprocal(jnp.sum(e, axis=-1, keepdims=True), approx=True)
        # per-head context written into its static lane slice of the (T, D) scratch slab
        ctx_ref[:, sl] = jnp.dot(p.astype(bf16), v[:, sl], preferred_element_type=f32)

    # single K=D output projection (one MXU push) instead of H pushes with K=HD
    attn = jnp.dot(ctx_ref[...].astype(bf16), wo_ref[0], preferred_element_type=f32)
    x = x + attn + bo_ref[0]              # out_proj bias + residual (dropout = identity)

    # ---------------- feed-forward sub-block ----------------
    h2 = _layer_norm(x, ln2_w_ref[0], ln2_b_ref[0])
    f = jnp.dot(h2.astype(bf16), w1_ref[0], preferred_element_type=f32) + b1_ref[0]
    f = _gelu(f)
    x = x + jnp.dot(f.astype(bf16), w2_ref[0], preferred_element_type=f32) + b2_ref[0]
    x_ref[...] = x                        # carry residual stream to the next layer step

    # ---------------- final norm + LM head on the last layer ----------------
    @pl.when(l == L - 1)
    def _():
        xf = _layer_norm(x, lnf_w_ref[...], lnf_b_ref[...])
        logits_ref[...] = jnp.dot(xf.astype(bf16), w_head_ref[...],
                                  preferred_element_type=f32)


def gpt_forward(input_ids, params):
    """input_ids: (B, T) int32.  params: 16-tuple of stacked f32 weights (see __main__)."""
    (tok_emb, pos_emb, ln1_w, ln1_b, wqkv, wo, bo,
     ln2_w, ln2_b, w1, b1, w2, b2, lnf_w, lnf_b, w_head) = params
    bf16 = jnp.bfloat16
    ids_flat = input_ids.reshape(BT).astype(jnp.int32)

    def lyr(shape):       # per-layer streamed weight block (double-buffered HBM->VMEM)
        return pl.BlockSpec((1,) + shape, lambda b, l, ids: (l, 0, 0))

    def cst(shape):       # layer-invariant block (fetched once)
        nd = len(shape)
        return pl.BlockSpec(shape, lambda b, l, ids: (0,) * nd)

    grid_spec = pltpu.PrefetchScalarGridSpec(
        num_scalar_prefetch=1,
        grid=(B, L),                       # batch (parallel, 2 TCs on v7x) x layer (streamed)
        in_specs=[
            pl.BlockSpec(memory_space=pl.ANY),                   # tok_emb stays in HBM (gather)
            pl.BlockSpec((T, D), lambda b, l, ids: (0, 0)),      # pos_emb[:T]
            lyr((1, D)), lyr((1, D)),                            # ln1_w, ln1_b
            lyr((D, 3 * D)),                                     # wqkv (bf16)
            lyr((D, D)), lyr((1, D)),                            # wo (bf16), bo
            lyr((1, D)), lyr((1, D)),                            # ln2_w, ln2_b
            lyr((D, FF)), lyr((1, FF)),                          # w1 (bf16), b1
            lyr((FF, D)), lyr((1, D)),                           # w2 (bf16), b2
            cst((1, D)), cst((1, D)),                            # lnf_w, lnf_b
            cst((D, V)),                                         # w_head (bf16)
        ],
        out_specs=pl.BlockSpec((T, V), lambda b, l, ids: (b, 0)),
        scratch_shapes=[pltpu.VMEM((T, D), jnp.float32),         # residual stream x
                        pltpu.VMEM((T, D), jnp.float32),         # per-head context slab
                        pltpu.SemaphoreType.DMA((T,))],          # embedding-row gather sems
    )
    logits_flat = pl.pallas_call(
        gpt_kernel,
        out_shape=jax.ShapeDtypeStruct((BT, V), jnp.float32),
        grid_spec=grid_spec,
        compiler_params=pltpu.CompilerParams(
            dimension_semantics=("parallel", "arbitrary")),
    )(ids_flat,
      tok_emb, pos_emb,
      ln1_w, ln1_b, wqkv.astype(bf16), wo.astype(bf16), bo,
      ln2_w, ln2_b, w1.astype(bf16), b1, w2.astype(bf16), b2,
      lnf_w, lnf_b, w_head.astype(bf16))
    return logits_flat.reshape(B, T, V)


def gpt_reference(input_ids, ref_params):
    """Pure-JAX f32 reference mirroring the PyTorch GPTModel forward exactly."""
    (tok_emb, pos_emb, ln1_w, ln1_b, wq, wk, wv, wo, bo,
     ln2_w, ln2_b, w1, b1, w2, b2, lnf_w, lnf_b, w_head) = ref_params
    x = tok_emb[input_ids] + pos_emb[:T][None]
    mask = jnp.triu(jnp.ones((T, T), dtype=bool), k=1)
    for l in range(L):
        h = _layer_norm(x, ln1_w[l], ln1_b[l])
        q = (h @ wq[l]).reshape(B, T, H, HD).transpose(0, 2, 1, 3)
        k = (h @ wk[l]).reshape(B, T, H, HD).transpose(0, 2, 1, 3)
        v = (h @ wv[l]).reshape(B, T, H, HD).transpose(0, 2, 1, 3)
        scores = q @ k.transpose(0, 1, 3, 2)
        scores = jnp.where(mask, -jnp.inf, scores)
        w_attn = jax.nn.softmax(scores / math.sqrt(HD), axis=-1)
        ctx = (w_attn @ v).transpose(0, 2, 1, 3).reshape(B, T, D)
        x = x + ctx @ wo[l] + bo[l]
        h2 = _layer_norm(x, ln2_w[l], ln2_b[l])
        x = x + _gelu(h2 @ w1[l] + b1[l]) @ w2[l] + b2[l]
    x = _layer_norm(x, lnf_w, lnf_b)
    return x @ w_head


if __name__ == "__main__":
    key = jax.random.PRNGKey(0)
    keys = jax.random.split(key, 20)

    def nrm(k_, shape):
        return 0.02 * jax.random.normal(k_, shape, dtype=jnp.float32)

    input_ids = jax.random.randint(keys[0], (B, T), 0, V, dtype=jnp.int32)

    # nn.Linear weights stored pre-transposed as (in, out); layers stacked on a leading L axis.
    tok_emb = nrm(keys[1], (V, D))
    pos_emb = nrm(keys[2], (CTX, D))
    wq = nrm(keys[3], (L, D, D))
    wk = nrm(keys[4], (L, D, D))
    wv = nrm(keys[5], (L, D, D))
    wo = nrm(keys[6], (L, D, D))
    bo = nrm(keys[7], (L, 1, D))
    w1 = nrm(keys[8], (L, D, FF))
    b1 = nrm(keys[9], (L, 1, FF))
    w2 = nrm(keys[10], (L, FF, D))
    b2 = nrm(keys[11], (L, 1, D))
    ln1_w = 1.0 + 0.1 * jax.random.normal(keys[12], (L, 1, D), dtype=jnp.float32)
    ln1_b = 0.1 * jax.random.normal(keys[13], (L, 1, D), dtype=jnp.float32)
    ln2_w = 1.0 + 0.1 * jax.random.normal(keys[14], (L, 1, D), dtype=jnp.float32)
    ln2_b = 0.1 * jax.random.normal(keys[15], (L, 1, D), dtype=jnp.float32)
    lnf_w = 1.0 + 0.1 * jax.random.normal(keys[16], (1, D), dtype=jnp.float32)
    lnf_b = 0.1 * jax.random.normal(keys[17], (1, D), dtype=jnp.float32)
    w_head = nrm(keys[18], (D, V))

    # Fused QKV weight with the 1/sqrt(head_dim) softmax scale folded into W_query.
    wqkv = jnp.concatenate([wq * (1.0 / math.sqrt(HD)), wk, wv], axis=-1)   # (L, D, 3D)

    params = (tok_emb, pos_emb, ln1_w, ln1_b, wqkv, wo, bo,
              ln2_w, ln2_b, w1, b1, w2, b2, lnf_w, lnf_b, w_head)

    logits = gpt_forward(input_ids, params)
    logits = jax.block_until_ready(logits)

    ref = gpt_reference(input_ids, (tok_emb, pos_emb, ln1_w, ln1_b, wq, wk, wv, wo, bo,
                                    ln2_w, ln2_b, w1, b1, w2, b2, lnf_w, lnf_b, w_head))

    assert logits.shape == (B, T, V)
    # bf16 MXU operands + EUP approx reciprocal -> compare against the f32 reference loosely
    max_diff = jnp.max(jnp.abs(logits - ref))
    assert jnp.allclose(logits, ref, atol=5e-2, rtol=5e-2), \
        f"mismatch vs reference, max abs diff = {max_diff}"

    print("KERNEL_OK")
</pallas_src>

<mosaic_0001>
module attributes {stable_mosaic.version = 11 : i64} {
  func.func @gpt_kernel(%arg0: i32, %arg1: i32, %arg2: memref<16xi32, #tpu.memory_space<smem>>, %arg3: memref<256x128xf32, #tpu.memory_space<any>>, %arg4: memref<8x128xf32, #tpu.memory_space<vmem>>, %arg5: memref<1x1x128xf32, #tpu.memory_space<vmem>>, %arg6: memref<1x1x128xf32, #tpu.memory_space<vmem>>, %arg7: memref<1x128x384xbf16, #tpu.memory_space<vmem>>, %arg8: memref<1x128x128xbf16, #tpu.memory_space<vmem>>, %arg9: memref<1x1x128xf32, #tpu.memory_space<vmem>>, %arg10: memref<1x1x128xf32, #tpu.memory_space<vmem>>, %arg11: memref<1x1x128xf32, #tpu.memory_space<vmem>>, %arg12: memref<1x128x512xbf16, #tpu.memory_space<vmem>>, %arg13: memref<1x1x512xf32, #tpu.memory_space<vmem>>, %arg14: memref<1x512x128xbf16, #tpu.memory_space<vmem>>, %arg15: memref<1x1x128xf32, #tpu.memory_space<vmem>>, %arg16: memref<1x128xf32, #tpu.memory_space<vmem>>, %arg17: memref<1x128xf32, #tpu.memory_space<vmem>>, %arg18: memref<128x256xbf16, #tpu.memory_space<vmem>>, %arg19: memref<8x256xf32, #tpu.memory_space<vmem>>, %arg20: memref<8x128xf32, #tpu.memory_space<vmem>>, %arg21: memref<8x128xf32, #tpu.memory_space<vmem>>, %arg22: memref<8x!tpu.dma_semaphore, #tpu.memory_space<semaphore_mem>>) attributes {dimension_semantics = [#tpu.dimension_semantics<parallel>, #tpu.dimension_semantics<arbitrary>], iteration_bounds = array<i64: 2, 2>, scalar_prefetch = 1 : i64, scratch_operands = 3 : i64, tpu.core_type = #tpu.core_type<tc>, window_params = [{}, {transform_indices = @transform_1, window_bounds = array<i64: 8, 128>}, {transform_indices = @transform_2, window_bounds = array<i64: 1, 1, 128>}, {transform_indices = @transform_3, window_bounds = array<i64: 1, 1, 128>}, {transform_indices = @transform_4, window_bounds = array<i64: 1, 128, 384>}, {transform_indices = @transform_5, window_bounds = array<i64: 1, 128, 128>}, {transform_indices = @transform_6, window_bounds = array<i64: 1, 1, 128>}, {transform_indices = @transform_7, window_bounds = array<i64: 1, 1, 128>}, {transform_indices = @transform_8, window_bounds = array<i64: 1, 1, 128>}, {transform_indices = @transform_9, window_bounds = array<i64: 1, 128, 512>}, {transform_indices = @transform_10, window_bounds = array<i64: 1, 1, 512>}, {transform_indices = @transform_11, window_bounds = array<i64: 1, 512, 128>}, {transform_indices = @transform_12, window_bounds = array<i64: 1, 1, 128>}, {pipeline_mode = #tpu.pipeline_mode<synchronous>, transform_indices = @transform_13, window_bounds = array<i64: 1, 128>}, {pipeline_mode = #tpu.pipeline_mode<synchronous>, transform_indices = @transform_14, window_bounds = array<i64: 1, 128>}, {pipeline_mode = #tpu.pipeline_mode<synchronous>, transform_indices = @transform_15, window_bounds = array<i64: 128, 256>}, {transform_indices = @transform_16, window_bounds = array<i64: 8, 256>}]} {
    %c0_i32 = arith.constant 0 : i32
    %0 = arith.cmpi eq, %arg1, %c0_i32 : i32
    %1 = arith.extui %0 : i1 to i32
    %c0_i32_0 = arith.constant 0 : i32
    %2 = arith.cmpi ne, %1, %c0_i32_0 : i32
    scf.if %2 {
      %c8_i32 = arith.constant 8 : i32
      %184 = arith.muli %arg0, %c8_i32 : i32
      %c0_i32_80 = arith.constant 0 : i32
      %185 = arith.addi %184, %c0_i32_80 : i32
      %186 = arith.index_cast %185 : i32 to index
      %187 = memref.load %arg2[%186] : memref<16xi32, #tpu.memory_space<smem>>
      %c0_i32_81 = arith.constant 0 : i32
      %c0_i32_82 = arith.constant 0 : i32
      %c0_i32_83 = arith.constant 0 : i32
      %188 = tpu.memref_slice %arg3[%187, %c0_i32_83] : memref<256x128xf32, #tpu.memory_space<any>> -> memref<1x128xf32, #tpu.memory_space<any>>
      %189 = tpu.memref_squeeze %188 : memref<1x128xf32, #tpu.memory_space<any>> -> memref<128xf32, #tpu.memory_space<any>>
      %c0_i32_84 = arith.constant 0 : i32
      %190 = tpu.memref_slice %arg20[%c0_i32_81, %c0_i32_84] : memref<8x128xf32, #tpu.memory_space<vmem>> -> memref<1x128xf32, #tpu.memory_space<vmem>>
      %191 = tpu.memref_squeeze %190 : memref<1x128xf32, #tpu.memory_space<vmem>> -> memref<128xf32, #tpu.memory_space<vmem>>
      %192 = tpu.memref_slice %arg22[%c0_i32_82] : memref<8x!tpu.dma_semaphore, #tpu.memory_space<semaphore_mem>> -> memref<1x!tpu.dma_semaphore, #tpu.memory_space<semaphore_mem>>
      %193 = tpu.memref_squeeze %192 : memref<1x!tpu.dma_semaphore, #tpu.memory_space<semaphore_mem>> -> memref<!tpu.dma_semaphore, #tpu.memory_space<semaphore_mem>>
      tpu.enqueue_dma source(%189 : memref<128xf32, #tpu.memory_space<any>>) target(%191 : memref<128xf32, #tpu.memory_space<vmem>>) target_semaphore(%193 : memref<!tpu.dma_semaphore, #tpu.memory_space<semaphore_mem>>)
      %c1_i32_85 = arith.constant 1 : i32
      %194 = arith.addi %184, %c1_i32_85 : i32
      %195 = arith.index_cast %194 : i32 to index
      %196 = memref.load %arg2[%195] : memref<16xi32, #tpu.memory_space<smem>>
      %c1_i32_86 = arith.constant 1 : i32
      %c1_i32_87 = arith.constant 1 : i32
      %c0_i32_88 = arith.constant 0 : i32
      %197 = tpu.memref_slice %arg3[%196, %c0_i32_88] : memref<256x128xf32, #tpu.memory_space<any>> -> memref<1x128xf32, #tpu.memory_space<any>>
      %198 = tpu.memref_squeeze %197 : memref<1x128xf32, #tpu.memory_space<any>> -> memref<128xf32, #tpu.memory_space<any>>
      %c0_i32_89 = arith.constant 0 : i32
      %199 = tpu.memref_slice %arg20[%c1_i32_86, %c0_i32_89] : memref<8x128xf32, #tpu.memory_space<vmem>> -> memref<1x128xf32, #tpu.memory_space<vmem>>
      %200 = tpu.memref_squeeze %199 : memref<1x128xf32, #tpu.memory_space<vmem>> -> memref<128xf32, #tpu.memory_space<vmem>>
      %201 = tpu.memref_slice %arg22[%c1_i32_87] : memref<8x!tpu.dma_semaphore, #tpu.memory_space<semaphore_mem>> -> memref<1x!tpu.dma_semaphore, #tpu.memory_space<semaphore_mem>>
      %202 = tpu.memref_squeeze %201 : memref<1x!tpu.dma_semaphore, #tpu.memory_space<semaphore_mem>> -> memref<!tpu.dma_semaphore, #tpu.memory_space<semaphore_mem>>
      tpu.enqueue_dma source(%198 : memref<128xf32, #tpu.memory_space<any>>) target(%200 : memref<128xf32, #tpu.memory_space<vmem>>) target_semaphore(%202 : memref<!tpu.dma_semaphore, #tpu.memory_space<semaphore_mem>>)
      %c2_i32 = arith.constant 2 : i32
      %203 = arith.addi %184, %c2_i32 : i32
      %204 = arith.index_cast %203 : i32 to index
      %205 = memref.load %arg2[%204] : memref<16xi32, #tpu.memory_space<smem>>
      %c2_i32_90 = arith.constant 2 : i32
      %c2_i32_91 = arith.constant 2 : i32
      %c0_i32_92 = arith.constant 0 : i32
      %206 = tpu.memref_slice %arg3[%205, %c0_i32_92] : memref<256x128xf32, #tpu.memory_space<any>> -> memref<1x128xf32, #tpu.memory_space<any>>
      %207 = tpu.memref_squeeze %206 : memref<1x128xf32, #tpu.memory_space<any>> -> memref<128xf32, #tpu.memory_space<any>>
      %c0_i32_93 = arith.constant 0 : i32
      %208 = tpu.memref_slice %arg20[%c2_i32_90, %c0_i32_93] : memref<8x128xf32, #tpu.memory_space<vmem>> -> memref<1x128xf32, #tpu.memory_space<vmem>>
      %209 = tpu.memref_squeeze %208 : memref<1x128xf32, #tpu.memory_space<vmem>> -> memref<128xf32, #tpu.memory_space<vmem>>
      %210 = tpu.memref_slice %arg22[%c2_i32_91] : memref<8x!tpu.dma_semaphore, #tpu.memory_space<semaphore_mem>> -> memref<1x!tpu.dma_semaphore, #tpu.memory_space<semaphore_mem>>
      %211 = tpu.memref_squeeze %210 : memref<1x!tpu.dma_semaphore, #tpu.memory_space<semaphore_mem>> -> memref<!tpu.dma_semaphore, #tpu.memory_space<semaphore_mem>>
      tpu.enqueue_dma source(%207 : memref<128xf32, #tpu.memory_space<any>>) target(%209 : memref<128xf32, #tpu.memory_space<vmem>>) target_semaphore(%211 : memref<!tpu.dma_semaphore, #tpu.memory_space<semaphore_mem>>)
      %c3_i32 = arith.constant 3 : i32
      %212 = arith.addi %184, %c3_i32 : i32
      %213 = arith.index_cast %212 : i32 to index
      %214 = memref.load %arg2[%213] : memref<16xi32, #tpu.memory_space<smem>>
      %c3_i32_94 = arith.constant 3 : i32
      %c3_i32_95 = arith.constant 3 : i32
      %c0_i32_96 = arith.constant 0 : i32
      %215 = tpu.memref_slice %arg3[%214, %c0_i32_96] : memref<256x128xf32, #tpu.memory_space<any>> -> memref<1x128xf32, #tpu.memory_space<any>>
      %216 = tpu.memref_squeeze %215 : memref<1x128xf32, #tpu.memory_space<any>> -> memref<128xf32, #tpu.memory_space<any>>
      %c0_i32_97 = arith.constant 0 : i32
      %217 = tpu.memref_slice %arg20[%c3_i32_94, %c0_i32_97] : memref<8x128xf32, #tpu.memory_space<vmem>> -> memref<1x128xf32, #tpu.memory_space<vmem>>
      %218 = tpu.memref_squeeze %217 : memref<1x128xf32, #tpu.memory_space<vmem>> -> memref<128xf32, #tpu.memory_space<vmem>>
      %219 = tpu.memref_slice %arg22[%c3_i32_95] : memref<8x!tpu.dma_semaphore, #tpu.memory_space<semaphore_mem>> -> memref<1x!tpu.dma_semaphore, #tpu.memory_space<semaphore_mem>>
      %220 = tpu.memref_squeeze %219 : memref<1x!tpu.dma_semaphore, #tpu.memory_space<semaphore_mem>> -> memref<!tpu.dma_semaphore, #tpu.memory_space<semaphore_mem>>
      tpu.enqueue_dma source(%216 : memref<128xf32, #tpu.memory_space<any>>) target(%218 : memref<128xf32, #tpu.memory_space<vmem>>) target_semaphore(%220 : memref<!tpu.dma_semaphore, #tpu.memory_space<semaphore_mem>>)
      %c4_i32 = arith.constant 4 : i32
      %221 = arith.addi %184, %c4_i32 : i32
      %222 = arith.index_cast %221 : i32 to index
      %223 = memref.load %arg2[%222] : memref<16xi32, #tpu.memory_space<smem>>
      %c4_i32_98 = arith.constant 4 : i32
      %c4_i32_99 = arith.constant 4 : i32
      %c0_i32_100 = arith.constant 0 : i32
      %224 = tpu.memref_slice %arg3[%223, %c0_i32_100] : memref<256x128xf32, #tpu.memory_space<any>> -> memref<1x128xf32, #tpu.memory_space<any>>
      %225 = tpu.memref_squeeze %224 : memref<1x128xf32, #tpu.memory_space<any>> -> memref<128xf32, #tpu.memory_space<any>>
      %c0_i32_101 = arith.constant 0 : i32
      %226 = tpu.memref_slice %arg20[%c4_i32_98, %c0_i32_101] : memref<8x128xf32, #tpu.memory_space<vmem>> -> memref<1x128xf32, #tpu.memory_space<vmem>>
      %227 = tpu.memref_squeeze %226 : memref<1x128xf32, #tpu.memory_space<vmem>> -> memref<128xf32, #tpu.memory_space<vmem>>
      %228 = tpu.memref_slice %arg22[%c4_i32_99] : memref<8x!tpu.dma_semaphore, #tpu.memory_space<semaphore_mem>> -> memref<1x!tpu.dma_semaphore, #tpu.memory_space<semaphore_mem>>
      %229 = tpu.memref_squeeze %228 : memref<1x!tpu.dma_semaphore, #tpu.memory_space<semaphore_mem>> -> memref<!tpu.dma_semaphore, #tpu.memory_space<semaphore_mem>>
      tpu.enqueue_dma source(%225 : memref<128xf32, #tpu.memory_space<any>>) target(%227 : memref<128xf32, #tpu.memory_space<vmem>>) target_semaphore(%229 : memref<!tpu.dma_semaphore, #tpu.memory_space<semaphore_mem>>)
      %c5_i32 = arith.constant 5 : i32
      %230 = arith.addi %184, %c5_i32 : i32
      %231 = arith.index_cast %230 : i32 to index
      %232 = memref.load %arg2[%231] : memref<16xi32, #tpu.memory_space<smem>>
      %c5_i32_102 = arith.constant 5 : i32
      %c5_i32_103 = arith.constant 5 : i32
      %c0_i32_104 = arith.constant 0 : i32
      %233 = tpu.memref_slice %arg3[%232, %c0_i32_104] : memref<256x128xf32, #tpu.memory_space<any>> -> memref<1x128xf32, #tpu.memory_space<any>>
      %234 = tpu.memref_squeeze %233 : memref<1x128xf32, #tpu.memory_space<any>> -> memref<128xf32, #tpu.memory_space<any>>
      %c0_i32_105 = arith.constant 0 : i32
      %235 = tpu.memref_slice %arg20[%c5_i32_102, %c0_i32_105] : memref<8x128xf32, #tpu.memory_space<vmem>> -> memref<1x128xf32, #tpu.memory_space<vmem>>
      %236 = tpu.memref_squeeze %235 : memref<1x128xf32, #tpu.memory_space<vmem>> -> memref<128xf32, #tpu.memory_space<vmem>>
      %237 = tpu.memref_slice %arg22[%c5_i32_103] : memref<8x!tpu.dma_semaphore, #tpu.memory_space<semaphore_mem>> -> memref<1x!tpu.dma_semaphore, #tpu.memory_space<semaphore_mem>>
      %238 = tpu.memref_squeeze %237 : memref<1x!tpu.dma_semaphore, #tpu.memory_space<semaphore_mem>> -> memref<!tpu.dma_semaphore, #tpu.memory_space<semaphore_mem>>
      tpu.enqueue_dma source(%234 : memref<128xf32, #tpu.memory_space<any>>) target(%236 : memref<128xf32, #tpu.memory_space<vmem>>) target_semaphore(%238 : memref<!tpu.dma_semaphore, #tpu.memory_space<semaphore_mem>>)
      %c6_i32 = arith.constant 6 : i32
      %239 = arith.addi %184, %c6_i32 : i32
      %240 = arith.index_cast %239 : i32 to index
      %241 = memref.load %arg2[%240] : memref<16xi32, #tpu.memory_space<smem>>
      %c6_i32_106 = arith.constant 6 : i32
      %c6_i32_107 = arith.constant 6 : i32
      %c0_i32_108 = arith.constant 0 : i32
      %242 = tpu.memref_slice %arg3[%241, %c0_i32_108] : memref<256x128xf32, #tpu.memory_space<any>> -> memref<1x128xf32, #tpu.memory_space<any>>
      %243 = tpu.memref_squeeze %242 : memref<1x128xf32, #tpu.memory_space<any>> -> memref<128xf32, #tpu.memory_space<any>>
      %c0_i32_109 = arith.constant 0 : i32
      %244 = tpu.memref_slice %arg20[%c6_i32_106, %c0_i32_109] : memref<8x128xf32, #tpu.memory_space<vmem>> -> memref<1x128xf32, #tpu.memory_space<vmem>>
      %245 = tpu.memref_squeeze %244 : memref<1x128xf32, #tpu.memory_space<vmem>> -> memref<128xf32, #tpu.memory_space<vmem>>
      %246 = tpu.memref_slice %arg22[%c6_i32_107] : memref<8x!tpu.dma_semaphore, #tpu.memory_space<semaphore_mem>> -> memref<1x!tpu.dma_semaphore, #tpu.memory_space<semaphore_mem>>
      %247 = tpu.memref_squeeze %246 : memref<1x!tpu.dma_semaphore, #tpu.memory_space<semaphore_mem>> -> memref<!tpu.dma_semaphore, #tpu.memory_space<semaphore_mem>>
      tpu.enqueue_dma source(%243 : memref<128xf32, #tpu.memory_space<any>>) target(%245 : memref<128xf32, #tpu.memory_space<vmem>>) target_semaphore(%247 : memref<!tpu.dma_semaphore, #tpu.memory_space<semaphore_mem>>)
      %c7_i32 = arith.constant 7 : i32
      %248 = arith.addi %184, %c7_i32 : i32
      %249 = arith.index_cast %248 : i32 to index
      %250 = memref.load %arg2[%249] : memref<16xi32, #tpu.memory_space<smem>>
      %c7_i32_110 = arith.constant 7 : i32
      %c7_i32_111 = arith.constant 7 : i32
      %c0_i32_112 = arith.constant 0 : i32
      %251 = tpu.memref_slice %arg3[%250, %c0_i32_112] : memref<256x128xf32, #tpu.memory_space<any>> -> memref<1x128xf32, #tpu.memory_space<any>>
      %252 = tpu.memref_squeeze %251 : memref<1x128xf32, #tpu.memory_space<any>> -> memref<128xf32, #tpu.memory_space<any>>
      %c0_i32_113 = arith.constant 0 : i32
      %253 = tpu.memref_slice %arg20[%c7_i32_110, %c0_i32_113] : memref<8x128xf32, #tpu.memory_space<vmem>> -> memref<1x128xf32, #tpu.memory_space<vmem>>
      %254 = tpu.memref_squeeze %253 : memref<1x128xf32, #tpu.memory_space<vmem>> -> memref<128xf32, #tpu.memory_space<vmem>>
      %255 = tpu.memref_slice %arg22[%c7_i32_111] : memref<8x!tpu.dma_semaphore, #tpu.memory_space<semaphore_mem>> -> memref<1x!tpu.dma_semaphore, #tpu.memory_space<semaphore_mem>>
      %256 = tpu.memref_squeeze %255 : memref<1x!tpu.dma_semaphore, #tpu.memory_space<semaphore_mem>> -> memref<!tpu.dma_semaphore, #tpu.memory_space<semaphore_mem>>
      tpu.enqueue_dma source(%252 : memref<128xf32, #tpu.memory_space<any>>) target(%254 : memref<128xf32, #tpu.memory_space<vmem>>) target_semaphore(%256 : memref<!tpu.dma_semaphore, #tpu.memory_space<semaphore_mem>>)
      %c0_i32_114 = arith.constant 0 : i32
      %c0_i32_115 = arith.constant 0 : i32
      %c0_i32_116 = arith.constant 0 : i32
      %257 = tpu.memref_slice %arg3[%187, %c0_i32_116] : memref<256x128xf32, #tpu.memory_space<any>> -> memref<1x128xf32, #tpu.memory_space<any>>
      %258 = tpu.memref_squeeze %257 : memref<1x128xf32, #tpu.memory_space<any>> -> memref<128xf32, #tpu.memory_space<any>>
      %c0_i32_117 = arith.constant 0 : i32
      %259 = tpu.memref_slice %arg20[%c0_i32_114, %c0_i32_117] : memref<8x128xf32, #tpu.memory_space<vmem>> -> memref<1x128xf32, #tpu.memory_space<vmem>>
      %260 = tpu.memref_squeeze %259 : memref<1x128xf32, #tpu.memory_space<vmem>> -> memref<128xf32, #tpu.memory_space<vmem>>
      %261 = tpu.memref_slice %arg22[%c0_i32_115] : memref<8x!tpu.dma_semaphore, #tpu.memory_space<semaphore_mem>> -> memref<1x!tpu.dma_semaphore, #tpu.memory_space<semaphore_mem>>
      %262 = tpu.memref_squeeze %261 : memref<1x!tpu.dma_semaphore, #tpu.memory_space<semaphore_mem>> -> memref<!tpu.dma_semaphore, #tpu.memory_space<semaphore_mem>>
      tpu.wait_dma2 semaphore(%262 : memref<!tpu.dma_semaphore, #tpu.memory_space<semaphore_mem>>) src(%258 : memref<128xf32, #tpu.memory_space<any>>) dst(%260 : memref<128xf32, #tpu.memory_space<vmem>>)
      %c1_i32_118 = arith.constant 1 : i32
      %c1_i32_119 = arith.constant 1 : i32
      %c0_i32_120 = arith.constant 0 : i32
      %263 = tpu.memref_slice %arg3[%196, %c0_i32_120] : memref<256x128xf32, #tpu.memory_space<any>> -> memref<1x128xf32, #tpu.memory_space<any>>
      %264 = tpu.memref_squeeze %263 : memref<1x128xf32, #tpu.memory_space<any>> -> memref<128xf32, #tpu.memory_space<any>>
      %c0_i32_121 = arith.constant 0 : i32
      %265 = tpu.memref_slice %arg20[%c1_i32_118, %c0_i32_121] : memref<8x128xf32, #tpu.memory_space<vmem>> -> memref<1x128xf32, #tpu.memory_space<vmem>>
      %266 = tpu.memref_squeeze %265 : memref<1x128xf32, #tpu.memory_space<vmem>> -> memref<128xf32, #tpu.memory_space<vmem>>
      %267 = tpu.memref_slice %arg22[%c1_i32_119] : memref<8x!tpu.dma_semaphore, #tpu.memory_space<semaphore_mem>> -> memref<1x!tpu.dma_semaphore, #tpu.memory_space<semaphore_mem>>
      %268 = tpu.memref_squeeze %267 : memref<1x!tpu.dma_semaphore, #tpu.memory_space<semaphore_mem>> -> memref<!tpu.dma_semaphore, #tpu.memory_space<semaphore_mem>>
      tpu.wait_dma2 semaphore(%268 : memref<!tpu.dma_semaphore, #tpu.memory_space<semaphore_mem>>) src(%264 : memref<128xf32, #tpu.memory_space<any>>) dst(%266 : memref<128xf32, #tpu.memory_space<vmem>>)
      %c2_i32_122 = arith.constant 2 : i32
      %c2_i32_123 = arith.constant 2 : i32
      %c0_i32_124 = arith.constant 0 : i32
      %269 = tpu.memref_slice %arg3[%205, %c0_i32_124] : memref<256x128xf32, #tpu.memory_space<any>> -> memref<1x128xf32, #tpu.memory_space<any>>
      %270 = tpu.memref_squeeze %269 : memref<1x128xf32, #tpu.memory_space<any>> -> memref<128xf32, #tpu.memory_space<any>>
      %c0_i32_125 = arith.constant 0 : i32
      %271 = tpu.memref_slice %arg20[%c2_i32_122, %c0_i32_125] : memref<8x128xf32, #tpu.memory_space<vmem>> -> memref<1x128xf32, #tpu.memory_space<vmem>>
      %272 = tpu.memref_squeeze %271 : memref<1x128xf32, #tpu.memory_space<vmem>> -> memref<128xf32, #tpu.memory_space<vmem>>
      %273 = tpu.memref_slice %arg22[%c2_i32_123] : memref<8x!tpu.dma_semaphore, #tpu.memory_space<semaphore_mem>> -> memref<1x!tpu.dma_semaphore, #tpu.memory_space<semaphore_mem>>
      %274 = tpu.memref_squeeze %273 : memref<1x!tpu.dma_semaphore, #tpu.memory_space<semaphore_mem>> -> memref<!tpu.dma_semaphore, #tpu.memory_space<semaphore_mem>>
      tpu.wait_dma2 semaphore(%274 : memref<!tpu.dma_semaphore, #tpu.memory_space<semaphore_mem>>) src(%270 : memref<128xf32, #tpu.memory_space<any>>) dst(%272 : memref<128xf32, #tpu.memory_space<vmem>>)
      %c3_i32_126 = arith.constant 3 : i32
      %c3_i32_127 = arith.constant 3 : i32
      %c0_i32_128 = arith.constant 0 : i32
      %275 = tpu.memref_slice %arg3[%214, %c0_i32_128] : memref<256x128xf32, #tpu.memory_space<any>> -> memref<1x128xf32, #tpu.memory_space<any>>
      %276 = tpu.memref_squeeze %275 : memref<1x128xf32, #tpu.memory_space<any>> -> memref<128xf32, #tpu.memory_space<any>>
      %c0_i32_129 = arith.constant 0 : i32
      %277 = tpu.memref_slice %arg20[%c3_i32_126, %c0_i32_129] : memref<8x128xf32, #tpu.memory_space<vmem>> -> memref<1x128xf32, #tpu.memory_space<vmem>>
      %278 = tpu.memref_squeeze %277 : memref<1x128xf32, #tpu.memory_space<vmem>> -> memref<128xf32, #tpu.memory_space<vmem>>
      %279 = tpu.memref_slice %arg22[%c3_i32_127] : memref<8x!tpu.dma_semaphore, #tpu.memory_space<semaphore_mem>> -> memref<1x!tpu.dma_semaphore, #tpu.memory_space<semaphore_mem>>
      %280 = tpu.memref_squeeze %279 : memref<1x!tpu.dma_semaphore, #tpu.memory_space<semaphore_mem>> -> memref<!tpu.dma_semaphore, #tpu.memory_space<semaphore_mem>>
      tpu.wait_dma2 semaphore(%280 : memref<!tpu.dma_semaphore, #tpu.memory_space<semaphore_mem>>) src(%276 : memref<128xf32, #tpu.memory_space<any>>) dst(%278 : memref<128xf32, #tpu.memory_space<vmem>>)
      %c4_i32_130 = arith.constant 4 : i32
      %c4_i32_131 = arith.constant 4 : i32
      %c0_i32_132 = arith.constant 0 : i32
      %281 = tpu.memref_slice %arg3[%223, %c0_i32_132] : memref<256x128xf32, #tpu.memory_space<any>> -> memref<1x128xf32, #tpu.memory_space<any>>
      %282 = tpu.memref_squeeze %281 : memref<1x128xf32, #tpu.memory_space<any>> -> memref<128xf32, #tpu.memory_space<any>>
      %c0_i32_133 = arith.constant 0 : i32
      %283 = tpu.memref_slice %arg20[%c4_i32_130, %c0_i32_133] : memref<8x128xf32, #tpu.memory_space<vmem>> -> memref<1x128xf32, #tpu.memory_space<vmem>>
      %284 = tpu.memref_squeeze %283 : memref<1x128xf32, #tpu.memory_space<vmem>> -> memref<128xf32, #tpu.memory_space<vmem>>
      %285 = tpu.memref_slice %arg22[%c4_i32_131] : memref<8x!tpu.dma_semaphore, #tpu.memory_space<semaphore_mem>> -> memref<1x!tpu.dma_semaphore, #tpu.memory_space<semaphore_mem>>
      %286 = tpu.memref_squeeze %285 : memref<1x!tpu.dma_semaphore, #tpu.memory_space<semaphore_mem>> -> memref<!tpu.dma_semaphore, #tpu.memory_space<semaphore_mem>>
      tpu.wait_dma2 semaphore(%286 : memref<!tpu.dma_semaphore, #tpu.memory_space<semaphore_mem>>) src(%282 : memref<128xf32, #tpu.memory_space<any>>) dst(%284 : memref<128xf32, #tpu.memory_space<vmem>>)
      %c5_i32_134 = arith.constant 5 : i32
      %c5_i32_135 = arith.constant 5 : i32
      %c0_i32_136 = arith.constant 0 : i32
      %287 = tpu.memref_slice %arg3[%232, %c0_i32_136] : memref<256x128xf32, #tpu.memory_space<any>> -> memref<1x128xf32, #tpu.memory_space<any>>
      %288 = tpu.memref_squeeze %287 : memref<1x128xf32, #tpu.memory_space<any>> -> memref<128xf32, #tpu.memory_space<any>>
      %c0_i32_137 = arith.constant 0 : i32
      %289 = tpu.memref_slice %arg20[%c5_i32_134, %c0_i32_137] : memref<8x128xf32, #tpu.memory_space<vmem>> -> memref<1x128xf32, #tpu.memory_space<vmem>>
      %290 = tpu.memref_squeeze %289 : memref<1x128xf32, #tpu.memory_space<vmem>> -> memref<128xf32, #tpu.memory_space<vmem>>
      %291 = tpu.memref_slice %arg22[%c5_i32_135] : memref<8x!tpu.dma_semaphore, #tpu.memory_space<semaphore_mem>> -> memref<1x!tpu.dma_semaphore, #tpu.memory_space<semaphore_mem>>
      %292 = tpu.memref_squeeze %291 : memref<1x!tpu.dma_semaphore, #tpu.memory_space<semaphore_mem>> -> memref<!tpu.dma_semaphore, #tpu.memory_space<semaphore_mem>>
      tpu.wait_dma2 semaphore(%292 : memref<!tpu.dma_semaphore, #tpu.memory_space<semaphore_mem>>) src(%288 : memref<128xf32, #tpu.memory_space<any>>) dst(%290 : memref<128xf32, #tpu.memory_space<vmem>>)
      %c6_i32_138 = arith.constant 6 : i32
      %c6_i32_139 = arith.constant 6 : i32
      %c0_i32_140 = arith.constant 0 : i32
      %293 = tpu.memref_slice %arg3[%241, %c0_i32_140] : memref<256x128xf32, #tpu.memory_space<any>> -> memref<1x128xf32, #tpu.memory_space<any>>
      %294 = tpu.memref_squeeze %293 : memref<1x128xf32, #tpu.memory_space<any>> -> memref<128xf32, #tpu.memory_space<any>>
      %c0_i32_141 = arith.constant 0 : i32
      %295 = tpu.memref_slice %arg20[%c6_i32_138, %c0_i32_141] : memref<8x128xf32, #tpu.memory_space<vmem>> -> memref<1x128xf32, #tpu.memory_space<vmem>>
      %296 = tpu.memref_squeeze %295 : memref<1x128xf32, #tpu.memory_space<vmem>> -> memref<128xf32, #tpu.memory_space<vmem>>
      %297 = tpu.memref_slice %arg22[%c6_i32_139] : memref<8x!tpu.dma_semaphore, #tpu.memory_space<semaphore_mem>> -> memref<1x!tpu.dma_semaphore, #tpu.memory_space<semaphore_mem>>
      %298 = tpu.memref_squeeze %297 : memref<1x!tpu.dma_semaphore, #tpu.memory_space<semaphore_mem>> -> memref<!tpu.dma_semaphore, #tpu.memory_space<semaphore_mem>>
      tpu.wait_dma2 semaphore(%298 : memref<!tpu.dma_semaphore, #tpu.memory_space<semaphore_mem>>) src(%294 : memref<128xf32, #tpu.memory_space<any>>) dst(%296 : memref<128xf32, #tpu.memory_space<vmem>>)
      %c7_i32_142 = arith.constant 7 : i32
      %c7_i32_143 = arith.constant 7 : i32
      %c0_i32_144 = arith.constant 0 : i32
      %299 = tpu.memref_slice %arg3[%250, %c0_i32_144] : memref<256x128xf32, #tpu.memory_space<any>> -> memref<1x128xf32, #tpu.memory_space<any>>
      %300 = tpu.memref_squeeze %299 : memref<1x128xf32, #tpu.memory_space<any>> -> memref<128xf32, #tpu.memory_space<any>>
      %c0_i32_145 = arith.constant 0 : i32
      %301 = tpu.memref_slice %arg20[%c7_i32_142, %c0_i32_145] : memref<8x128xf32, #tpu.memory_space<vmem>> -> memref<1x128xf32, #tpu.memory_space<vmem>>
      %302 = tpu.memref_squeeze %301 : memref<1x128xf32, #tpu.memory_space<vmem>> -> memref<128xf32, #tpu.memory_space<vmem>>
      %303 = tpu.memref_slice %arg22[%c7_i32_143] : memref<8x!tpu.dma_semaphore, #tpu.memory_space<semaphore_mem>> -> memref<1x!tpu.dma_semaphore, #tpu.memory_space<semaphore_mem>>
      %304 = tpu.memref_squeeze %303 : memref<1x!tpu.dma_semaphore, #tpu.memory_space<semaphore_mem>> -> memref<!tpu.dma_semaphore, #tpu.memory_space<semaphore_mem>>
      tpu.wait_dma2 semaphore(%304 : memref<!tpu.dma_semaphore, #tpu.memory_space<semaphore_mem>>) src(%300 : memref<128xf32, #tpu.memory_space<any>>) dst(%302 : memref<128xf32, #tpu.memory_space<vmem>>)
      %c0_146 = arith.constant 0 : index
      %c0_147 = arith.constant 0 : index
      %305 = vector.load %arg20[%c0_146, %c0_147] : memref<8x128xf32, #tpu.memory_space<vmem>>, vector<8x128xf32>
      %c0_148 = arith.constant 0 : index
      %c0_149 = arith.constant 0 : index
      %306 = vector.load %arg4[%c0_148, %c0_149] : memref<8x128xf32, #tpu.memory_space<vmem>>, vector<8x128xf32>
      %307 = arith.addf %305, %306 : vector<8x128xf32>
      %c0_150 = arith.constant 0 : index
      %c0_151 = arith.constant 0 : index
      %308 = vector.load %arg20[%c0_150, %c0_151] : memref<8x128xf32, #tpu.memory_space<vmem>>, vector<8x128xf32>
      tpu.vector_store %arg20[%c0_150, %c0_151], %307 {strides = array<i32>} : memref<8x128xf32, #tpu.memory_space<vmem>>, vector<8x128xf32>,
    } else {
    }
    %c0 = arith.constant 0 : index
    %c0_1 = arith.constant 0 : index
    %3 = vector.load %arg20[%c0, %c0_1] : memref<8x128xf32, #tpu.memory_space<vmem>>, vector<8x128xf32>
    %4 = tpu.iota {dimensions = array<i32: 0>} : vector<8x8xi32>
    %5 = tpu.iota {dimensions = array<i32: 1>} : vector<8x8xi32>
    %6 = arith.cmpi sle, %5, %4 : vector<8x8xi32>
    %cst = arith.constant 0.000000e+00 : f32
    %cst_2 = arith.constant -1.000000e+30 : f32
    %7 = vector.broadcast %cst : f32 to vector<8x8xf32>
    %8 = vector.broadcast %cst_2 : f32 to vector<8x8xf32>
    %9 = arith.select %6, %7, %8 : vector<8x8xi1>, vector<8x8xf32>
    %c0_3 = arith.constant 0 : index
    %c0_4 = arith.constant 0 : index
    %c0_5 = arith.constant 0 : index
    %10 = vector.load %arg5[%c0_3, %c0_4, %c0_5] : memref<1x1x128xf32, #tpu.memory_space<vmem>>, vector<1x1x128xf32>
    %11 = vector.shape_cast %10 : vector<1x1x128xf32> to vector<1x128xf32>
    %c0_6 = arith.constant 0 : index
    %c0_7 = arith.constant 0 : index
    %c0_8 = arith.constant 0 : index
    %12 = vector.load %arg6[%c0_6, %c0_7, %c0_8] : memref<1x1x128xf32, #tpu.memory_space<vmem>>, vector<1x1x128xf32>
    %13 = vector.shape_cast %12 : vector<1x1x128xf32> to vector<1x128xf32>
    %cst_9 = arith.constant dense<0.000000e+00> : vector<8xf32>
    %14 = vector.multi_reduction <add>, %3, %cst_9 [1] : vector<8x128xf32> to vector<8xf32>
    %15 = vector.shape_cast %14 : vector<8xf32> to vector<8x1xf32>
    %cst_10 = arith.constant 1.280000e+02 : f32
    %16 = vector.broadcast %cst_10 : f32 to vector<8x1xf32>
    %17 = arith.divf %15, %16 : vector<8x1xf32>
    %18 = vector.broadcast %17 : vector<8x1xf32> to vector<8x128xf32>
    %19 = arith.subf %3, %18 : vector<8x128xf32>
    %20 = arith.mulf %19, %19 : vector<8x128xf32>
    %cst_11 = arith.constant dense<0.000000e+00> : vector<8xf32>
    %21 = vector.multi_reduction <add>, %20, %cst_11 [1] : vector<8x128xf32> to vector<8xf32>
    %22 = vector.shape_cast %21 : vector<8xf32> to vector<8x1xf32>
    %cst_12 = arith.constant 1.280000e+02 : f32
    %23 = vector.broadcast %cst_12 : f32 to vector<8x1xf32>
    %24 = arith.divf %22, %23 : vector<8x1xf32>
    %25 = vector.broadcast %11 : vector<1x128xf32> to vector<8x128xf32>
    %26 = arith.mulf %25, %19 : vector<8x128xf32>
    %cst_13 = arith.constant 9.99999974E-6 : f32
    %27 = vector.broadcast %cst_13 : f32 to vector<8x1xf32>
    %28 = arith.addf %24, %27 : vector<8x1xf32>
    %29 = math.rsqrt %28 : vector<8x1xf32>
    %30 = vector.broadcast %29 : vector<8x1xf32> to vector<8x128xf32>
    %31 = arith.mulf %26, %30 : vector<8x128xf32>
    %32 = vector.broadcast %13 : vector<1x128xf32> to vector<8x128xf32>
    %33 = arith.addf %31, %32 : vector<8x128xf32>
    %34 = arith.truncf %33 : vector<8x128xf32> to vector<8x128xbf16>
    %c0_14 = arith.constant 0 : index
    %c0_15 = arith.constant 0 : index
    %c0_16 = arith.constant 0 : index
    %35 = vector.load %arg7[%c0_14, %c0_15, %c0_16] : memref<1x128x384xbf16, #tpu.memory_space<vmem>>, vector<1x128x384xbf16>
    %36 = vector.shape_cast %35 : vector<1x128x384xbf16> to vector<128x384xbf16>
    %cst_17 = arith.constant dense<0.000000e+00> : vector<8x384xf32>
    %37 = tpu.matmul %34, %36, %cst_17 {dimension_numbers = #tpu.dot_dimension_numbers<[1], [0], [0], [1], [0, 0, 1, 1], [], []>} : vector<8x128xbf16>, vector<128x384xbf16>, vector<8x384xf32> -> vector<8x384xf32>
    %38 = vector.extract_strided_slice %37 {offsets = [0, 0], sizes = [8, 128], strides = [1, 1]} : vector<8x384xf32> to vector<8x128xf32>
    %39 = arith.truncf %38 : vector<8x128xf32> to vector<8x128xbf16>
    %40 = vector.extract_strided_slice %37 {offsets = [0, 128], sizes = [8, 128], strides = [1, 1]} : vector<8x384xf32> to vector<8x128xf32>
    %41 = arith.truncf %40 : vector<8x128xf32> to vector<8x128xbf16>
    %42 = vector.extract_strided_slice %37 {offsets = [0, 256], sizes = [8, 128], strides = [1, 1]} : vector<8x384xf32> to vector<8x128xf32>
    %43 = arith.truncf %42 : vector<8x128xf32> to vector<8x128xbf16>
    %44 = vector.extract_strided_slice %39 {offsets = [0, 0], sizes = [8, 32], strides = [1, 1]} : vector<8x128xbf16> to vector<8x32xbf16>
    %45 = vector.extract_strided_slice %41 {offsets = [0, 0], sizes = [8, 32], strides = [1, 1]} : vector<8x128xbf16> to vector<8x32xbf16>
    %cst_18 = arith.constant dense<0.000000e+00> : vector<8x8xf32>
    %46 = tpu.matmul %44, %45, %cst_18 {dimension_numbers = #tpu.dot_dimension_numbers<[1], [1], [0], [0], [0, 0, 1, 0], [], []>} : vector<8x32xbf16>, vector<8x32xbf16>, vector<8x8xf32> -> vector<8x8xf32>
    %47 = arith.addf %46, %9 : vector<8x8xf32>
    %cst_19 = arith.constant dense<0xFF800000> : vector<8xf32>
    %48 = vector.multi_reduction <maximumf>, %47, %cst_19 [1] : vector<8x8xf32> to vector<8xf32>
    %49 = vector.shape_cast %48 : vector<8xf32> to vector<8x1xf32>
    %50 = vector.broadcast %49 : vector<8x1xf32> to vector<8x8xf32>
    %51 = arith.subf %47, %50 : vector<8x8xf32>
    %52 = math.exp %51 : vector<8x8xf32>
    %cst_20 = arith.constant dense<0.000000e+00> : vector<8xf32>
    %53 = vector.multi_reduction <add>, %52, %cst_20 [1] : vector<8x8xf32> to vector<8xf32>
    %54 = vector.shape_cast %53 : vector<8xf32> to vector<8x1xf32>
    %55 = tpu.reciprocal %54 {approx = true} : vector<8x1xf32> -> vector<8x1xf32>
    %56 = vector.broadcast %55 : vector<8x1xf32> to vector<8x8xf32>
    %57 = arith.mulf %52, %56 : vector<8x8xf32>
    %58 = arith.truncf %57 : vector<8x8xf32> to vector<8x8xbf16>
    %59 = vector.extract_strided_slice %43 {offsets = [0, 0], sizes = [8, 32], strides = [1, 1]} : vector<8x128xbf16> to vector<8x32xbf16>
    %cst_21 = arith.constant dense<0.000000e+00> : vector<8x32xf32>
    %60 = tpu.matmul %58, %59, %cst_21 {dimension_numbers = #tpu.dot_dimension_numbers<[1], [0], [0], [1], [0, 0, 1, 1], [], []>} : vector<8x8xbf16>, vector<8x32xbf16>, vector<8x32xf32> -> vector<8x32xf32>
    %c0_22 = arith.constant 0 : index
    %c0_23 = arith.constant 0 : index
    %61 = vector.load %arg21[%c0_22, %c0_23] : memref<8x128xf32, #tpu.memory_space<vmem>>, vector<8x32xf32>
    tpu.vector_store %arg21[%c0_22, %c0_23], %60 {strides = array<i32>} : memref<8x128xf32, #tpu.memory_space<vmem>>, vector<8x32xf32>,
    %62 = vector.extract_strided_slice %39 {offsets = [0, 32], sizes = [8, 32], strides = [1, 1]} : vector<8x128xbf16> to vector<8x32xbf16>
    %63 = vector.extract_strided_slice %41 {offsets = [0, 32], sizes = [8, 32], strides = [1, 1]} : vector<8x128xbf16> to vector<8x32xbf16>
    %cst_24 = arith.constant dense<0.000000e+00> : vector<8x8xf32>
    %64 = tpu.matmul %62, %63, %cst_24 {dimension_numbers = #tpu.dot_dimension_numbers<[1], [1], [0], [0], [0, 0, 1, 0], [], []>} : vector<8x32xbf16>, vector<8x32xbf16>, vector<8x8xf32> -> vector<8x8xf32>
    %65 = arith.addf %64, %9 : vector<8x8xf32>
    %cst_25 = arith.constant dense<0xFF800000> : vector<8xf32>
    %66 = vector.multi_reduction <maximumf>, %65, %cst_25 [1] : vector<8x8xf32> to vector<8xf32>
    %67 = vector.shape_cast %66 : vector<8xf32> to vector<8x1xf32>
    %68 = vector.broadcast %67 : vector<8x1xf32> to vector<8x8xf32>
    %69 = arith.subf %65, %68 : vector<8x8xf32>
    %70 = math.exp %69 : vector<8x8xf32>
    %cst_26 = arith.constant dense<0.000000e+00> : vector<8xf32>
    %71 = vector.multi_reduction <add>, %70, %cst_26 [1] : vector<8x8xf32> to vector<8xf32>
    %72 = vector.shape_cast %71 : vector<8xf32> to vector<8x1xf32>
    %73 = tpu.reciprocal %72 {approx = true} : vector<8x1xf32> -> vector<8x1xf32>
    %74 = vector.broadcast %73 : vector<8x1xf32> to vector<8x8xf32>
    %75 = arith.mulf %70, %74 : vector<8x8xf32>
    %76 = arith.truncf %75 : vector<8x8xf32> to vector<8x8xbf16>
    %77 = vector.extract_strided_slice %43 {offsets = [0, 32], sizes = [8, 32], strides = [1, 1]} : vector<8x128xbf16> to vector<8x32xbf16>
    %cst_27 = arith.constant dense<0.000000e+00> : vector<8x32xf32>
    %78 = tpu.matmul %76, %77, %cst_27 {dimension_numbers = #tpu.dot_dimension_numbers<[1], [0], [0], [1], [0, 0, 1, 1], [], []>} : vector<8x8xbf16>, vector<8x32xbf16>, vector<8x32xf32> -> vector<8x32xf32>
    %c0_28 = arith.constant 0 : index
    %c32 = arith.constant 32 : index
    %79 = vector.load %arg21[%c0_28, %c32] : memref<8x128xf32, #tpu.memory_space<vmem>>, vector<8x32xf32>
    tpu.vector_store %arg21[%c0_28, %c32], %78 {strides = array<i32>} : memref<8x128xf32, #tpu.memory_space<vmem>>, vector<8x32xf32>,
    %80 = vector.extract_strided_slice %39 {offsets = [0, 64], sizes = [8, 32], strides = [1, 1]} : vector<8x128xbf16> to vector<8x32xbf16>
    %81 = vector.extract_strided_slice %41 {offsets = [0, 64], sizes = [8, 32], strides = [1, 1]} : vector<8x128xbf16> to vector<8x32xbf16>
    %cst_29 = arith.constant dense<0.000000e+00> : vector<8x8xf32>
    %82 = tpu.matmul %80, %81, %cst_29 {dimension_numbers = #tpu.dot_dimension_numbers<[1], [1], [0], [0], [0, 0, 1, 0], [], []>} : vector<8x32xbf16>, vector<8x32xbf16>, vector<8x8xf32> -> vector<8x8xf32>
    %83 = arith.addf %82, %9 : vector<8x8xf32>
    %cst_30 = arith.constant dense<0xFF800000> : vector<8xf32>
    %84 = vector.multi_reduction <maximumf>, %83, %cst_30 [1] : vector<8x8xf32> to vector<8xf32>
    %85 = vector.shape_cast %84 : vector<8xf32> to vector<8x1xf32>
    %86 = vector.broadcast %85 : vector<8x1xf32> to vector<8x8xf32>
    %87 = arith.subf %83, %86 : vector<8x8xf32>
    %88 = math.exp %87 : vector<8x8xf32>
    %cst_31 = arith.constant dense<0.000000e+00> : vector<8xf32>
    %89 = vector.multi_reduction <add>, %88, %cst_31 [1] : vector<8x8xf32> to vector<8xf32>
    %90 = vector.shape_cast %89 : vector<8xf32> to vector<8x1xf32>
    %91 = tpu.reciprocal %90 {approx = true} : vector<8x1xf32> -> vector<8x1xf32>
    %92 = vector.broadcast %91 : vector<8x1xf32> to vector<8x8xf32>
    %93 = arith.mulf %88, %92 : vector<8x8xf32>
    %94 = arith.truncf %93 : vector<8x8xf32> to vector<8x8xbf16>
    %95 = vector.extract_strided_slice %43 {offsets = [0, 64], sizes = [8, 32], strides = [1, 1]} : vector<8x128xbf16> to vector<8x32xbf16>
    %cst_32 = arith.constant dense<0.000000e+00> : vector<8x32xf32>
    %96 = tpu.matmul %94, %95, %cst_32 {dimension_numbers = #tpu.dot_dimension_numbers<[1], [0], [0], [1], [0, 0, 1, 1], [], []>} : vector<8x8xbf16>, vector<8x32xbf16>, vector<8x32xf32> -> vector<8x32xf32>
    %c0_33 = arith.constant 0 : index
    %c64 = arith.constant 64 : index
    %97 = vector.load %arg21[%c0_33, %c64] : memref<8x128xf32, #tpu.memory_space<vmem>>, vector<8x32xf32>
    tpu.vector_store %arg21[%c0_33, %c64], %96 {strides = array<i32>} : memref<8x128xf32, #tpu.memory_space<vmem>>, vector<8x32xf32>,
    %98 = vector.extract_strided_slice %39 {offsets = [0, 96], sizes = [8, 32], strides = [1, 1]} : vector<8x128xbf16> to vector<8x32xbf16>
    %99 = vector.extract_strided_slice %41 {offsets = [0, 96], sizes = [8, 32], strides = [1, 1]} : vector<8x128xbf16> to vector<8x32xbf16>
    %cst_34 = arith.constant dense<0.000000e+00> : vector<8x8xf32>
    %100 = tpu.matmul %98, %99, %cst_34 {dimension_numbers = #tpu.dot_dimension_numbers<[1], [1], [0], [0], [0, 0, 1, 0], [], []>} : vector<8x32xbf16>, vector<8x32xbf16>, vector<8x8xf32> -> vector<8x8xf32>
    %101 = arith.addf %100, %9 : vector<8x8xf32>
    %cst_35 = arith.constant dense<0xFF800000> : vector<8xf32>
    %102 = vector.multi_reduction <maximumf>, %101, %cst_35 [1] : vector<8x8xf32> to vector<8xf32>
    %103 = vector.shape_cast %102 : vector<8xf32> to vector<8x1xf32>
    %104 = vector.broadcast %103 : vector<8x1xf32> to vector<8x8xf32>
    %105 = arith.subf %101, %104 : vector<8x8xf32>
    %106 = math.exp %105 : vector<8x8xf32>
    %cst_36 = arith.constant dense<0.000000e+00> : vector<8xf32>
    %107 = vector.multi_reduction <add>, %106, %cst_36 [1] : vector<8x8xf32> to vector<8xf32>
    %108 = vector.shape_cast %107 : vector<8xf32> to vector<8x1xf32>
    %109 = tpu.reciprocal %108 {approx = true} : vector<8x1xf32> -> vector<8x1xf32>
    %110 = vector.broadcast %109 : vector<8x1xf32> to vector<8x8xf32>
    %111 = arith.mulf %106, %110 : vector<8x8xf32>
    %112 = arith.truncf %111 : vector<8x8xf32> to vector<8x8xbf16>
    %113 = vector.extract_strided_slice %43 {offsets = [0, 96], sizes = [8, 32], strides = [1, 1]} : vector<8x128xbf16> to vector<8x32xbf16>
    %cst_37 = arith.constant dense<0.000000e+00> : vector<8x32xf32>
    %114 = tpu.matmul %112, %113, %cst_37 {dimension_numbers = #tpu.dot_dimension_numbers<[1], [0], [0], [1], [0, 0, 1, 1], [], []>} : vector<8x8xbf16>, vector<8x32xbf16>, vector<8x32xf32> -> vector<8x32xf32>
    %c0_38 = arith.constant 0 : index
    %c96 = arith.constant 96 : index
    %115 = vector.load %arg21[%c0_38, %c96] : memref<8x128xf32, #tpu.memory_space<vmem>>, vector<8x32xf32>
    tpu.vector_store %arg21[%c0_38, %c96], %114 {strides = array<i32>} : memref<8x128xf32, #tpu.memory_space<vmem>>, vector<8x32xf32>,
    %c0_39 = arith.constant 0 : index
    %c0_40 = arith.constant 0 : index
    %116 = vector.load %arg21[%c0_39, %c0_40] : memref<8x128xf32, #tpu.memory_space<vmem>>, vector<8x128xf32>
    %117 = arith.truncf %116 : vector<8x128xf32> to vector<8x128xbf16>
    %c0_41 = arith.constant 0 : index
    %c0_42 = arith.constant 0 : index
    %c0_43 = arith.constant 0 : index
    %118 = vector.load %arg8[%c0_41, %c0_42, %c0_43] : memref<1x128x128xbf16, #tpu.memory_space<vmem>>, vector<1x128x128xbf16>
    %119 = vector.shape_cast %118 : vector<1x128x128xbf16> to vector<128x128xbf16>
    %cst_44 = arith.constant dense<0.000000e+00> : vector<8x128xf32>
    %120 = tpu.matmul %117, %119, %cst_44 {dimension_numbers = #tpu.dot_dimension_numbers<[1], [0], [0], [1], [0, 0, 1, 1], [], []>} : vector<8x128xbf16>, vector<128x128xbf16>, vector<8x128xf32> -> vector<8x128xf32>
    %121 = arith.addf %3, %120 : vector<8x128xf32>
    %c0_45 = arith.constant 0 : index
    %c0_46 = arith.constant 0 : index
    %c0_47 = arith.constant 0 : index
    %122 = vector.load %arg9[%c0_45, %c0_46, %c0_47] : memref<1x1x128xf32, #tpu.memory_space<vmem>>, vector<1x1x128xf32>
    %123 = vector.shape_cast %122 : vector<1x1x128xf32> to vector<1x128xf32>
    %124 = vector.broadcast %123 : vector<1x128xf32> to vector<8x128xf32>
    %125 = arith.addf %121, %124 : vector<8x128xf32>
    %c0_48 = arith.constant 0 : index
    %c0_49 = arith.constant 0 : index
    %c0_50 = arith.constant 0 : index
    %126 = vector.load %arg10[%c0_48, %c0_49, %c0_50] : memref<1x1x128xf32, #tpu.memory_space<vmem>>, vector<1x1x128xf32>
    %127 = vector.shape_cast %126 : vector<1x1x128xf32> to vector<1x128xf32>
    %c0_51 = arith.constant 0 : index
    %c0_52 = arith.constant 0 : index
    %c0_53 = arith.constant 0 : index
    %128 = vector.load %arg11[%c0_51, %c0_52, %c0_53] : memref<1x1x128xf32, #tpu.memory_space<vmem>>, vector<1x1x128xf32>
    %129 = vector.shape_cast %128 : vector<1x1x128xf32> to vector<1x128xf32>
    %cst_54 = arith.constant dense<0.000000e+00> : vector<8xf32>
    %130 = vector.multi_reduction <add>, %125, %cst_54 [1] : vector<8x128xf32> to vector<8xf32>
    %131 = vector.shape_cast %130 : vector<8xf32> to vector<8x1xf32>
    %cst_55 = arith.constant 1.280000e+02 : f32
    %132 = vector.broadcast %cst_55 : f32 to vector<8x1xf32>
    %133 = arith.divf %131, %132 : vector<8x1xf32>
    %134 = vector.broadcast %133 : vector<8x1xf32> to vector<8x128xf32>
    %135 = arith.subf %125, %134 : vector<8x128xf32>
    %136 = arith.mulf %135, %135 : vector<8x128xf32>
    %cst_56 = arith.constant dense<0.000000e+00> : vector<8xf32>
    %137 = vector.multi_reduction <add>, %136, %cst_56 [1] : vector<8x128xf32> to vector<8xf32>
    %138 = vector.shape_cast %137 : vector<8xf32> to vector<8x1xf32>
    %cst_57 = arith.constant 1.280000e+02 : f32
    %139 = vector.broadcast %cst_57 : f32 to vector<8x1xf32>
    %140 = arith.divf %138, %139 : vector<8x1xf32>
    %141 = vector.broadcast %127 : vector<1x128xf32> to vector<8x128xf32>
    %142 = arith.mulf %141, %135 : vector<8x128xf32>
    %cst_58 = arith.constant 9.99999974E-6 : f32
    %143 = vector.broadcast %cst_58 : f32 to vector<8x1xf32>
    %144 = arith.addf %140, %143 : vector<8x1xf32>
    %145 = math.rsqrt %144 : vector<8x1xf32>
    %146 = vector.broadcast %145 : vector<8x1xf32> to vector<8x128xf32>
    %147 = arith.mulf %142, %146 : vector<8x128xf32>
    %148 = vector.broadcast %129 : vector<1x128xf32> to vector<8x128xf32>
    %149 = arith.addf %147, %148 : vector<8x128xf32>
    %150 = arith.truncf %149 : vector<8x128xf32> to vector<8x128xbf16>
    %c0_59 = arith.constant 0 : index
    %c0_60 = arith.constant 0 : index
    %c0_61 = arith.constant 0 : index
    %151 = vector.load %arg12[%c0_59, %c0_60, %c0_61] : memref<1x128x512xbf16, #tpu.memory_space<vmem>>, vector<1x128x512xbf16>
    %152 = vector.shape_cast %151 : vector<1x128x512xbf16> to vector<128x512xbf16>
    %cst_62 = arith.constant dense<0.000000e+00> : vector<8x512xf32>
    %153 = tpu.matmul %150, %152, %cst_62 {dimension_numbers = #tpu.dot_dimension_numbers<[1], [0], [0], [1], [0, 0, 1, 1], [], []>} : vector<8x128xbf16>, vector<128x512xbf16>, vector<8x512xf32> -> vector<8x512xf32>
    %c0_63 = arith.constant 0 : index
    %c0_64 = arith.constant 0 : index
    %c0_65 = arith.constant 0 : index
    %154 = vector.load %arg13[%c0_63, %c0_64, %c0_65] : memref<1x1x512xf32, #tpu.memory_space<vmem>>, vector<1x1x512xf32>
    %155 = vector.shape_cast %154 : vector<1x1x512xf32> to vector<1x512xf32>
    %156 = vector.broadcast %155 : vector<1x512xf32> to vector<8x512xf32>
    %157 = arith.addf %153, %156 : vector<8x512xf32>
    %cst_66 = arith.constant 5.000000e-01 : f32
    %158 = vector.broadcast %cst_66 : f32 to vector<8x512xf32>
    %159 = arith.mulf %158, %157 : vector<8x512xf32>
    %cst_67 = arith.constant 4.471500e-02 : f32
    %160 = vector.broadcast %cst_67 : f32 to vector<8x512xf32>
    %161 = arith.mulf %160, %157 : vector<8x512xf32>
    %162 = arith.mulf %161, %157 : vector<8x512xf32>
    %163 = arith.mulf %162, %157 : vector<8x512xf32>
    %164 = arith.addf %157, %163 : vector<8x512xf32>
    %cst_68 = arith.constant 0.797884583 : f32
    %165 = vector.broadcast %cst_68 : f32 to vector<8x512xf32>
    %166 = arith.mulf %165, %164 : vector<8x512xf32>
    %167 = math.tanh %166 : vector<8x512xf32>
    %cst_69 = arith.constant 1.000000e+00 : f32
    %168 = vector.broadcast %cst_69 : f32 to vector<8x512xf32>
    %169 = arith.addf %168, %167 : vector<8x512xf32>
    %170 = arith.mulf %159, %169 : vector<8x512xf32>
    %171 = arith.truncf %170 : vector<8x512xf32> to vector<8x512xbf16>
    %c0_70 = arith.constant 0 : index
    %c0_71 = arith.constant 0 : index
    %c0_72 = arith.constant 0 : index
    %172 = vector.load %arg14[%c0_70, %c0_71, %c0_72] : memref<1x512x128xbf16, #tpu.memory_space<vmem>>, vector<1x512x128xbf16>
    %173 = vector.shape_cast %172 : vector<1x512x128xbf16> to vector<512x128xbf16>
    %cst_73 = arith.constant dense<0.000000e+00> : vector<8x128xf32>
    %174 = tpu.matmul %171, %173, %cst_73 {dimension_numbers = #tpu.dot_dimension_numbers<[1], [0], [0], [1], [0, 0, 1, 1], [], []>} : vector<8x512xbf16>, vector<512x128xbf16>, vector<8x128xf32> -> vector<8x128xf32>
    %175 = arith.addf %125, %174 : vector<8x128xf32>
    %c0_74 = arith.constant 0 : index
    %c0_75 = arith.constant 0 : index
    %c0_76 = arith.constant 0 : index
    %176 = vector.load %arg15[%c0_74, %c0_75, %c0_76] : memref<1x1x128xf32, #tpu.memory_space<vmem>>, vector<1x1x128xf32>
    %177 = vector.shape_cast %176 : vector<1x1x128xf32> to vector<1x128xf32>
    %178 = vector.broadcast %177 : vector<1x128xf32> to vector<8x128xf32>
    %179 = arith.addf %175, %178 : vector<8x128xf32>
    %c0_77 = arith.constant 0 : index
    %c0_78 = arith.constant 0 : index
    %180 = vector.load %arg20[%c0_77, %c0_78] : memref<8x128xf32, #tpu.memory_space<vmem>>, vector<8x128xf32>
    tpu.vector_store %arg20[%c0_77, %c0_78], %179 {strides = array<i32>} : memref<8x128xf32, #tpu.memory_space<vmem>>, vector<8x128xf32>,
    %c1_i32 = arith.constant 1 : i32
    %181 = arith.cmpi eq, %arg1, %c1_i32 : i32
    %182 = arith.extui %181 : i1 to i32
    %c0_i32_79 = arith.constant 0 : i32
    %183 = arith.cmpi ne, %182, %c0_i32_79 : i32
    scf.if %183 {
      %c0_80 = arith.constant 0 : index
      %c0_81 = arith.constant 0 : index
      %184 = vector.load %arg16[%c0_80, %c0_81] : memref<1x128xf32, #tpu.memory_space<vmem>>, vector<1x128xf32>
      %c0_82 = arith.constant 0 : index
      %c0_83 = arith.constant 0 : index
      %185 = vector.load %arg17[%c0_82, %c0_83] : memref<1x128xf32, #tpu.memory_space<vmem>>, vector<1x128xf32>
      %cst_84 = arith.constant dense<0.000000e+00> : vector<8xf32>
      %186 = vector.multi_reduction <add>, %179, %cst_84 [1] : vector<8x128xf32> to vector<8xf32>
      %187 = vector.shape_cast %186 : vector<8xf32> to vector<8x1xf32>
      %cst_85 = arith.constant 1.280000e+02 : f32
      %188 = vector.broadcast %cst_85 : f32 to vector<8x1xf32>
      %189 = arith.divf %187, %188 : vector<8x1xf32>
      %190 = vector.broadcast %189 : vector<8x1xf32> to vector<8x128xf32>
      %191 = arith.subf %179, %190 : vector<8x128xf32>
      %192 = arith.mulf %191, %191 : vector<8x128xf32>
      %cst_86 = arith.constant dense<0.000000e+00> : vector<8xf32>
      %193 = vector.multi_reduction <add>, %192, %cst_86 [1] : vector<8x128xf32> to vector<8xf32>
      %194 = vector.shape_cast %193 : vector<8xf32> to vector<8x1xf32>
      %cst_87 = arith.constant 1.280000e+02 : f32
      %195 = vector.broadcast %cst_87 : f32 to vector<8x1xf32>
      %196 = arith.divf %194, %195 : vector<8x1xf32>
      %197 = vector.broadcast %184 : vector<1x128xf32> to vector<8x128xf32>
      %198 = arith.mulf %197, %191 : vector<8x128xf32>
      %cst_88 = arith.constant 9.99999974E-6 : f32
      %199 = vector.broadcast %cst_88 : f32 to vector<8x1xf32>
      %200 = arith.addf %196, %199 : vector<8x1xf32>
      %201 = math.rsqrt %200 : vector<8x1xf32>
      %202 = vector.broadcast %201 : vector<8x1xf32> to vector<8x128xf32>
      %203 = arith.mulf %198, %202 : vector<8x128xf32>
      %204 = vector.broadcast %185 : vector<1x128xf32> to vector<8x128xf32>
      %205 = arith.addf %203, %204 : vector<8x128xf32>
      %206 = arith.truncf %205 : vector<8x128xf32> to vector<8x128xbf16>
      %c0_89 = arith.constant 0 : index
      %c0_90 = arith.constant 0 : index
      %207 = vector.load %arg18[%c0_89, %c0_90] : memref<128x256xbf16, #tpu.memory_space<vmem>>, vector<128x256xbf16>
      %cst_91 = arith.constant dense<0.000000e+00> : vector<8x256xf32>
      %208 = tpu.matmul %206, %207, %cst_91 {dimension_numbers = #tpu.dot_dimension_numbers<[1], [0], [0], [1], [0, 0, 1, 1], [], []>} : vector<8x128xbf16>, vector<128x256xbf16>, vector<8x256xf32> -> vector<8x256xf32>
      %c0_92 = arith.constant 0 : index
      %c0_93 = arith.constant 0 : index
      %209 = vector.load %arg19[%c0_92, %c0_93] : memref<8x256xf32, #tpu.memory_space<vmem>>, vector<8x256xf32>
      tpu.vector_store %arg19[%c0_92, %c0_93], %208 {strides = array<i32>} : memref<8x256xf32, #tpu.memory_space<vmem>>, vector<8x256xf32>,
    } else {
    }
    return
  }
  func.func @transform_1(%arg0: i32, %arg1: i32, %arg2: memref<16xi32, #tpu.memory_space<smem>>) -> (i32, i32) {
    %c0_i32 = arith.constant 0 : i32
    %c0_i32_0 = arith.constant 0 : i32
    %c0_i32_1 = arith.constant 0 : i32
    return %c0_i32, %c0_i32_0 : i32, i32
  }
  func.func @transform_2(%arg0: i32, %arg1: i32, %arg2: memref<16xi32, #tpu.memory_space<smem>>) -> (i32, i32, i32) {
    %c0_i32 = arith.constant 0 : i32
    %c0_i32_0 = arith.constant 0 : i32
    %c0_i32_1 = arith.constant 0 : i32
    return %arg1, %c0_i32, %c0_i32_0 : i32, i32, i32
  }
  func.func @transform_3(%arg0: i32, %arg1: i32, %arg2: memref<16xi32, #tpu.memory_space<smem>>) -> (i32, i32, i32) {
    %c0_i32 = arith.constant 0 : i32
    %c0_i32_0 = arith.constant 0 : i32
    %c0_i32_1 = arith.constant 0 : i32
    return %arg1, %c0_i32, %c0_i32_0 : i32, i32, i32
  }
  func.func @transform_4(%arg0: i32, %arg1: i32, %arg2: memref<16xi32, #tpu.memory_space<smem>>) -> (i32, i32, i32) {
    %c0_i32 = arith.constant 0 : i32
    %c0_i32_0 = arith.constant 0 : i32
    %c0_i32_1 = arith.constant 0 : i32
    return %arg1, %c0_i32, %c0_i32_0 : i32, i32, i32
  }
  func.func @transform_5(%arg0: i32, %arg1: i32, %arg2: memref<16xi32, #tpu.memory_space<smem>>) -> (i32, i32, i32) {
    %c0_i32 = arith.constant 0 : i32
    %c0_i32_0 = arith.constant 0 : i32
    %c0_i32_1 = arith.constant 0 : i32
    return %arg1, %c0_i32, %c0_i32_0 : i32, i32, i32
  }
  func.func @transform_6(%arg0: i32, %arg1: i32, %arg2: memref<16xi32, #tpu.memory_space<smem>>) -> (i32, i32, i32) {
    %c0_i32 = arith.constant 0 : i32
    %c0_i32_0 = arith.constant 0 : i32
    %c0_i32_1 = arith.constant 0 : i32
    return %arg1, %c0_i32, %c0_i32_0 : i32, i32, i32
  }
  func.func @transform_7(%arg0: i32, %arg1: i32, %arg2: memref<16xi32, #tpu.memory_space<smem>>) -> (i32, i32, i32) {
    %c0_i32 = arith.constant 0 : i32
    %c0_i32_0 = arith.constant 0 : i32
    %c0_i32_1 = arith.constant 0 : i32
    return %arg1, %c0_i32, %c0_i32_0 : i32, i32, i32
  }
  func.func @transform_8(%arg0: i32, %arg1: i32, %arg2: memref<16xi32, #tpu.memory_space<smem>>) -> (i32, i32, i32) {
    %c0_i32 = arith.constant 0 : i32
    %c0_i32_0 = arith.constant 0 : i32
    %c0_i32_1 = arith.constant 0 : i32
    return %arg1, %c0_i32, %c0_i32_0 : i32, i32, i32
  }
  func.func @transform_9(%arg0: i32, %arg1: i32, %arg2: memref<16xi32, #tpu.memory_space<smem>>) -> (i32, i32, i32) {
    %c0_i32 = arith.constant 0 : i32
    %c0_i32_0 = arith.constant 0 : i32
    %c0_i32_1 = arith.constant 0 : i32
    return %arg1, %c0_i32, %c0_i32_0 : i32, i32, i32
  }
  func.func @transform_10(%arg0: i32, %arg1: i32, %arg2: memref<16xi32, #tpu.memory_space<smem>>) -> (i32, i32, i32) {
    %c0_i32 = arith.constant 0 : i32
    %c0_i32_0 = arith.constant 0 : i32
    %c0_i32_1 = arith.constant 0 : i32
    return %arg1, %c0_i32, %c0_i32_0 : i32, i32, i32
  }
  func.func @transform_11(%arg0: i32, %arg1: i32, %arg2: memref<16xi32, #tpu.memory_space<smem>>) -> (i32, i32, i32) {
    %c0_i32 = arith.constant 0 : i32
    %c0_i32_0 = arith.constant 0 : i32
    %c0_i32_1 = arith.constant 0 : i32
    return %arg1, %c0_i32, %c0_i32_0 : i32, i32, i32
  }
  func.func @transform_12(%arg0: i32, %arg1: i32, %arg2: memref<16xi32, #tpu.memory_space<smem>>) -> (i32, i32, i32) {
    %c0_i32 = arith.constant 0 : i32
    %c0_i32_0 = arith.constant 0 : i32
    %c0_i32_1 = arith.constant 0 : i32
    return %arg1, %c0_i32, %c0_i32_0 : i32, i32, i32
  }
  func.func @transform_13(%arg0: i32, %arg1: i32, %arg2: memref<16xi32, #tpu.memory_space<smem>>) -> (i32, i32) {
    %c0_i32 = arith.constant 0 : i32
    %c0_i32_0 = arith.constant 0 : i32
    %c0_i32_1 = arith.constant 0 : i32
    return %c0_i32, %c0_i32_0 : i32, i32
  }
  func.func @transform_14(%arg0: i32, %arg1: i32, %arg2: memref<16xi32, #tpu.memory_space<smem>>) -> (i32, i32) {
    %c0_i32 = arith.constant 0 : i32
    %c0_i32_0 = arith.constant 0 : i32
    %c0_i32_1 = arith.constant 0 : i32
    return %c0_i32, %c0_i32_0 : i32, i32
  }
  func.func @transform_15(%arg0: i32, %arg1: i32, %arg2: memref<16xi32, #tpu.memory_space<smem>>) -> (i32, i32) {
    %c0_i32 = arith.constant 0 : i32
    %c0_i32_0 = arith.constant 0 : i32
    %c0_i32_1 = arith.constant 0 : i32
    return %c0_i32, %c0_i32_0 : i32, i32
  }
  func.func @transform_16(%arg0: i32, %arg1: i32, %arg2: memref<16xi32, #tpu.memory_space<smem>>) -> (i32, i32) {
    %c0_i32 = arith.constant 0 : i32
    %c0_i32_0 = arith.constant 0 : i32
    return %arg0, %c0_i32 : i32, i32
  }
}

</mosaic_0001>

<bundles_post_ra>
// kernel: tpu_custom_call.1
= control target key start
LH: loop header
LB: loop body
LE: loop exit
PB: predicated region body
PF: predicated region fallthrough
CT: control target
= control target key end

     0   :  { %s5186_s0 = inlined_call_operand.hbm [shape: s32[16], index: 0, kind: input, shape index: {}]   ;;  %s5187_s1 = inlined_call_operand.hbm [shape: f32[256,128], index: 1, kind: input, shape index: {}]   ;;  %s5188_s2 = inlined_call_operand.hbm [shape: f32[16,128], index: 2, kind: input, shape index: {}]   ;;  %s5189_s3 = inlined_call_operand.vmem [shape: f32[2,1,128], index: 3, kind: input, shape index: {}]   ;;  %s5190_s4 = inlined_call_operand.vmem [shape: f32[2,1,128], index: 4, kind: input, shape index: {}]   ;;  %s5191_s5 = inlined_call_operand.hbm [shape: bf16[2,128,384], index: 5, kind: input, shape index: {}]   ;;  %s5192_s6 = inlined_call_operand.hbm [shape: bf16[2,128,128], index: 6, kind: input, shape index: {}]   ;;  %s5193_s7 = inlined_call_operand.vmem [shape: f32[2,1,128], index: 7, kind: input, shape index: {}]   ;;  %s5194_s8 = inlined_call_operand.vmem [shape: f32[2,1,128], index: 8, kind: input, shape index: {}]   ;;  %s5195_s9 = inlined_call_operand.vmem [shape: f32[2,1,128], index: 9, kind: input, shape index: {}]   ;;  %s5196_s10 = inlined_call_operand.hbm [shape: bf16[2,128,512], index: 10, kind: input, shape index: {}]   ;;  %s5197_s11 = inlined_call_operand.vmem [shape: f32[2,1,512], index: 11, kind: input, shape index: {}]   ;;  %s5198_s12 = inlined_call_operand.hbm [shape: bf16[2,512,128], index: 12, kind: input, shape index: {}]   ;;  %s5199_s13 = inlined_call_operand.vmem [shape: f32[2,1,128], index: 13, kind: input, shape index: {}]   ;;  %s5200_s14 = inlined_call_operand.vmem [shape: f32[1,128], index: 14, kind: input, shape index: {}]   ;;  %s5201_s15 = inlined_call_operand.vmem [shape: f32[1,128], index: 15, kind: input, shape index: {}]   ;;  %s5202_s16 = inlined_call_operand.hbm [shape: bf16[128,256], index: 16, kind: input, shape index: {}]   ;;  %s5203_s17 = inlined_call_operand.hbm [shape: f32[16,256], index: 17, kind: output, shape index: {}]  }
   0x1   :  { %5228 = sst [smem:[#allocation64_spill]] %s5186_s0 }
   0x2   :  { %5229 = sst [smem:[#allocation65_spill]] %s5187_s1  ;;  %s5246_s26 = sld [smem:[#allocation64_spill]] }
   0x3   :  { %5230 = sst [smem:[#allocation66_spill]] %s5188_s2 }
   0x4   :  { %5231 = sst [smem:[#allocation67_spill]] %s5189_s3 }
   0x5   :  { %5232 = sst [smem:[#allocation68_spill]] %s5190_s4 }
   0x6   :  { %5233 = sst [smem:[#allocation69_spill]] %s5191_s5 }
   0x7   :  { %5234 = sst [smem:[#allocation70_spill]] %s5192_s6 }
   0x8   :  { %5235 = sst [smem:[#allocation71_spill]] %s5193_s7 }
   0x9   :  { %5236 = sst [smem:[#allocation72_spill]] %s5194_s8 }
   0xa   :  { %5237 = sst [smem:[#allocation73_spill]] %s5195_s9 }
   0xb   :  { %5238 = sst [smem:[#allocation74_spill]] %s5196_s10 }
   0xc   :  { %5239 = sst [smem:[#allocation75_spill]] %s5197_s11  ;;  %s3672_s11 = scalar_lea.hbm %s5246_s26, 16 }
   0xd   :  { %5240 = sst [smem:[#allocation76_spill]] %s5198_s12  ;;  %p3673_p0 = scmp.ne.s32.totalorder %s5246_s26, %s3672_s11 }
   0xe   :  { %5241 = sst [smem:[#allocation77_spill]] %s5199_s13  ;;  %p3676_p1 = scmp.lt.u32.totalorder %s3672_s11, %s5246_s26 }
   0xf   :  { %5242 = sst [smem:[#allocation78_spill]] %s5200_s14 }
  0x10   :  { %5243 = sst [smem:[#allocation79_spill]] %s5201_s15  ;;  %p3678_p2 = pnand %p3676_p1, %p3673_p0 }
  0x11   :  { %5244 = sst [smem:[#allocation80_spill]] %s5202_s16 }
  0x12   :  { %5245 = sst [smem:[#allocation81_spill]] %s5203_s17 }
  0x13   :  { %3681 = shalt.err (!%p3678_p2)  }
  0x14   :  { %s4204_s30 = smov [#allocation6]  }
  0x15   :  { %23 = dma.hbm_to_smem %s5246_s26, 16, %s4204_s30, [#allocation5] }
  0x16   :  { %4122 = dma.done.wait [#allocation5], 16 }
  0x17   :  { %4123 = vsyncadd [#allocation5], 4294967280 }
  0x18   :  { %25 = sfence }
  0x19   :  { %26 = vsyncpa [#allocation8], 0 }
  0x1a   :  { %27 = vsyncpa [#allocation11], 0 }
  0x1b   :  { %29 = vsyncpa [#allocation11 + $0x1], 0 }
  0x1c   :  { %30 = vsyncpa [#allocation14], 0 }
  0x1d   :  { %32 = vsyncpa [#allocation14 + $0x1], 0 }
  0x1e   :  { %33 = vsyncpa [#allocation17], 0 }
  0x1f   :  { %34 = vsyncpa [#allocation9], 0 }
  0x20   :  { %36 = vsyncpa [#allocation9 + $0x1], 0  ;;  %s4338_s1 = smov 0   ;;  %s4340_s11 = smov 0  }
  0x21   :  { %s4342_s20 = smov 0   ;;  %s4344_s21 = smov 0  }
  0x22   :  { %s4346_s22 = smov 0   ;;  %s4348_s23 = smov 0  }
  0x23   :  { %s4350_s24 = smov 0   ;;  %s4352_s25 = smov 0  }
  0x24   :  { %s4354_s26 = smov 0   ;;  %s4356_s27 = smov 0  }
  0x25   :  { %s4358_s28 = smov 0  }
  0x26 LB: > { %5247 = sst [smem:[#allocation51_spill]] %s4162_s1  ;;  %s51_s29 = sadd.s32 1, %s4194_s26  ;;  %s4202_s28 = sphi %s4358_s28, %s42_s28   ;;  %s4198_s27 = sphi %s4356_s27, %s5326_s27   ;;  %s4194_s26 = sphi %s4354_s26, %s5325_s26   ;;  %s4190_s25 = sphi %s4352_s25, %s5324_s25   ;;  %s4186_s24 = sphi %s4350_s24, %s5323_s24   ;;  %s4182_s23 = sphi %s4348_s23, %s5322_s23   ;;  %s4178_s22 = sphi %s4346_s22, %s5330_s22   ;;  %s4174_s21 = sphi %s4344_s21, %s5329_s21   ;;  %s4170_s20 = sphi %s4342_s20, %s5320_s20   ;;  %s4166_s11 = sphi %s4340_s11, %s5328_s11   ;;  %s4162_s1 = sphi %s4338_s1, %s5327_s1  }
  0x27   : > { %5248 = sst [smem:[#allocation52_spill]] %s4170_s20  ;;  %s134_s0 = sadd.s32 1, %s4182_s23 }
  0x28   : > { %5249 = sst [smem:[#allocation53_spill]] %s4182_s23  ;;  %p4395_p3 = scmp.ge.s32.totalorder %s51_s29, 2 }
  0x29   : > { %5250 = sst [smem:[#allocation54_spill]] %s4186_s24  ;;  %p141_p4 = scmp.ne.s32.totalorder %s4182_s23, %s4178_s22 }
  0x2a   : > { %5251 = sst [smem:[#allocation55_spill]] %s4190_s25  ;;  %p142_p5 = scmp.eq.s32.totalorder %s4202_s28, 0 }
  0x2b   : > { %5252 = sst [smem:[#allocation56_spill]] %s4194_s26  ;;  %s5332_s29 = smov (%p4395_p3, %s51_s29), 0 }
  0x2c   : > { %5253 = sst [smem:[#allocation57_spill]] %s4198_s27  ;;  %p143_p6 = por %p142_p5, %p141_p4 }
  0x2d   : > { %5254 = sst [smem:[#allocation58_spill]] %s4202_s28  ;;  %p3379_p7 = scmp.lt.s32.totalorder %s4202_s28, 4 }
  0x2e   : > { %s5255_s30 = scalar_select %p4395_p3, 1, 0 }
  0x2f   : > { %5256 = sst [smem:[#allocation59_spill]] %s5332_s29  ;;  %s131_s18 = ssub.s32 %s4194_s26, %s5332_s29 }
  0x30   : > { %p132_p8 = scmp.eq.s32.totalorder %s131_s18, 0  ;;  %s4411_s17 = sand.u32 1, %s4182_s23  }
  0x31   : > { %s3333_s15 = smul.u32 3072, %s4194_s26  ;;  %s5258_s5 = sld [smem:[#allocation69_spill]] }
  0x32   : > { %s4415_s14 = scalar_select %p132_p8, %s4182_s23, %s134_s0  }
  0x33   : > { %s3332_s25 = smul.u32 192, %s4411_s17  ;;  %p4423_p9 = pnand %p3379_p7, %p143_p6 }
  0x34   : > { %5257 = sst [smem:[#allocation60_spill]] %s4415_s14  ;;  %s5260_s0 = sand.u32 1, %s4202_s28  }
  0x35   : > { %s5259_s29 = scalar_select %p4423_p9, 1, 0 }
  0x36   : > { %s514_s18 = scalar_lea.vmem [#allocation10], %s3332_s25  ;;  %s4431_s14 = scalar_lea.sflag [#allocation11], %s5260_s0 }
  0x37   : > { %s4421_s8 = scalar_lea.hbm %s5258_s5, %s3333_s15  ;;  %s521_s19 = sshll.u32 %s514_s18, 4  ;;  %s4427_s19 = int_to_ptr.vmem [resolvable:$true] %s521_s19 }
  0x38   : > { %s3682_s23 = scalar_lea.hbm %s4421_s8, 3072  ;;  %p4437_p11 = pneg %p4423_p9 }
  0x39   : > { %p3683_p10 = scmp.ne.s32.totalorder %s4421_s8, %s3682_s23  ;;  %s3687_s25 = scalar_lea.hbm %s5258_s5, 6144 }
  0x3a   : > { %s5261_s9 = scalar_select %p4437_p11, 1, 0 }
  0x3b   : > { %p3685_p12 = pnand %p4437_p11, %p3683_p10  ;;  %p3688_p0 = scmp.lt.u32.totalorder %s4421_s8, %s5258_s5 }
  0x3c   : > { %p3689_p1 = scmp.lt.u32.totalorder %s3687_s25, %s3682_s23  ;;  %p3691_p4 = scmp.lt.u32.totalorder %s3682_s23, %s4421_s8 }
  0x3d   : > { %p3686_p13 = pneg %p3685_p12 }
  0x3e   : > { %p3690_p2 = por %p3689_p1, %p3688_p0 }
  0x40   : > { %p3692_p5 = por %p3691_p4, %p3690_p2 }
  0x42   : > { %p3693_p6 = pnand %p3692_p5, %p3686_p13 }
  0x44   : > { %3696 = shalt.err (!%p3693_p6)
}
  0x45   : > { %s3697_s0 = scalar_lea.vmem %s4427_s19, 3072  ;;  %s4205_s13 = smov [#allocation10]  }
  0x46   : > { %p3698_p7 = scmp.ne.s32.totalorder %s4427_s19, %s3697_s0  ;;  %s3702_s15 = sshll.u32 %s4205_s13, 4  ;;  %s3703_s15 = int_to_ptr.vmem [resolvable:$false] %s3702_s15 }
  0x47   : > { %s3704_s7 = scalar_lea.vmem %s3703_s15, 6144  ;;  %p3705_p12 = scmp.lt.s32.totalorder %s4427_s19, %s3703_s15 }
  0x48   : > { %p3700_p8 = pnand %p3698_p7, %p4437_p11  ;;  %p3706_p3 = scmp.lt.s32.totalorder %s3704_s7, %s3697_s0 }
  0x4a   : > { %p3701_p10 = pneg %p3700_p8  ;;  %p3707_p0 = por %p3706_p3, %p3705_p12 }
  0x4c   : > { %p3708_p1 = pnand %p3707_p0, %p3701_p10 }
  0x4e   : > { %3711 = shalt.err (!%p3708_p1)
}
  0x4f   : > { %s4206_s23 = smov 192   ;;  %s4207_s25 = smov 12  }
  0x50   : > { %3363 = dma.hbm_to_vmem [thread:$0]  (!%p4423_p9), %s4421_s8, 3072, %s4427_s19, %s4431_s14, %s4206_s23, %s4206_s23, %s4207_s25  }
  0x51   : > { %s2996_s18 = sshll.u32 %s4411_s17, 8  ;;  %s3163_s13 = sshll.u32 %s4194_s26, 12 }
  0x52   : > { %s5262_s10 = sld [smem:[#allocation74_spill]]  ;;  %s574_s5 = scalar_lea.vmem [#allocation13], %s2996_s18 }
  0x53   : > { %s581_s4 = sshll.u32 %s574_s5, 4  ;;  %s5263_s3 = sand.u32 1, %s4202_s28   ;;  %s4472_s4 = int_to_ptr.vmem [resolvable:$true] %s581_s4 }
  0x54   : > { %s4476_s24 = scalar_lea.sflag [#allocation14], %s5263_s3 }
  0x58   : > { %s4468_s7 = scalar_lea.hbm %s5262_s10, %s3163_s13  ;;  %s3717_s25 = scalar_lea.hbm %s5262_s10, 8192 }
  0x59   : > { %s3712_s8 = scalar_lea.hbm %s4468_s7, 4096  ;;  %p3718_p4 = scmp.lt.u32.totalorder %s4468_s7, %s5262_s10 }
  0x5a   : > { %p3713_p3 = scmp.ne.s32.totalorder %s4468_s7, %s3712_s8  ;;  %p3719_p5 = scmp.lt.u32.totalorder %s3717_s25, %s3712_s8 }
  0x5b   : > { %p3721_p7 = scmp.lt.u32.totalorder %s3712_s8, %s4468_s7 }
  0x5c   : > { %p3715_p13 = pnand %p3713_p3, %p4437_p11  ;;  %p3720_p6 = por %p3719_p5, %p3718_p4 }
  0x5e   : > { %p3716_p2 = pneg %p3715_p13  ;;  %p3722_p8 = por %p3721_p7, %p3720_p6 }
  0x60   : > { %p3723_p10 = pnand %p3722_p8, %p3716_p2 }
  0x62   : > { %3726 = shalt.err (!%p3723_p10)
}
  0x63   : > { %s3727_s3 = scalar_lea.vmem %s4472_s4, 4096  ;;  %s4208_s5 = smov [#allocation13]  }
  0x64   : > { %p3728_p12 = scmp.ne.s32.totalorder %s4472_s4, %s3727_s3  ;;  %s3732_s19 = sshll.u32 %s4208_s5, 4  ;;  %s3733_s19 = int_to_ptr.vmem [resolvable:$false] %s3732_s19 }
  0x65   : > { %s3734_s23 = scalar_lea.vmem %s3733_s19, 8192  ;;  %p3735_p3 = scmp.lt.s32.totalorder %s4472_s4, %s3733_s19 }
  0x66   : > { %p3730_p0 = pnand %p3728_p12, %p4437_p11  ;;  %p3736_p13 = scmp.lt.s32.totalorder %s3734_s23, %s3727_s3 }
  0x68   : > { %p3731_p1 = pneg %p3730_p0  ;;  %p3737_p4 = por %p3736_p13, %p3735_p3 }
  0x6a   : > { %p3738_p5 = pnand %p3737_p4, %p3731_p1 }
  0x6c   : > { %3741 = shalt.err (!%p3738_p5)
}
  0x6d   : > { %s4209_s8 = smov 256   ;;  %s4210_s25 = smov 16  }
  0x6e   : > { %3369 = dma.hbm_to_vmem [thread:$0]  (!%p4423_p9), %s4468_s7, 4096, %s4472_s4, %s4476_s24, %s4209_s8, %s4209_s8, %s4210_s25  }
  0x6f   : > { %s5264_s12 = sld [smem:[#allocation76_spill]]  ;;  %s602_s5 = scalar_lea.vmem [#allocation15], %s2996_s18 }
  0x70   : > { %s609_s19 = sshll.u32 %s602_s5, 4  ;;  %s4512_s23 = sadd.s32 4294967295, %s4202_s28   ;;  %s4509_s19 = int_to_ptr.vmem [resolvable:$true] %s609_s19 }
  0x71   : > { %s2987_s4 = sadd.s32 4294967294, %s4202_s28   ;;  %s54_s7 = sadd.s32 1, %s4198_s27 }
  0x72   : > { %p147_p2 = scmp.ne.s32.totalorder %s4178_s22, %s4174_s21  ;;  %p5265_p6 = scmp.ne.s32.totalorder %s5255_s30, 0 }
  0x73   : > { %p5218_p7 = scmp.eq.s32.totalorder %s4512_s23, 0  ;;  %s431_s18 = sadd.s32 1, %s4170_s20 }
  0x74   : > { %s5334_s7 = smov (!%p5265_p6, %s54_s7), %s4198_s27  ;;  %p441_p10 = scmp.ne.s32.totalorder %s4170_s20, %s4166_s11 }
  0x75   : > { %s4505_s3 = scalar_lea.hbm %s5264_s12, %s3163_s13  ;;  %p56_p8 = scmp.ge.s32.totalorder %s5334_s7, 2 }
  0x76   : > { %p4527_p12 = por %p5218_p7, %p147_p2  ;;  %p442_p0 = scmp.eq.s32.totalorder %s4512_s23, 3 }
  0x77   : > { %s5336_s7 = smov (%p56_p8, %s5334_s7), 0  ;;  %p447_p3 = scmp.ne.s32.totalorder %s4166_s11, %s4162_s1 }
  0x78   : > { %s5266_s13 = scalar_select %p4527_p12, 1, 0 }
  0x79   : > { %5267 = sst [smem:[#allocation61_spill]] %s5336_s7  ;;  %p4534_p1 = por %p442_p0, %p441_p10 }
  0x7a   : > { %s428_s21 = ssub.s32 %s4198_s27, %s5336_s7  ;;  %p448_p13 = scmp.eq.s32.totalorder %s2987_s4, 3 }
  0x7b   : > { %s5268_s8 = scalar_select %p4534_p1, 1, 0 }
  0x7c   : > { %p429_p4 = scmp.eq.s32.totalorder %s428_s21, 0  ;;  %p2988_p5 = scmp.ge.s32.totalorder %s4202_s28, 1 }
  0x7d   : > { %p4543_p6 = por %p448_p13, %p447_p3  ;;  %p455_p2 = scmp.lt.s32.totalorder %s4202_s28, 5 }
  0x7e   : > { %s4549_s25 = scalar_select %p429_p4, %s4170_s20, %s431_s18  }
  0x7f   : > { %s5269_s30 = scalar_select %p4543_p6, 1, 0 }
  0x80   : > { %5271 = sst [smem:[#allocation63_spill]] %s4549_s25  ;;  %p4551_p8 = pnand %p2988_p5, %p455_p2 }
  0x81   : > { %5270 = sst [smem:[#allocation62_spill]] %s5269_s30  ;;  %s4211_s15 = smov [#allocation7]  }
  0x82   : > { %s5272_s0 = scalar_select %p4551_p8, 1, 0 }
  0x83   : > { %p3353_p10 = pneg %p4551_p8  ;;  %s468_s5 = sshll.u32 %s4211_s15, 4  ;;  %s469_s5 = int_to_ptr.vmem [resolvable:$true] %s468_s5 }
  0x84   : > { %s4212_s4 = smov [#allocation16]   ;;  %s5274_s2 = sld [smem:[#allocation66_spill]] }
  0x85   : > { %s484_s21 = sshll.u32 %s4212_s4, 4  ;;  %p4559_p0 = pnand %p3353_p10, %p5218_p7  ;;  %s4563_s21 = int_to_ptr.vmem [resolvable:$true] %s484_s21 }
  0x87   : > { %p3744_p13 = pneg %p4559_p0 }
  0x8a   : > { %s3742_s25 = scalar_lea.hbm %s5274_s2, 128  ;;  %s3747_s1 = scalar_lea.hbm %s5274_s2, 256 }
  0x8b   : > { %p3743_p3 = scmp.ne.s32.totalorder %s5274_s2, %s3742_s25  ;;  %p3748_p2 = scmp.lt.u32.totalorder %s3747_s1, %s3742_s25 }
  0x8c   : > { %p3749_p10 = scmp.lt.u32.totalorder %s3742_s25, %s5274_s2 }
  0x8d   : > { %p3745_p4 = pnand %p3744_p13, %p3743_p3 }
  0x8e   : > { %p3750_p7 = por %p3749_p10, %p3748_p2 }
  0x8f   : > { %p3746_p5 = pneg %p3745_p4 }
  0x91   : > { %p3751_p6 = pnand %p3750_p7, %p3746_p5 }
  0x93   : > { %3754 = shalt.err (!%p3751_p6)
}
  0x94   : > { %s3755_s20 = scalar_lea.vmem %s469_s5, 128  ;;  %p3763_p4 = scmp.lt.s32.totalorder %s469_s5, %s469_s5 }
  0x95   : > { %p3756_p1 = scmp.ne.s32.totalorder %s469_s5, %s3755_s20  ;;  %p3764_p8 = scmp.lt.s32.totalorder %s3755_s20, %s3755_s20 }
  0x97   : > { %p3758_p12 = pnand %p3756_p1, %p3744_p13  ;;  %p3765_p9 = por %p3764_p8, %p3763_p4 }
  0x99   : > { %p3759_p3 = pneg %p3758_p12 }
  0x9b   : > { %p3766_p11 = pnand %p3765_p9, %p3759_p3 }
  0x9d   : > { %3769 = shalt.err (!%p3766_p11)
}
  0x9e   : > { %3356 = dma.hbm_to_vmem [thread:$0]  (!%p4559_p0), %s5274_s2, 128, %s469_s5, [#allocation8]  }
  0x9f   : > { %s5275_s16 = sld [smem:[#allocation80_spill]] }
  0xa5   : > { %s3770_s30 = scalar_lea.hbm %s5275_s16, 2048 }
  0xa6   : > { %p3771_p7 = scmp.ne.s32.totalorder %s5275_s16, %s3770_s30  ;;  %p3777_p11 = scmp.lt.u32.totalorder %s3770_s30, %s5275_s16 }
  0xa8   : > { %p3773_p12 = pnand %p3771_p7, %p3744_p13 }
  0xaa   : > { %p3774_p9 = pneg %p3773_p12 }
  0xac   : > { %p3779_p1 = pnand %p3777_p11, %p3774_p9 }
  0xae   : > { %3782 = shalt.err (!%p3779_p1)
}
  0xaf   : > { %s3783_s5 = scalar_lea.vmem %s4563_s21, 2048  ;;  %p3791_p2 = scmp.lt.s32.totalorder %s4563_s21, %s4563_s21 }
  0xb0   : > { %p3784_p6 = scmp.ne.s32.totalorder %s4563_s21, %s3783_s5  ;;  %p3792_p10 = scmp.lt.s32.totalorder %s3783_s5, %s3783_s5 }
  0xb2   : > { %p3786_p8 = pnand %p3784_p6, %p3744_p13  ;;  %p3793_p3 = por %p3792_p10, %p3791_p2 }
  0xb4   : > { %p3787_p5 = pneg %p3786_p8 }
  0xb6   : > { %p3794_p4 = pnand %p3793_p3, %p3787_p5 }
  0xb8   : > { %3797 = shalt.err (!%p3794_p4)
}
  0xb9   : > { %s4213_s20 = smov 128   ;;  %s4214_s1 = smov 8  }
  0xba   : > { %3359 = dma.hbm_to_vmem [thread:$0]  (!%p4559_p0), %s5275_s16, 2048, %s4563_s21, [#allocation17], %s4213_s20, %s4213_s20, %s4214_s1  }
  0xbb   : > { %s3162_s7 = sshll.u32 %s4194_s26, 10  ;;  %s5276_s6 = sld [smem:[#allocation70_spill]] }
  0xbc   : > { %s5277_s15 = sshll.u32 %s4411_s17, 6  ;;  %p5278_p7 = scmp.ne.s32.totalorder %s5261_s9, 0 }
  0xbd   : > { %s535_s4 = scalar_lea.vmem [#allocation12], %s5277_s15 }
  0xbe   : > { %s542_s5 = sshll.u32 %s535_s4, 4  ;;  %s4624_s5 = int_to_ptr.vmem [resolvable:$true] %s542_s5 }
  0xc1   : > { %s4620_s18 = scalar_lea.hbm %s5276_s6, %s3162_s7  ;;  %s3803_s1 = scalar_lea.hbm %s5276_s6, 2048 }
  0xc2   : > { %s3798_s10 = scalar_lea.hbm %s4620_s18, 1024  ;;  %p3804_p9 = scmp.lt.u32.totalorder %s4620_s18, %s5276_s6 }
  0xc3   : > { %p3799_p13 = scmp.ne.s32.totalorder %s4620_s18, %s3798_s10  ;;  %p3805_p11 = scmp.lt.u32.totalorder %s3803_s1, %s3798_s10 }
  0xc4   : > { %p3807_p6 = scmp.lt.u32.totalorder %s3798_s10, %s4620_s18 }
  0xc5   : > { %p3801_p12 = pnand %p3799_p13, %p5278_p7  ;;  %p3806_p1 = por %p3805_p11, %p3804_p9 }
  0xc7   : > { %p3802_p0 = pneg %p3801_p12  ;;  %p3808_p8 = por %p3807_p6, %p3806_p1 }
  0xc9   : > { %p3809_p5 = pnand %p3808_p8, %p3802_p0 }
  0xcb   : > { %3812 = shalt.err (!%p3809_p5)
}
  0xcc   : > { %s3813_s17 = scalar_lea.vmem %s4624_s5, 1024  ;;  %s4215_s7 = smov [#allocation12]  }
  0xcd   : > { %p3814_p2 = scmp.ne.s32.totalorder %s4624_s5, %s3813_s17  ;;  %s3818_s30 = sshll.u32 %s4215_s7, 4  ;;  %s3819_s30 = int_to_ptr.vmem [resolvable:$false] %s3818_s30 }
  0xce   : > { %s3820_s25 = scalar_lea.vmem %s3819_s30, 2048  ;;  %p3821_p4 = scmp.lt.s32.totalorder %s4624_s5, %s3819_s30 }
  0xcf   : > { %p3816_p10 = pnand %p3814_p2, %p5278_p7  ;;  %p3822_p13 = scmp.lt.s32.totalorder %s3820_s25, %s3813_s17 }
  0xd1   : > { %p3817_p3 = pneg %p3816_p10  ;;  %p3823_p12 = por %p3822_p13, %p3821_p4 }
  0xd3   : > { %p3824_p9 = pnand %p3823_p12, %p3817_p3 }
  0xd5   : > { %3827 = shalt.err (!%p3824_p9)
}
  0xd6   : > { %s4216_s15 = smov 64   ;;  %s4217_s4 = smov 4  }
  0xd7   : > { %p5279_p0 = scmp.ne.s32.totalorder %s5259_s29, 0  ;;  %s3828_s10 = scalar_lea.hbm %s4505_s3, 4096 }
  0xd8   : > { %p3829_p11 = scmp.ne.s32.totalorder %s4505_s3, %s3828_s10  ;;  %s3833_s1 = scalar_lea.hbm %s5264_s12, 8192 }
  0xd9   : > { %3366 = dma.hbm_to_vmem [thread:$0]  (!%p5279_p0), %s4620_s18, 1024, %s4624_s5, %s4431_s14, %s4216_s15, %s4216_s15, %s4217_s4  }
  0xda   : > { %p3831_p1 = pnand %p3829_p11, %p5278_p7  ;;  %p3834_p8 = scmp.lt.u32.totalorder %s4505_s3, %s5264_s12 }
  0xdb   : > { %p3835_p5 = scmp.lt.u32.totalorder %s3833_s1, %s3828_s10  ;;  %p3837_p10 = scmp.lt.u32.totalorder %s3828_s10, %s4505_s3 }
  0xdc   : > { %p3832_p6 = pneg %p3831_p1 }
  0xdd   : > { %p3836_p2 = por %p3835_p5, %p3834_p8 }
  0xdf   : > { %p3838_p3 = por %p3837_p10, %p3836_p2 }
  0xe1   : > { %p3839_p4 = pnand %p3838_p3, %p3832_p6 }
  0xe3   : > { %3842 = shalt.err (!%p3839_p4)
}
  0xe4   : > { %s3843_s14 = scalar_lea.vmem %s4509_s19, 4096  ;;  %s4218_s18 = smov [#allocation15]  }
  0xe5   : > { %p3844_p13 = scmp.ne.s32.totalorder %s4509_s19, %s3843_s14  ;;  %s3848_s5 = sshll.u32 %s4218_s18, 4  ;;  %s3849_s5 = int_to_ptr.vmem [resolvable:$false] %s3848_s5 }
  0xe6   : > { %s3850_s17 = scalar_lea.vmem %s3849_s5, 8192  ;;  %p3851_p11 = scmp.lt.s32.totalorder %s4509_s19, %s3849_s5 }
  0xe7   : > { %p3846_p12 = pnand %p3844_p13, %p5278_p7  ;;  %p3852_p1 = scmp.lt.s32.totalorder %s3850_s17, %s3843_s14 }
  0xe9   : > { %p3847_p9 = pneg %p3846_p12  ;;  %p3853_p8 = por %p3852_p1, %p3851_p11 }
  0xeb   : > { %p3854_p5 = pnand %p3853_p8, %p3847_p9 }
  0xed   : > { %3857 = shalt.err (!%p3854_p5)
}
  0xee   : > { %3372 = dma.hbm_to_vmem [thread:$0]  (!%p5279_p0), %s4505_s3, 4096, %s4509_s19, %s4476_s24, %s4216_s15, %s4216_s15, %s4217_s4  }
  0xef   : > { %p5280_p7 = scmp.ne.s32.totalorder %s5272_s0, 0 }
  0xf0   : > { %p5281_p6 = scmp.eq.s32.totalorder (!%p5280_p7), %s4512_s23, 0 }
  0xf1   : > { %627 = sbr.rel (%p5280_p7) target bundleno = 3981 (0xf8d), region = 80 }
  0xf8   : > { %4125 = dma.done.wait (%p5281_p6), [#allocation8], 128   ;;  %p5282_p2 = pmov %p5281_p6 }
  0xf9   : > { %s633_s29 = sand.u32 1, %s4512_s23   ;;  %s635_s9 = sand.u32 1, %s4178_s22  }
  0xfa   : > { %4127 = vsyncadd (%p5282_p2), [#allocation8], 4294967168  ;;  %s3334_s7 = smul.u32 192, %s635_s9  ;;  %s634_s30 = scalar_lea.sflag [#allocation11], %s633_s29 }
  0xfb   : > { %p5283_p10 = scmp.ne.s32.totalorder %s5266_s13, 0 }
  0xfc   : > { %s4684_s25 = scalar_lea.vmem [#allocation10], %s3334_s7 }
  0xfd   : > { %4129 = dma.done.wait (%p5283_p10), %s634_s30, 4096  }
  0xfe   : > { %4131 = vsyncadd (%p5283_p10), %s634_s30, 4294963200  ;;  %s3004_s24 = sshll.u32 %s635_s9, 6  ;;  %s3005_s3 = sshll.u32 %s635_s9, 8 }
  0xff   : > { %s4690_s19 = scalar_lea.vmem [#allocation12], %s3004_s24  ;;  %s652_s0 = scalar_lea.sflag [#allocation14], %s633_s29 }
 0x100   : > { %s4692_s15 = scalar_lea.vmem [#allocation13], %s3005_s3 }
 0x101   : > { %4133 = dma.done.wait (%p5283_p10), %s652_s0, 8192  }
 0x102   : > { %4135 = vsyncadd (%p5283_p10), %s652_s0, 4294959104  ;;  %s4698_s4 = scalar_lea.vmem [#allocation15], %s3005_s3  ;;  %p5284_p0 = pmov %p5282_p2 }
 0x104   : > { %4137 = dma.done.wait (%p5284_p0), [#allocation17], 2048   ;;  %p5285_p3 = pmov %p5284_p0 }
 0x105   : > { %s5286_s10 = sld [smem:[#allocation54_spill]]  ;;  %s5226_s21 = sand.u32 1, %s4166_s11  }
 0x106   : > { %4139 = vsyncadd (%p5285_p3), [#allocation17], 4294965248  ;;  %s3008_s20 = sshll.u32 %s5226_s21, 4  ;;  %s5292_s28 = sld [smem:[#allocation75_spill]] }
 0x107   : > { %s4741_s29 = scalar_lea.vmem [#allocation18], %s3008_s20 }
 0x10b   : > { %p752_p4 = scmp.lt.s32.totalorder %s5286_s10, 1  ;;  %p3010_p13 = scmp.ne.s32.totalorder %s5286_s10, 0 }
 0x10c   : > { %s5294_s9 = sld [smem:[#allocation55_spill]] (!%p3010_p13)  ;;  %s4219_s16 = smov (!%p3010_p13), [#allocation2]  }
 0x10d   : > { %s4709_s1 = scalar_select %p752_p4, %s5286_s10, 1 }
 0x10e   : > { %778 = sbr.rel (%p3010_p13) target bundleno = 474 (0x1da), region = 108  ;;  %s4220_s20 = smov (!%p3010_p13), [#allocation2 + $0x1]  }
 0x10f   : > { %s3009_s12 = sshll.u32 %s4709_s1, 2  ;;  %s807_s3 = sshll.u32 (!%p3010_p13), %s4220_s20, 4  ;;  %s4754_s3 = int_to_ptr.vmem [resolvable:$true] %s807_s3 }
 0x110   : > { %s4735_s23 = scalar_lea.vmem %s5292_s28, %s3009_s12  ;;  %s790_s12 = sshll.u32 (!%p3010_p13), %s4219_s16, 4  ;;  %s4748_s12 = int_to_ptr.vmem [resolvable:$true] %s790_s12 }
 0x111   : > { %s4221_s28 = smov (!%p3010_p13), [#allocation2 + $0x2]  }
 0x112   : > { %s4745_s7 = sshll.u32 (!%p3010_p13), %s5294_s9, 3  ;;  %s824_s14 = sshll.u32 (!%p3010_p13), %s4221_s28, 4  ;;  %s4762_s14 = int_to_ptr.vmem [resolvable:$true] %s824_s14 }
 0x113   : > { %s780_s2 = sld [smem:[#allocation6 + %s4745_s7]] (!%p3010_p13)  ;;  %s794_s26 = sadd.s32 (!%p3010_p13), 1, %s4745_s7 }
 0x114   : > { %s4751_s24 = sld [smem:[#allocation6 + %s794_s26]] (!%p3010_p13)  ;;  %s811_s0 = sadd.s32 (!%p3010_p13), 2, %s4745_s7 }
 0x115   : > { %s4756_s10 = sld [smem:[#allocation6 + %s811_s0]]  ;;  %s828_s13 = sadd.s32 3, %s4745_s7 }
 0x116   : > { %s5295_s9 = sld [smem:[#allocation65_spill]] }
 0x119   : > { %s3012_s27 = sshll.u32 %s780_s2, 4 }
 0x11c   : > { %s782_s16 = scalar_lea.hbm %s5295_s9, %s3012_s27  ;;  %s4767_s20 = scalar_lea.hbm %s5295_s9, 4096 }
 0x11d   : > { %s3858_s17 = scalar_lea.hbm %s782_s16, 16  ;;  %p3861_p9 = scmp.lt.u32.totalorder %s782_s16, %s5295_s9 }
 0x11e   : > { %p3859_p12 = scmp.ne.s32.totalorder %s782_s16, %s3858_s17  ;;  %p3862_p11 = scmp.lt.u32.totalorder %s4767_s20, %s3858_s17 }
 0x11f   : > { %p3864_p8 = scmp.lt.u32.totalorder %s3858_s17, %s782_s16 }
 0x120   : > { %p3863_p1 = por %p3862_p11, %p3861_p9 }
 0x122   : > { %p3865_p5 = por %p3864_p8, %p3863_p1 }
 0x124   : > { %p3866_p7 = pnand %p3865_p5, %p3859_p12 }
 0x126   : > { %3869 = shalt.err (!%p3866_p7)  }
 0x127   : > { %s3870_s2 = scalar_lea.vmem %s4748_s12, 16  ;;  %s4776_s6 = scalar_lea.vmem %s4748_s12, 128 }
 0x128   : > { %p3871_p6 = scmp.ne.s32.totalorder %s4748_s12, %s3870_s2  ;;  %p3875_p2 = scmp.lt.s32.totalorder %s4748_s12, %s4748_s12 }
 0x129   : > { %p3876_p10 = scmp.lt.s32.totalorder %s4776_s6, %s3870_s2 }
 0x12b   : > { %p3877_p0 = por %p3876_p10, %p3875_p2 }
 0x12d   : > { %p3878_p3 = pnand %p3877_p0, %p3871_p6 }
 0x12f   : > { %3881 = shalt.err (!%p3878_p3)  }
 0x130   : > { %793 = dma.hbm_to_vmem [thread:$0]  %s782_s16, 16, %s4748_s12, [#allocation4] }
 0x131   : > { %s3013_s21 = sshll.u32 %s4751_s24, 4  ;;  %s4783_s17 = sld [smem:[#allocation6 + %s828_s13]] }
 0x132   : > { %s797_s18 = scalar_lea.hbm %s5295_s9, %s3013_s21  ;;  %s3014_s5 = sshll.u32 %s4756_s10, 4 }
 0x133   : > { %s3882_s26 = scalar_lea.hbm %s797_s18, 16  ;;  %p3885_p13 = scmp.lt.u32.totalorder %s797_s18, %s5295_s9 }
 0x134   : > { %p3883_p4 = scmp.ne.s32.totalorder %s797_s18, %s3882_s26  ;;  %p3886_p12 = scmp.lt.u32.totalorder %s4767_s20, %s3882_s26 }
 0x135   : > { %p3888_p11 = scmp.lt.u32.totalorder %s3882_s26, %s797_s18 }
 0x136   : > { %p3887_p9 = por %p3886_p12, %p3885_p13 }
 0x138   : > { %p3889_p1 = por %p3888_p11, %p3887_p9 }
 0x13a   : > { %p3890_p8 = pnand %p3889_p1, %p3883_p4 }
 0x13c   : > { %3893 = shalt.err (!%p3890_p8)  }
 0x13d   : > { %s3894_s24 = scalar_lea.vmem %s4754_s3, 16  ;;  %p3899_p7 = scmp.lt.s32.totalorder %s4754_s3, %s4748_s12 }
 0x13e   : > { %p3895_p5 = scmp.ne.s32.totalorder %s4754_s3, %s3894_s24  ;;  %p3900_p6 = scmp.lt.s32.totalorder %s4776_s6, %s3894_s24 }
 0x140   : > { %p3901_p2 = por %p3900_p6, %p3899_p7 }
 0x142   : > { %p3902_p10 = pnand %p3901_p2, %p3895_p5 }
 0x144   : > { %3905 = shalt.err (!%p3902_p10)  }
 0x145   : > { %810 = dma.hbm_to_vmem [thread:$0]  %s797_s18, 16, %s4754_s3, [#allocation4 + $0x1] }
 0x146   : > { %s814_s16 = scalar_lea.hbm %s5295_s9, %s3014_s5 }
 0x147   : > { %s3906_s21 = scalar_lea.hbm %s814_s16, 16  ;;  %p3909_p3 = scmp.lt.u32.totalorder %s814_s16, %s5295_s9 }
 0x148   : > { %p3907_p0 = scmp.ne.s32.totalorder %s814_s16, %s3906_s21  ;;  %p3910_p4 = scmp.lt.u32.totalorder %s4767_s20, %s3906_s21 }
 0x149   : > { %p3912_p12 = scmp.lt.u32.totalorder %s3906_s21, %s814_s16 }
 0x14a   : > { %p3911_p13 = por %p3910_p4, %p3909_p3 }
 0x14c   : > { %p3913_p9 = por %p3912_p12, %p3911_p13 }
 0x14e   : > { %p3914_p11 = pnand %p3913_p9, %p3907_p0 }
 0x150   : > { %3917 = shalt.err (!%p3914_p11)  }
 0x151   : > { %s3918_s3 = scalar_lea.vmem %s4762_s14, 16  ;;  %p3923_p8 = scmp.lt.s32.totalorder %s4762_s14, %s4748_s12 }
 0x152   : > { %p3919_p1 = scmp.ne.s32.totalorder %s4762_s14, %s3918_s3  ;;  %p3924_p5 = scmp.lt.s32.totalorder %s4776_s6, %s3918_s3 }
 0x154   : > { %p3925_p7 = por %p3924_p5, %p3923_p8 }
 0x156   : > { %p3926_p6 = pnand %p3925_p7, %p3919_p1 }
 0x158   : > { %3929 = shalt.err (!%p3926_p6)  }
 0x159   : > { %827 = dma.hbm_to_vmem [thread:$0]  %s814_s16, 16, %s4762_s14, [#allocation4 + $0x2] }
 0x15a   : > { %s4222_s18 = smov [#allocation2 + $0x3]   ;;  %s845_s26 = sadd.s32 4, %s4745_s7 }
 0x15b   : > { %s841_s5 = sshll.u32 %s4222_s18, 4  ;;  %s3015_s0 = sshll.u32 %s4783_s17, 4  ;;  %s842_s5 = int_to_ptr.vmem [resolvable:$true] %s841_s5 }
 0x15c   : > { %s831_s10 = scalar_lea.hbm %s5295_s9, %s3015_s0  ;;  %s4817_s13 = sld [smem:[#allocation6 + %s845_s26]] }
 0x15d   : > { %s3930_s21 = scalar_lea.hbm %s831_s10, 16  ;;  %p3933_p10 = scmp.lt.u32.totalorder %s831_s10, %s5295_s9 }
 0x15e   : > { %p3931_p2 = scmp.ne.s32.totalorder %s831_s10, %s3930_s21  ;;  %p3934_p0 = scmp.lt.u32.totalorder %s4767_s20, %s3930_s21 }
 0x15f   : > { %p3936_p4 = scmp.lt.u32.totalorder %s3930_s21, %s831_s10 }
 0x160   : > { %p3935_p3 = por %p3934_p0, %p3933_p10 }
 0x162   : > { %p3937_p13 = por %p3936_p4, %p3935_p3 }
 0x164   : > { %p3938_p12 = pnand %p3937_p13, %p3931_p2 }
 0x166   : > { %3941 = shalt.err (!%p3938_p12)  }
 0x167   : > { %s3942_s14 = scalar_lea.vmem %s842_s5, 16  ;;  %p3947_p11 = scmp.lt.s32.totalorder %s842_s5, %s4748_s12 }
 0x168   : > { %p3943_p9 = scmp.ne.s32.totalorder %s842_s5, %s3942_s14  ;;  %p3948_p1 = scmp.lt.s32.totalorder %s4776_s6, %s3942_s14 }
 0x16a   : > { %p3949_p8 = por %p3948_p1, %p3947_p11 }
 0x16c   : > { %p3950_p5 = pnand %p3949_p8, %p3943_p9 }
 0x16e   : > { %3953 = shalt.err (!%p3950_p5)  }
 0x16f   : > { %844 = dma.hbm_to_vmem [thread:$0]  %s831_s10, 16, %s842_s5, [#allocation4 + $0x3] }
 0x170   : > { %s862_s17 = sadd.s32 5, %s4745_s7  ;;  %s4223_s16 = smov [#allocation2 + $0x4]  }
 0x171   : > { %s858_s3 = sshll.u32 %s4223_s16, 4  ;;  %s863_s18 = sld [smem:[#allocation6 + %s862_s17]]  ;;  %s859_s3 = int_to_ptr.vmem [resolvable:$true] %s858_s3 }
 0x172   : > { %s4224_s26 = smov [#allocation2 + $0x5]   ;;  %s879_s2 = sadd.s32 6, %s4745_s7 }
 0x173   : > { %s875_s0 = sshll.u32 %s4224_s26, 4  ;;  %s3016_s24 = sshll.u32 %s4817_s13, 4  ;;  %s4828_s0 = int_to_ptr.vmem [resolvable:$true] %s875_s0 }
 0x174   : > { %s848_s28 = scalar_lea.hbm %s5295_s9, %s3016_s24  ;;  %s4833_s5 = sld [smem:[#allocation6 + %s879_s2]] }
 0x175   : > { %s3954_s10 = scalar_lea.hbm %s848_s28, 16  ;;  %p3957_p6 = scmp.lt.u32.totalorder %s848_s28, %s5295_s9 }
 0x176   : > { %p3955_p7 = scmp.ne.s32.totalorder %s848_s28, %s3954_s10  ;;  %p3958_p2 = scmp.lt.u32.totalorder %s4767_s20, %s3954_s10 }
 0x177   : > { %p3960_p0 = scmp.lt.u32.totalorder %s3954_s10, %s848_s28 }
 0x178   : > { %p3959_p10 = por %p3958_p2, %p3957_p6 }
 0x17a   : > { %p3961_p3 = por %p3960_p0, %p3959_p10 }
 0x17c   : > { %p3962_p4 = pnand %p3961_p3, %p3955_p7 }
 0x17e   : > { %3965 = shalt.err (!%p3962_p4)  }
 0x17f   : > { %s3966_s13 = scalar_lea.vmem %s859_s3, 16  ;;  %p3971_p12 = scmp.lt.s32.totalorder %s859_s3, %s4748_s12 }
 0x180   : > { %p3967_p13 = scmp.ne.s32.totalorder %s859_s3, %s3966_s13  ;;  %p3972_p9 = scmp.lt.s32.totalorder %s4776_s6, %s3966_s13 }
 0x182   : > { %p3973_p11 = por %p3972_p9, %p3971_p12 }
 0x184   : > { %p3974_p1 = pnand %p3973_p11, %p3967_p13 }
 0x186   : > { %3977 = shalt.err (!%p3974_p1)  }
 0x187   : > { %861 = dma.hbm_to_vmem [thread:$0]  %s848_s28, 16, %s859_s3, [#allocation4 + $0x4] }
 0x188   : > { %s3017_s17 = sshll.u32 %s863_s18, 4  ;;  %s4225_s2 = smov [#allocation2 + $0x6]  }
 0x189   : > { %s865_s26 = scalar_lea.hbm %s5295_s9, %s3017_s17  ;;  %s892_s24 = sshll.u32 %s4225_s2, 4  ;;  %s893_s24 = int_to_ptr.vmem [resolvable:$true] %s892_s24 }
 0x18a   : > { %s3978_s21 = scalar_lea.hbm %s865_s26, 16  ;;  %p3981_p5 = scmp.lt.u32.totalorder %s865_s26, %s5295_s9 }
 0x18b   : > { %p3979_p8 = scmp.ne.s32.totalorder %s865_s26, %s3978_s21  ;;  %p3982_p7 = scmp.lt.u32.totalorder %s4767_s20, %s3978_s21 }
 0x18c   : > { %p3984_p2 = scmp.lt.u32.totalorder %s3978_s21, %s865_s26 }
 0x18d   : > { %p3983_p6 = por %p3982_p7, %p3981_p5 }
 0x18f   : > { %p3985_p10 = por %p3984_p2, %p3983_p6 }
 0x191   : > { %p3986_p0 = pnand %p3985_p10, %p3979_p8 }
 0x193   : > { %3989 = shalt.err (!%p3986_p0)  }
 0x194   : > { %s3990_s3 = scalar_lea.vmem %s4828_s0, 16  ;;  %p3995_p4 = scmp.lt.s32.totalorder %s4828_s0, %s4748_s12 }
 0x195   : > { %p3991_p3 = scmp.ne.s32.totalorder %s4828_s0, %s3990_s3  ;;  %p3996_p13 = scmp.lt.s32.totalorder %s4776_s6, %s3990_s3 }
 0x197   : > { %p3997_p12 = por %p3996_p13, %p3995_p4 }
 0x199   : > { %p3998_p9 = pnand %p3997_p12, %p3991_p3 }
 0x19b   : > { %4001 = shalt.err (!%p3998_p9)  }
 0x19c   : > { %878 = dma.hbm_to_vmem [thread:$0]  %s865_s26, 16, %s4828_s0, [#allocation4 + $0x5] }
 0x19d   : > { %s896_s18 = sadd.s32 7, %s4745_s7  ;;  %s3018_s28 = sshll.u32 %s4833_s5, 4 }
 0x19e   : > { %s897_s14 = sld [smem:[#allocation6 + %s896_s18]]  ;;  %s882_s30 = scalar_lea.hbm %s5295_s9, %s3018_s28 }
 0x19f   : > { %s4002_s16 = scalar_lea.hbm %s882_s30, 16  ;;  %p4005_p1 = scmp.lt.u32.totalorder %s882_s30, %s5295_s9 }
 0x1a0   : > { %p4003_p11 = scmp.ne.s32.totalorder %s882_s30, %s4002_s16  ;;  %p4006_p8 = scmp.lt.u32.totalorder %s4767_s20, %s4002_s16 }
 0x1a1   : > { %p4008_p7 = scmp.lt.u32.totalorder %s4002_s16, %s882_s30 }
 0x1a2   : > { %p4007_p5 = por %p4006_p8, %p4005_p1 }
 0x1a4   : > { %p4009_p6 = por %p4008_p7, %p4007_p5 }
 0x1a6   : > { %p4010_p2 = pnand %p4009_p6, %p4003_p11 }
 0x1a8   : > { %4013 = shalt.err (!%p4010_p2)  }
 0x1a9   : > { %s4014_s0 = scalar_lea.vmem %s893_s24, 16  ;;  %p4019_p0 = scmp.lt.s32.totalorder %s893_s24, %s4748_s12 }
 0x1aa   : > { %p4015_p10 = scmp.ne.s32.totalorder %s893_s24, %s4014_s0  ;;  %p4020_p3 = scmp.lt.s32.totalorder %s4776_s6, %s4014_s0 }
 0x1ac   : > { %p4021_p4 = por %p4020_p3, %p4019_p0 }
 0x1ae   : > { %p4022_p13 = pnand %p4021_p4, %p4015_p10 }
 0x1b0   : > { %4025 = shalt.err (!%p4022_p13)  }
 0x1b1   : > { %895 = dma.hbm_to_vmem [thread:$0]  %s882_s30, 16, %s893_s24, [#allocation4 + $0x6] }
 0x1b2   : > { %s4226_s7 = smov [#allocation2 + $0x7]   ;;  %s3019_s26 = sshll.u32 %s897_s14, 4 }
 0x1b3   : > { %s909_s5 = sshll.u32 %s4226_s7, 4  ;;  %s899_s3 = scalar_lea.hbm %s5295_s9, %s3019_s26  ;;  %s910_s5 = int_to_ptr.vmem [resolvable:$true] %s909_s5 }
 0x1b4   : > { %s4026_s18 = scalar_lea.hbm %s899_s3, 16  ;;  %p4029_p9 = scmp.lt.u32.totalorder %s899_s3, %s5295_s9 }
 0x1b5   : > { %p4027_p12 = scmp.ne.s32.totalorder %s899_s3, %s4026_s18  ;;  %p4030_p11 = scmp.lt.u32.totalorder %s4767_s20, %s4026_s18 }
 0x1b6   : > { %p4032_p8 = scmp.lt.u32.totalorder %s4026_s18, %s899_s3 }
 0x1b7   : > { %p4031_p1 = por %p4030_p11, %p4029_p9 }
 0x1b9   : > { %p4033_p5 = por %p4032_p8, %p4031_p1 }
 0x1bb   : > { %p4034_p7 = pnand %p4033_p5, %p4027_p12 }
 0x1bd   : > { %4037 = shalt.err (!%p4034_p7)  }
 0x1be   : > { %s4038_s24 = scalar_lea.vmem %s910_s5, 16  ;;  %p4043_p2 = scmp.lt.s32.totalorder %s910_s5, %s4748_s12 }
 0x1bf   : > { %p4039_p6 = scmp.ne.s32.totalorder %s910_s5, %s4038_s24  ;;  %p4044_p10 = scmp.lt.s32.totalorder %s4776_s6, %s4038_s24 }
 0x1c1   : > { %p4045_p0 = por %p4044_p10, %p4043_p2 }
 0x1c3   : > { %p4046_p3 = pnand %p4045_p0, %p4039_p6 }
 0x1c5   : > { %4049 = shalt.err (!%p4046_p3)  }
 0x1c6   : > { %912 = dma.hbm_to_vmem [thread:$0]  %s899_s3, 16, %s910_s5, [#allocation4 + $0x7] }
 0x1c7   : > { %4140 = dma.done.wait [#allocation4], 16 }
 0x1c8   : > { %4141 = vsyncadd [#allocation4], 4294967280 }
 0x1c9   : > { %4142 = dma.done.wait [#allocation4 + $0x1], 16 }
 0x1ca   : > { %4143 = vsyncadd [#allocation4 + $0x1], 4294967280 }
 0x1cb   : > { %4144 = dma.done.wait [#allocation4 + $0x2], 16 }
 0x1cc   : > { %4145 = vsyncadd [#allocation4 + $0x2], 4294967280 }
 0x1cd   : > { %4146 = dma.done.wait [#allocation4 + $0x3], 16 }
 0x1ce   : > { %4147 = vsyncadd [#allocation4 + $0x3], 4294967280 }
 0x1cf   : > { %4148 = dma.done.wait [#allocation4 + $0x4], 16 }
 0x1d0   : > { %4149 = vsyncadd [#allocation4 + $0x4], 4294967280 }
 0x1d1   : > { %4150 = dma.done.wait [#allocation4 + $0x5], 16 }
 0x1d2   : > { %4151 = vsyncadd [#allocation4 + $0x5], 4294967280 }
 0x1d3   : > { %4152 = dma.done.wait [#allocation4 + $0x6], 16 }
 0x1d4   : > { %4153 = vsyncadd [#allocation4 + $0x6], 4294967280 }
 0x1d5   : > { %4154 = dma.done.wait [#allocation4 + $0x7], 16 }
 0x1d6   : > { %4155 = vsyncadd [#allocation4 + $0x7], 4294967280  ;;  %v929_v0 = vld [vmem:[#allocation2] sm:$0xff]  ;;  %v930_v1 = vld [vmem:[#allocation7] sm:$0xff] }
 0x1d7   : > { %v931_v2 = vadd.f32 %v930_v1, %v929_v0 }
 0x1d9   : > { %932 = vst [vmem:[#allocation2] sm:$0xff] %v931_v2 }
 0x1da PF: > { %v3498_v4 = vld [vmem:[%s4684_s25 + $0x4] ss:$12 sps:$4 sm:$0xff]   ;;  %v3500_v5 = vld [vmem:[%s4684_s25] ss:$12 sps:$4 sm:$0xff]   ;;  %v4227_v6 = vmov 0.0   ;;  %v4228_v28 = vmov 0   ;;  %v934_v57 = vlaneseq }
 0x1db   : > { %3244 = vmatprep.subr.bf16.mxu1 %v4227_v6  ;;  %v3501_v7 = vld [vmem:[%s4684_s25 + $0x8] ss:$12 sps:$4 sm:$0xff]   ;;  %1129 = vmatprep.subr.bf16.mxu0 %v3498_v4  ;;  %v3504_v9 = vld [vmem:[%s4684_s25 + $0x18] ss:$12 sps:$4 sm:$0xff]   ;;  %v3505_v10 = vld [vmem:[%s4684_s25 + $0x20] ss:$12 sps:$4 sm:$0xff]  }
 0x1dc   : > { %v3502_v8 = vld [vmem:[%s4684_s25 + $0x1c] ss:$12 sps:$4 sm:$0xff]   ;;  %1130 = vmatpush1.bf16.msra.mxu0 %v3500_v5  ;;  %3245 = vmatpush3.bf16.msra.mxu1 %v3501_v7  ;;  %v3506_v11 = vld [vmem:[%s4684_s25 + $0x34] ss:$12 sps:$4 sm:$0xff]   ;;  %v3509_v13 = vld [vmem:[%s4684_s25 + $0x38] ss:$12 sps:$4 sm:$0xff]  }
 0x1dd   : > { %1131 = vmatprep.subr.bf16.mxu0 %v3502_v8  ;;  %3246 = vmatprep.subr.bf16.mxu1 %v4227_v6  ;;  %v3508_v12 = vld [vmem:[%s4684_s25 + $0x30] ss:$12 sps:$4 sm:$0xff]   ;;  %v3510_v18 = vld [vmem:[%s4684_s25 + $0x4c] ss:$12 sps:$4 sm:$0xff]   ;;  %v3512_v19 = vld [vmem:[%s4684_s25 + $0x48] ss:$12 sps:$4 sm:$0xff]  }
 0x1de   : > { %v3513_v20 = vld [vmem:[%s4684_s25 + $0x50] ss:$12 sps:$4 sm:$0xff]   ;;  %v3516_v22 = vld [vmem:[%s4684_s25 + $0x60] ss:$12 sps:$4 sm:$0xff]   ;;  %v3517_v23 = vld [vmem:[%s4684_s25 + $0x68] ss:$12 sps:$4 sm:$0xff]   ;;  %1161 = vmatprep.mubr.bf16.mxu0 %v4228_v28 }
 0x1df   : > { %v3514_v21 = vld [vmem:[%s4684_s25 + $0x64] ss:$12 sps:$4 sm:$0xff]   ;;  %v3518_v24 = vld [vmem:[%s4684_s25 + $0x7c] ss:$12 sps:$4 sm:$0xff]   ;;  %v3521_v26 = vld [vmem:[%s4684_s25 + $0x80] ss:$12 sps:$4 sm:$0xff]  }
 0x1e0   : > { %v4874_v3 = vld [vmem:[#allocation2] sm:$0xff]  ;;  %1132 = vmatpush1.bf16.msra.mxu0 %v3504_v9  ;;  %3247 = vmatpush3.bf16.msra.mxu1 %v3505_v10  ;;  %v3520_v25 = vld [vmem:[%s4684_s25 + $0x78] ss:$12 sps:$4 sm:$0xff]   ;;  %v3522_v27 = vld [vmem:[%s4684_s25 + $0x94] ss:$12 sps:$4 sm:$0xff]   ;;  %vm4229_vm0 = vmmov 0  }
 0x1e1   : > { %942 = vadd.xlane.f32.xlu0 %v4874_v3  ;;  %1133 = vmatprep.subr.bf16.mxu0 %v3506_v11  ;;  %v3524_v29 = vld [vmem:[%s4684_s25 + $0x90] ss:$12 sps:$4 sm:$0xff]   ;;  %v3525_v30 = vld [vmem:[%s4684_s25 + $0x98] ss:$12 sps:$4 sm:$0xff]   ;;  %v3528_v32 = vld [vmem:[%s4684_s25 + $0xa8] ss:$12 sps:$4 sm:$0xff]  }
 0x1e2   : > { %3248 = vmatprep.subr.bf16.mxu1 %v4227_v6  ;;  %3260 = vmatprep.mubr.msk.bf16.mxu1 %vm4229_vm0, %v4227_v6  ;;  %v3526_v31 = vld [vmem:[%s4684_s25 + $0xac] ss:$12 sps:$4 sm:$0xff]   ;;  %v3529_v33 = vld [vmem:[%s4684_s25 + $0xb0] ss:$12 sps:$4 sm:$0xff]   ;;  %s5296_s6 = sld [smem:[#allocation67_spill]]  ;;  %s5298_s30 = sld [smem:[#allocation68_spill]] }
 0x1e3   : > { %vm1213_vm1 = vcmask 261120   ;;  %s4230_s2 = smov 96   ;;  %s4231_s21 = smov 32   ;;  %vm1276_vm2 = vcmask 1043456   ;;  %v4941_v58 = vshrl.u32 %v934_v57, 7  ;;  %v937_v59 = vand.u32 127, %v934_v57 }
 0x1e4   : > { %1134 = vmatpush1.bf16.msra.mxu0 %v3508_v12  ;;  %3249 = vmatpush3.bf16.msra.mxu1 %v3509_v13  ;;  %v4232_v60 = vmov -1e+30   ;;  %vm1260_vm4 = vcmask 64512   ;;  %s4233_s0 = smov 64   ;;  %vm1438_vm5 = vcmask 523520   ;;  %vm1554_vm6 = vcmask 785920  }
 0x1e5   : > { %3250 = vmatprep.subr.bf16.mxu1 %v4227_v6  ;;  %1135 = vmatprep.subr.bf16.mxu0 %v3510_v18  ;;  %vm938_vm3 = vcmp.le.s32.totalorder %v937_v59, %v4941_v58  ;;  %vm1670_vm7 = vcmask 1048320   ;;  %s5300_s5 = sld [smem:[#allocation71_spill]]  ;;  %s5302_s3 = sld [smem:[#allocation72_spill]] }
 0x1e6   : > { %v4944_v61 = vsel %vm938_vm3, 0.0, %v4232_v60  ;;  %s5304_s13 = sld [smem:[#allocation73_spill]]  ;;  %s5306_s12 = sld [smem:[#allocation77_spill]] }
 0x1e8   : > { %1136 = vmatpush1.bf16.msra.mxu0 %v3512_v19  ;;  %3251 = vmatpush3.bf16.msra.mxu1 %v3513_v20  ;;  %s5297_s14 = scalar_lea.vmem %s5296_s6, %s4709_s1  ;;  %s5299_s16 = scalar_lea.vmem %s5298_s30, %s4709_s1 }
 0x1e9   : > { %3252 = vmatprep.subr.bf16.mxu1 %v4227_v6  ;;  %1137 = vmatprep.subr.bf16.mxu0 %v3514_v21  ;;  %v3020_v37 = vld [vmem:[%s5297_s14] ss:$0 sm:$0xff]  ;;  %s5308_s6 = sld [smem:[#allocation54_spill]] }
 0x1ea   : > { %v3021_v40 = vld [vmem:[%s5299_s16] ss:$0 sm:$0xff] }
 0x1eb   : > { %s5301_s26 = scalar_lea.vmem %s5300_s5, %s4709_s1  ;;  %s5303_s18 = scalar_lea.vmem %s5302_s3, %s4709_s1 }
 0x1ec   : > { %1138 = vmatpush1.bf16.msra.mxu0 %v3516_v22  ;;  %3253 = vmatpush3.bf16.msra.mxu1 %v3517_v23  ;;  %s5305_s24 = scalar_lea.vmem %s5304_s13, %s4709_s1  ;;  %s5307_s20 = scalar_lea.vmem %s5306_s12, %s4709_s1 }
 0x1ed   : > { %1139 = vmatprep.subr.bf16.mxu0 %v3518_v24  ;;  %3254 = vmatprep.subr.bf16.mxu1 %v4227_v6 }
 0x1ef   : > { %p3130_p4 = scmp.ne.s32.totalorder %s5308_s6, 1 }
 0x1f0   : > { %1140 = vmatpush1.bf16.msra.mxu0 %v3520_v25  ;;  %3255 = vmatpush3.bf16.msra.mxu1 %v3521_v26  ;;  %s5309_s25 = sld [smem:[#allocation78_spill]] (!%p3130_p4)  ;;  %s5310_s16 = sld [smem:[#allocation79_spill]] (!%p3130_p4) }
 0x1f1   : > { %1141 = vmatprep.subr.bf16.mxu0 %v3522_v27  ;;  %3256 = vmatprep.subr.bf16.mxu1 %v4227_v6 }
 0x1f4   : > { %1142 = vmatpush1.bf16.msra.mxu0 %v3524_v29  ;;  %3257 = vmatpush3.bf16.msra.mxu1 %v3525_v30 }
 0x1f5   : > { %1143 = vmatprep.subr.bf16.mxu0 %v3526_v31  ;;  %3258 = vmatprep.subr.bf16.mxu1 %v4227_v6 }
 0x1f8   : > { %1144 = vmatpush1.bf16.msra.mxu0 %v3528_v32  ;;  %3259 = vmatpush3.bf16.msra.mxu1 %v3529_v33 }
 0x1f9   : > { %3264 = vmatprep.subr.bf16.mxu1 %v4227_v6  ;;  %3288 = vmatprep.subr.bf16.mxu0 %v4227_v6 }
 0x26e   : > { %v943_v14 = vpop.xlane.xlu0 %942 }
 0x26f   : > { %v945_v15 = vmul.f32 0.0078125, %v943_v14 }
 0x271   : > { %v946_v16 = vsub.f32 %v4874_v3, %v945_v15 }
 0x273   : > { %v947_v17 = vmul.f32 %v946_v16, %v946_v16  ;;  %v957_v38 = vmul.f32 %v3020_v37, %v946_v16 }
 0x275   : > { %948 = vadd.xlane.f32.xlu0 %v947_v17 }
 0x302   : > { %v949_v34 = vpop.xlane.xlu0 %948 }
 0x303   : > { %v950_v35 = vmul.f32 0.0078125, %v949_v34 }
 0x305   : > { %v958_v36 = vadd.f32 1e-05, %v950_v35 }
 0x307   : > { %3618 = vrsqrt.f32 %v958_v36 }
 0x311   : > { %v3619_v39 = vpop.eup %3618 }
 0x312   : > { %v960_v41 = vmul.f32 %v3619_v39, %v957_v38 }
 0x314   : > { %v967_v42 = vadd.f32 %v3021_v40, %v960_v41 }
 0x316   : > { %v968_v43 = vpack.c.bf16 %v967_v42, %v967_v42 }
 0x318   : > { %1162 = vmatmul.mubr.bf16.vlgmr.msra.gmra.mrb[0].mxu0 %v968_v43  ;;  %3261 = vmatmul.mubr.bf16.vlgmr.msra.gmra.mrb[0].mxu1 %v968_v43 }
 0x319   : > { %3266 = vmatprep.mubr.msk.bf16.mxu1 %vm4229_vm0, %v4227_v6  ;;  %3290 = vmatprep.mubr.msk.bf16.mxu0 %vm4229_vm0, %v4227_v6 }
 0x3eb   : > { %v1163_v44 = vpop.f32.mrb[0].mxu0  ;;  %v1204_v45 = vpop.f32.mrb[0].mxu1 }
 0x3ec   : > { %v1165_v46 = vpop.f32.mrb[1].mxu0  ;;  %v3262_v47 = vpop.f32.mrb[1].mxu1  ;;  %v4932_v54 = vpack.c.bf16 %v1204_v45, %v1204_v45  ;;  %v1210_v55 = vpack.c.bf16 %v1163_v44, %v1163_v44 }
 0x3ed   : > { %v1211_v48 = vpack.c.bf16 %v1165_v46, %v1165_v46  ;;  %v1167_v49 = vpop.f32.mrb[2].mxu0  ;;  %v1207_v50 = vpop.f32.mrb[2].mxu1 }
 0x3ee   : > { %v1168_v51 = vpop.f32.mrb[3].mxu0  ;;  %v3263_v52 = vpop.f32.mrb[3].mxu1  ;;  %v1278_v56 = vsel %vm1276_vm2, %v4932_v54, 0 }
 0x3ef   : > { %1325 = vrot.lane.b32.xlu0 %v1211_v48, %s4230_s2  ;;  %v1218_v53 = vsel %vm1213_vm1, %v1211_v48, 0 }
 0x3f0   : > { %3265 = vmatpush3.bf16.xpose.msra.mxu1 %v1218_v53 }
 0x3f1   : > { %3270 = vmatprep.subr.bf16.mxu1 %v4227_v6 }
 0x3f3   : > { %1558 = vrot.lane.b32.xlu0 %v1211_v48, %s4231_s21 }
 0x3f7   : > { %3267 = vmatmul.mubr.msk.bf16.vlgmr.msra.gmra.mrb[4].mxu1 %vm1213_vm1, %v1210_v55 }
 0x3f8   : > { %3271 = vmatpush3.bf16.msra.mxu1 %v1278_v56  ;;  %3272 = vmatprep.mubr.msk.bf16.mxu1 %vm4229_vm0, %v4227_v6 }
 0x3f9   : > { %3276 = vmatprep.subr.bf16.mxu1 %v4227_v6 }
 0x461   : > { %v1326_v13 = vpop.permute.xlu0 %1325 }
 0x462   : > { %v1331_v20 = vsel %vm1213_vm1, %v1326_v13, 0 }
 0x465   : > { %v1559_v18 = vpop.permute.xlu0 %1558 }
 0x466   : > { %v1564_v22 = vsel %vm1213_vm1, %v1559_v18, 0 }
 0x4ca   : > { %v1254_v62 = vpop.f32.mrb[4].mxu1 }
 0x4cb   : > { %v1255_v63 = vadd.f32 %v1254_v62, %v4944_v61  ;;  %v3268_v0 = vpop.f32.mrb[5].mxu1 }
 0x4cc   : > { %v1257_v1 = vpop.f32.mrb[6].mxu1 }
 0x4cd   : > { %v3269_v2 = vpop.f32.mrb[7].mxu1  ;;  %v1261_v4 = vsel %vm1260_vm4, %v1255_v63, -inf }
 0x4ce   : > { %1262 = vmax.xlane.f32.xlu1 %v1261_v4 }
 0x55b   : > { %v1263_v5 = vpop.xlane.xlu1 %1262 }
 0x55c   : > { %v1264_v7 = vsub.f32 %v1255_v63, %v1263_v5 }
 0x55e   : > { %v1265_v8 = vmul.f32 1.442695, %v1264_v7 }
 0x560   : > { %3620 = vpow2.f32 %v1265_v8 }
 0x56a   : > { %v3621_v9 = vpop.eup %3620 }
 0x56b   : > { %v1267_v10 = vsel %vm1260_vm4, %v3621_v9, 0.0 }
 0x56c   : > { %1268 = vadd.xlane.f32.xlu1 %v1267_v10 }
 0x57d   : > { %1322 = vrot.lane.b32.xlu1 %v1210_v55, %s4230_s2 }
 0x581   : > { %1442 = vrot.lane.b32.xlu1 %v1211_v48, %s4233_s0 }
 0x585   : > { %1440 = vrot.lane.b32.xlu1 %v1210_v55, %s4233_s0 }
 0x589   : > { %1556 = vrot.lane.b32.xlu1 %v1210_v55, %s4231_s21 }
 0x5f9   : > { %v1269_v11 = vpop.xlane.xlu1 %1268 }
 0x5fa   : > { %3622 = vrcp.f32 %v1269_v11 }
 0x5fd   : > { %v1323_v12 = vpop.permute.xlu1 %1322 }
 0x601   : > { %v1443_v14 = vpop.permute.xlu1 %1442 }
 0x602   : > { %v1448_v15 = vsel %vm1213_vm1, %v1443_v14, 0 }
 0x603   : > { %3289 = vmatpush3.bf16.xpose.msra.mxu0 %v1448_v15 }
 0x604   : > { %v3623_v16 = vpop.eup %3622  ;;  %3300 = vmatprep.subr.bf16.mxu0 %v4227_v6 }
 0x605   : > { %v1271_v17 = vmul.f32 %v3623_v16, %v3621_v9  ;;  %v1441_v21 = vpop.permute.xlu1 %1440 }
 0x607   : > { %v1272_v19 = vpack.c.bf16 %v1271_v17, %v1271_v17 }
 0x609   : > { %3273 = vmatmul.mubr.msk.bf16.vlgmr.msra.gmra.mrb[8].mxu1 %vm1260_vm4, %v1272_v19  ;;  %v1557_v23 = vpop.permute.xlu1 %1556  ;;  %v3530_v19 = vld [vmem:[%s4690_s19] sm:$0xff]  }
 0x60a   : > { %3277 = vmatpush3.bf16.xpose.msra.mxu1 %v1331_v20  ;;  %3291 = vmatmul.mubr.msk.bf16.vlgmr.msra.gmra.mrb[4].mxu0 %vm1213_vm1, %v1441_v21  ;;  %v3531_v20 = vld [vmem:[%s4690_s19 + $0x8] sm:$0xff]   ;;  %v3532_v21 = vld [vmem:[%s4690_s19 + $0x10] sm:$0xff]  }
 0x60b   : > { %3301 = vmatpush3.bf16.xpose.msra.mxu0 %v1564_v22  ;;  %3278 = vmatprep.mubr.msk.bf16.mxu1 %vm4229_vm0, %v4227_v6  ;;  %v3533_v22 = vld [vmem:[%s4690_s19 + $0x18] sm:$0xff]  }
 0x60c   : > { %3302 = vmatprep.mubr.msk.bf16.mxu0 %vm4229_vm0, %v4227_v6  ;;  %3282 = vmatprep.subr.bf16.mxu1 %v4227_v6 }
 0x60d   : > { %3312 = vmatprep.subr.bf16.mxu0 %v4227_v6 }
 0x611   : > { %3279 = vmatmul.mubr.msk.bf16.vlgmr.msra.gmra.mrb[12].mxu1 %vm1213_vm1, %v1323_v12 }
 0x612   : > { %3303 = vmatmul.mubr.msk.bf16.vlgmr.msra.gmra.mrb[8].mxu0 %vm1213_vm1, %v1557_v23  ;;  %3284 = vmatprep.mubr.msk.bf16.mxu1 %vm4229_vm0, %v4227_v6  ;;  %v3534_v23 = vld [vmem:[%s4690_s19 + $0x20] sm:$0xff]  }
 0x613   : > { %3328 = vmatprep.mubr.msk.bf16.mxu0 %vm4229_vm0, %v4227_v6  ;;  %3313 = vmatpush3.bf16.msra.mxu0 %v3530_v19  ;;  %v3577_v19 = vld [vmem:[%s4692_s15 + $0xc8] ss:$16 sps:$4 sm:$0xff]  }
 0x614   : > { %3314 = vmatprep.subr.bf16.mxu0 %v4227_v6 }
 0x617   : > { %3315 = vmatpush3.bf16.msra.mxu0 %v3531_v20  ;;  %v3582_v20 = vld [vmem:[%s4692_s15 + $0xe4] ss:$16 sps:$4 sm:$0xff]  }
 0x618   : > { %3316 = vmatprep.subr.bf16.mxu0 %v4227_v6 }
 0x61b   : > { %3317 = vmatpush3.bf16.msra.mxu0 %v3532_v21  ;;  %v3585_v21 = vld [vmem:[%s4692_s15 + $0xec] ss:$16 sps:$4 sm:$0xff]  }
 0x61c   : > { %3318 = vmatprep.subr.bf16.mxu0 %v4227_v6 }
 0x61f   : > { %3319 = vmatpush3.bf16.msra.mxu0 %v3533_v22  ;;  %v3580_v22 = vld [vmem:[%s4692_s15 + $0xe0] ss:$16 sps:$4 sm:$0xff]  }
 0x620   : > { %3320 = vmatprep.subr.bf16.mxu0 %v4227_v6 }
 0x623   : > { %3321 = vmatpush3.bf16.msra.mxu0 %v3534_v23  ;;  %v3583_v23 = vld [vmem:[%s4692_s15 + $0xe8] ss:$16 sps:$4 sm:$0xff]  }
 0x624   : > { %3322 = vmatprep.subr.bf16.mxu0 %v4227_v6 }
 0x6dc   : > { %v1314_v24 = vpop.f32.mrb[8].mxu1 }
 0x6dd   : > { %1320 = vst.msk [vmem:[#allocation3] sm:$0xff] %vm1213_vm1, %v1314_v24  ;;  %v3274_v25 = vpop.f32.mrb[9].mxu1  ;;  %v1484_v26 = vpop.f32.mrb[4].mxu0  ;;  %v3535_v24 = vld [vmem:[%s4690_s19 + $0x28] sm:$0xff]  }
 0x6de   : > { %v1485_v27 = vadd.f32 %v1484_v26, %v4944_v61  ;;  %v1317_v29 = vpop.f32.mrb[10].mxu1  ;;  %v3292_v30 = vpop.f32.mrb[5].mxu0  ;;  %3323 = vmatpush3.bf16.msra.mxu0 %v3535_v24 }
 0x6df   : > { %v3275_v31 = vpop.f32.mrb[11].mxu1  ;;  %v1487_v32 = vpop.f32.mrb[6].mxu0  ;;  %3324 = vmatprep.subr.bf16.mxu0 %v4227_v6  ;;  %v3536_v30 = vld [vmem:[%s4690_s19 + $0x30] sm:$0xff]  }
 0x6e0   : > { %v3293_v33 = vpop.f32.mrb[7].mxu0  ;;  %v1490_v34 = vsel %vm1260_vm4, %v1485_v27, -inf  ;;  %v3537_v31 = vld [vmem:[%s4690_s19 + $0x38] sm:$0xff]  }
 0x6e1   : > { %1491 = vmax.xlane.f32.xlu1 %v1490_v34 }
 0x6e2   : > { %3325 = vmatpush3.bf16.msra.mxu0 %v3536_v30 }
 0x6e3   : > { %3326 = vmatprep.subr.bf16.mxu0 %v4227_v6 }
 0x6e4   : > { %v1367_v35 = vpop.f32.mrb[12].mxu1 }
 0x6e5   : > { %v1368_v36 = vadd.f32 %v1367_v35, %v4944_v61  ;;  %v3280_v37 = vpop.f32.mrb[13].mxu1  ;;  %v1600_v38 = vpop.f32.mrb[8].mxu0 }
 0x6e6   : > { %v1370_v39 = vpop.f32.mrb[14].mxu1  ;;  %v3304_v40 = vpop.f32.mrb[9].mxu0  ;;  %v1601_v41 = vadd.f32 %v1600_v38, %v4944_v61  ;;  %3327 = vmatpush3.bf16.msra.mxu0 %v3537_v31  ;;  %v3064_v31 = vld [vmem:[%s5305_s24] ss:$0 sm:$0xff] }
 0x6e7   : > { %v3281_v42 = vpop.f32.mrb[15].mxu1  ;;  %v1603_v43 = vpop.f32.mrb[10].mxu0  ;;  %v1373_v44 = vsel %vm1260_vm4, %v1368_v36, -inf }
 0x6e8   : > { %1374 = vmax.xlane.f32.xlu0 %v1373_v44  ;;  %v3305_v45 = vpop.f32.mrb[11].mxu0  ;;  %v1606_v46 = vsel %vm1260_vm4, %v1601_v41, -inf }
 0x6e9   : > { %v3062_v45 = vld [vmem:[%s5301_s26] ss:$0 sm:$0xff] }
 0x6ec   : > { %1607 = vmax.xlane.f32.xlu0 %v1606_v46 }
 0x76e   : > { %v1492_v47 = vpop.xlane.xlu1 %1491 }
 0x76f   : > { %v1493_v48 = vsub.f32 %v1485_v27, %v1492_v47 }
 0x771   : > { %v1494_v49 = vmul.f32 1.442695, %v1493_v48 }
 0x773   : > { %3624 = vpow2.f32 %v1494_v49 }
 0x775   : > { %v1375_v50 = vpop.xlane.xlu0 %1374 }
 0x776   : > { %v1376_v51 = vsub.f32 %v1368_v36, %v1375_v50 }
 0x778   : > { %v1377_v52 = vmul.f32 1.442695, %v1376_v51  ;;  %v3540_v51 = vld [vmem:[%s4692_s15 + $0x4] ss:$16 sps:$4 sm:$0xff]  }
 0x779   : > { %v1608_v53 = vpop.xlane.xlu0 %1607 }
 0x77a   : > { %3626 = vpow2.f32 %v1377_v52  ;;  %v1609_v55 = vsub.f32 %v1601_v41, %v1608_v53  ;;  %v3541_v52 = vld [vmem:[%s4692_s15 + $0x8] ss:$16 sps:$4 sm:$0xff]   ;;  %v3543_v53 = vld [vmem:[%s4692_s15 + $0xc] ss:$16 sps:$4 sm:$0xff]  }
 0x77b   : > { %2070 = vmatprep.subr.bf16.mxu0 %v3543_v53  ;;  %v3605_v53 = vld [vmem:[%s4698_s4 + $0xa0] sm:$0xff]  }
 0x77c   : > { %v1610_v56 = vmul.f32 1.442695, %v1609_v55  ;;  %v3546_v55 = vld [vmem:[%s4692_s15 + $0x24] ss:$16 sps:$4 sm:$0xff]  }
 0x77d   : > { %v3625_v57 = vpop.eup %3624 }
 0x77e   : > { %3628 = vpow2.f32 %v1610_v56  ;;  %v1496_v59 = vsel %vm1260_vm4, %v3625_v57, 0.0  ;;  %v3549_v56 = vld [vmem:[%s4692_s15 + $0x2c] ss:$16 sps:$4 sm:$0xff]  }
 0x77f   : > { %1497 = vadd.xlane.f32.xlu0 %v1496_v59  ;;  %v3552_v59 = vld [vmem:[%s4692_s15 + $0x44] ss:$16 sps:$4 sm:$0xff]  }
 0x784   : > { %v3627_v60 = vpop.eup %3626 }
 0x785   : > { %v1379_v61 = vsel %vm1260_vm4, %v3627_v60, 0.0 }
 0x786   : > { %1380 = vadd.xlane.f32.xlu0 %v1379_v61  ;;  %v3550_v61 = vld [vmem:[%s4692_s15 + $0x40] ss:$16 sps:$4 sm:$0xff]  }
 0x788   : > { %v3629_v62 = vpop.eup %3628 }
 0x789   : > { %v1612_v63 = vsel %vm1260_vm4, %v3629_v62, 0.0 }
 0x78a   : > { %1613 = vadd.xlane.f32.xlu1 %v1612_v63 }
 0x79b   : > { %1502 = vrot.lane.b32.xlu1 %v4932_v54, %s4233_s0 }
 0x79c   : > { %1386 = vrot.lane.b32.xlu0 %v4932_v54, %s4230_s2 }
 0x79f   : > { %1618 = vrot.lane.b32.xlu1 %v4932_v54, %s4231_s21 }
 0x80c   : > { %v1498_v0 = vpop.xlane.xlu0 %1497 }
 0x813   : > { %v1381_v1 = vpop.xlane.xlu0 %1380 }
 0x814   : > { %3630 = vrcp.f32 %v1381_v1 }
 0x815   : > { %3632 = vrcp.f32 %v1498_v0 }
 0x817   : > { %v1387_v2 = vpop.permute.xlu0 %1386  ;;  %v1614_v5 = vpop.xlane.xlu1 %1613 }
 0x818   : > { %v1392_v4 = vsel %vm1276_vm2, %v1387_v2, 0  ;;  %3634 = vrcp.f32 %v1614_v5  ;;  %v3561_v5 = vld [vmem:[%s4692_s15 + $0x6c] ss:$16 sps:$4 sm:$0xff]  }
 0x819   : > { %3283 = vmatpush3.bf16.msra.mxu1 %v1392_v4  ;;  %v3558_v4 = vld [vmem:[%s4692_s15 + $0x64] ss:$16 sps:$4 sm:$0xff]  }
 0x81a   : > { %3294 = vmatprep.subr.bf16.mxu1 %v4227_v6 }
 0x81b   : > { %v1503_v9 = vpop.permute.xlu1 %1502 }
 0x81c   : > { %v1508_v12 = vsel %vm1276_vm2, %v1503_v9, 0  ;;  %v3562_v9 = vld [vmem:[%s4692_s15 + $0x80] ss:$16 sps:$4 sm:$0xff]  }
 0x81e   : > { %v3631_v7 = vpop.eup %3630 }
 0x81f   : > { %v1383_v8 = vmul.f32 %v3631_v7, %v3627_v60  ;;  %v3633_v11 = vpop.eup %3632  ;;  %v1619_v13 = vpop.permute.xlu1 %1618  ;;  %v3555_v60 = vld [vmem:[%s4692_s15 + $0x4c] ss:$16 sps:$4 sm:$0xff]   ;;  %v3556_v7 = vld [vmem:[%s4692_s15 + $0x60] ss:$16 sps:$4 sm:$0xff]  }
 0x820   : > { %v1500_v54 = vmul.f32 %v3633_v11, %v3625_v57  ;;  %v1624_v16 = vsel %vm1276_vm2, %v1619_v13, 0  ;;  %v3547_v57 = vld [vmem:[%s4692_s15 + $0x28] ss:$16 sps:$4 sm:$0xff]   ;;  %v3573_v13 = vld [vmem:[%s4692_s15 + $0xac] ss:$16 sps:$4 sm:$0xff]  }
 0x821   : > { %v1384_v10 = vpack.c.bf16 %v1383_v8, %v1383_v8  ;;  %v3559_v8 = vld [vmem:[%s4692_s15 + $0x68] ss:$16 sps:$4 sm:$0xff]  }
 0x822   : > { %v1501_v14 = vpack.c.bf16 %v1500_v54, %v1500_v54  ;;  %v3635_v15 = vpop.eup %3634  ;;  %v3565_v11 = vld [vmem:[%s4692_s15 + $0x88] ss:$16 sps:$4 sm:$0xff]   ;;  %v3570_v54 = vld [vmem:[%s4692_s15 + $0xa4] ss:$16 sps:$4 sm:$0xff]  }
 0x823   : > { %3285 = vmatmul.mubr.msk.bf16.vlgmr.msra.gmra.mrb[16].mxu1 %vm1260_vm4, %v1384_v10  ;;  %v1616_v17 = vmul.f32 %v3635_v15, %v3629_v62  ;;  %v3553_v62 = vld [vmem:[%s4692_s15 + $0x48] ss:$16 sps:$4 sm:$0xff]   ;;  %v3564_v10 = vld [vmem:[%s4692_s15 + $0x84] ss:$16 sps:$4 sm:$0xff]  }
 0x824   : > { %3295 = vmatpush3.bf16.msra.mxu1 %v1508_v12  ;;  %3296 = vmatprep.mubr.msk.bf16.mxu1 %vm4229_vm0, %v4227_v6  ;;  %v3567_v12 = vld [vmem:[%s4692_s15 + $0x8c] ss:$16 sps:$4 sm:$0xff]   ;;  %v3571_v15 = vld [vmem:[%s4692_s15 + $0xa8] ss:$16 sps:$4 sm:$0xff]  }
 0x825   : > { %3306 = vmatprep.subr.bf16.mxu1 %v4227_v6  ;;  %v1617_v18 = vpack.c.bf16 %v1616_v17, %v1616_v17  ;;  %v3579_v17 = vld [vmem:[%s4692_s15 + $0xcc] ss:$16 sps:$4 sm:$0xff]  }
 0x82b   : > { %3297 = vmatmul.mubr.msk.bf16.vlgmr.msra.gmra.mrb[20].mxu1 %vm1260_vm4, %v1501_v14  ;;  %v3568_v14 = vld [vmem:[%s4692_s15 + $0xa0] ss:$16 sps:$4 sm:$0xff]  }
 0x82c   : > { %3307 = vmatpush3.bf16.msra.mxu1 %v1624_v16  ;;  %3308 = vmatprep.mubr.msk.bf16.mxu1 %vm4229_vm0, %v4227_v6  ;;  %v3576_v16 = vld [vmem:[%s4692_s15 + $0xc4] ss:$16 sps:$4 sm:$0xff]  }
 0x82d   : > { %2029 = vmatprep.subr.bf16.mxu1 %v3540_v51  ;;  %v3603_v51 = vld [vmem:[%s4698_s4 + $0xe0] sm:$0xff]  }
 0x833   : > { %3309 = vmatmul.mubr.msk.bf16.vlgmr.msra.gmra.mrb[24].mxu1 %vm1260_vm4, %v1617_v18  ;;  %v3574_v18 = vld [vmem:[%s4692_s15 + $0xc0] ss:$16 sps:$4 sm:$0xff]  }
 0x834   : > { %2061 = vmatprep.mubr.bf16.mxu1 %v4228_v28 }
 0x8f6   : > { %v1428_v25 = vpop.f32.mrb[16].mxu1 }
 0x8f7   : > { %1435 = vrot.lane.b32.xlu1 %v1428_v25, %s4231_s21  ;;  %v3286_v26 = vpop.f32.mrb[17].mxu1 }
 0x8f8   : > { %v1431_v27 = vpop.f32.mrb[18].mxu1 }
 0x8f9   : > { %v3287_v29 = vpop.f32.mrb[19].mxu1  ;;  %v3063_v27 = vld [vmem:[%s5303_s18] ss:$0 sm:$0xff] }
 0x8fe   : > { %v1544_v32 = vpop.f32.mrb[20].mxu1 }
 0x8ff   : > { %1551 = vrot.lane.b32.xlu0 %v1544_v32, %s4233_s0  ;;  %v3298_v33 = vpop.f32.mrb[21].mxu1 }
 0x900   : > { %v1547_v34 = vpop.f32.mrb[22].mxu1 }
 0x901   : > { %v3299_v35 = vpop.f32.mrb[23].mxu1 }
 0x902   : > { %v3586_v35 = vld [vmem:[%s4698_s4 + $0x40] sm:$0xff]  }
 0x906   : > { %v1660_v36 = vpop.f32.mrb[24].mxu1 }
 0x907   : > { %1667 = vrot.lane.b32.xlu1 %v1660_v36, %s4230_s2  ;;  %v3310_v37 = vpop.f32.mrb[25].mxu1  ;;  %v3587_v36 = vld [vmem:[%s4698_s4 + $0xc0] sm:$0xff]  }
 0x908   : > { %v1663_v38 = vpop.f32.mrb[26].mxu1  ;;  %v3588_v37 = vld [vmem:[%s4698_s4] sm:$0xff]  }
 0x909   : > { %v3311_v39 = vpop.f32.mrb[27].mxu1  ;;  %v3589_v38 = vld [vmem:[%s4698_s4 + $0x80] sm:$0xff]  }
 0x90a   : > { %v3590_v39 = vld [vmem:[%s4698_s4 + $0x48] sm:$0xff]  }
 0x969   : > { %v1436_v40 = vpop.permute.xlu1 %1435 }
 0x96a   : > { %1439 = vst.msk [vmem:[#allocation3] sm:$0xff] %vm1438_vm5, %v1436_v40  ;;  %v3591_v40 = vld [vmem:[%s4698_s4 + $0xc8] sm:$0xff]  }
 0x971   : > { %v1552_v41 = vpop.permute.xlu0 %1551 }
 0x972   : > { %1555 = vst.msk [vmem:[#allocation3] sm:$0xff] %vm1554_vm6, %v1552_v41  ;;  %v3592_v41 = vld [vmem:[%s4698_s4 + $0x8] sm:$0xff]  }
 0x979   : > { %v1668_v6 = vpop.permute.xlu1 %1667 }
 0x97a   : > { %1671 = vst.msk [vmem:[#allocation3] sm:$0xff] %vm1670_vm7, %v1668_v6  ;;  %v3593_v6 = vld [vmem:[%s4698_s4 + $0x88] sm:$0xff]  }
 0x981   : > { %v1672_v42 = vld [vmem:[#allocation3] sm:$0xff] }
 0x982   : > { %v1673_v43 = vpack.c.bf16 %v1672_v42, %v1672_v42  ;;  %v3594_v42 = vld [vmem:[%s4698_s4 + $0x50] sm:$0xff]  }
 0x984   : > { %3329 = vmatmul.mubr.bf16.vlgmr.msra.gmra.mrb[12].mxu0 %v1673_v43  ;;  %v3595_v43 = vld [vmem:[%s4698_s4 + $0xd0] sm:$0xff]  }
 0x985   : > { %2102 = vmatprep.mubr.bf16.mxu0 %v4228_v28  ;;  %v3538_v28 = vld [vmem:[%s4692_s15] ss:$16 sps:$4 sm:$0xff]   ;;  %2071 = vmatpush1.bf16.msra.mxu0 %v3541_v52 }
 0x986   : > { %2030 = vmatpush1.bf16.msra.mxu1 %v3538_v28  ;;  %2072 = vmatprep.subr.bf16.mxu0 %v3549_v56  ;;  %v3602_v28 = vld [vmem:[%s4698_s4 + $0x60] sm:$0xff]   ;;  %v3607_v56 = vld [vmem:[%s4698_s4 + $0xe8] sm:$0xff]  }
 0x987   : > { %2031 = vmatprep.subr.bf16.mxu1 %v3546_v55  ;;  %v3604_v52 = vld [vmem:[%s4698_s4 + $0x20] sm:$0xff]   ;;  %v3606_v55 = vld [vmem:[%s4698_s4 + $0x68] sm:$0xff]  }
 0x989   : > { %2073 = vmatpush1.bf16.msra.mxu0 %v3547_v57  ;;  %v3609_v57 = vld [vmem:[%s4698_s4 + $0xa8] sm:$0xff]  }
 0x98a   : > { %2074 = vmatprep.subr.bf16.mxu0 %v3555_v60  ;;  %v3611_v60 = vld [vmem:[%s4698_s4 + $0xf0] sm:$0xff]  }
 0x98d   : > { %2075 = vmatpush1.bf16.msra.mxu0 %v3553_v62  ;;  %v3613_v62 = vld [vmem:[%s4698_s4 + $0xb0] sm:$0xff]  }
 0x98e   : > { %2076 = vmatprep.subr.bf16.mxu0 %v3561_v5  ;;  %v1859_v5 = vsub.s32 2, %v4941_v58 }
 0x991   : > { %2077 = vmatpush1.bf16.msra.mxu0 %v3559_v8  ;;  %v1855_v8 = vsub.s32 1, %v4941_v58 }
 0x992   : > { %2078 = vmatprep.subr.bf16.mxu0 %v3567_v12 }
 0x995   : > { %2079 = vmatpush1.bf16.msra.mxu0 %v3565_v11 }
 0x996   : > { %2080 = vmatprep.subr.bf16.mxu0 %v3573_v13 }
 0x999   : > { %2081 = vmatpush1.bf16.msra.mxu0 %v3571_v15 }
 0x99a   : > { %2082 = vmatprep.subr.bf16.mxu0 %v3579_v17 }
 0x99d   : > { %2083 = vmatpush1.bf16.msra.mxu0 %v3577_v19 }
 0x99e   : > { %2084 = vmatprep.subr.bf16.mxu0 %v3585_v21 }
 0x9a1   : > { %2085 = vmatpush1.bf16.msra.mxu0 %v3583_v23 }
 0x9a2   : > { %3222 = vmatprep.subr.bf16.mxu0 %v3587_v36 }
 0xa57   : > { %v1772_v44 = vpop.f32.mrb[12].mxu0 }
 0xa58   : > { %v1778_v46 = vadd.f32 %v1772_v44, %v4874_v3  ;;  %v3330_v47 = vpop.f32.mrb[13].mxu0  ;;  %v3544_v3 = vld [vmem:[%s4692_s15 + $0x20] ss:$16 sps:$4 sm:$0xff]  }
 0xa59   : > { %v1775_v48 = vpop.f32.mrb[14].mxu0  ;;  %2032 = vmatpush1.bf16.msra.mxu1 %v3544_v3  ;;  %v3596_v44 = vld [vmem:[%s4698_s4 + $0x10] sm:$0xff]   ;;  %v3599_v47 = vld [vmem:[%s4698_s4 + $0xd8] sm:$0xff]   ;;  %v3608_v3 = vld [vmem:[%s4698_s4 + $0x28] sm:$0xff]  }
 0xa5a   : > { %v5025_v49 = vadd.f32 %v3062_v45, %v1778_v46  ;;  %v3331_v50 = vpop.f32.mrb[15].mxu0  ;;  %2033 = vmatprep.subr.bf16.mxu1 %v3552_v59  ;;  %v3597_v45 = vld [vmem:[%s4698_s4 + $0x90] sm:$0xff]   ;;  %v3598_v46 = vld [vmem:[%s4698_s4 + $0x58] sm:$0xff]  }
 0xa5b   : > { %v3600_v48 = vld [vmem:[%s4698_s4 + $0x18] sm:$0xff]   ;;  %v3610_v59 = vld [vmem:[%s4698_s4 + $0x70] sm:$0xff]  }
 0xa5c   : > { %1789 = vadd.xlane.f32.xlu0 %v5025_v49  ;;  %v3601_v50 = vld [vmem:[%s4698_s4 + $0x98] sm:$0xff]  }
 0xa5d   : > { %2034 = vmatpush1.bf16.msra.mxu1 %v3550_v61  ;;  %v3612_v61 = vld [vmem:[%s4698_s4 + $0x30] sm:$0xff]  }
 0xa5e   : > { %2035 = vmatprep.subr.bf16.mxu1 %v3558_v4  ;;  %v1851_v4 = vsub.s32 0, %v4941_v58 }
 0xa61   : > { %2036 = vmatpush1.bf16.msra.mxu1 %v3556_v7  ;;  %v1847_v7 = vld [vmem:[%s4735_s23] sm:$0xf] }
 0xa62   : > { %2037 = vmatprep.subr.bf16.mxu1 %v3564_v10  ;;  %v1852_v10 = vrot.slane %v1847_v7, %v1851_v4  ;;  %v1860_v11 = vrot.slane %v1847_v7, %v1859_v5  ;;  %v1856_v12 = vrot.slane %v1847_v7, %v1855_v8 }
 0xa65   : > { %2038 = vmatpush1.bf16.msra.mxu1 %v3562_v9  ;;  %v1863_v9 = vsub.s32 3, %v4941_v58 }
 0xa66   : > { %2039 = vmatprep.subr.bf16.mxu1 %v3570_v54 }
 0xa67   : > { %v1864_v54 = vrot.slane %v1847_v7, %v1863_v9 }
 0xa69   : > { %2040 = vmatpush1.bf16.msra.mxu1 %v3568_v14 }
 0xa6a   : > { %2041 = vmatprep.subr.bf16.mxu1 %v3576_v16 }
 0xa6d   : > { %2042 = vmatpush1.bf16.msra.mxu1 %v3574_v18 }
 0xa6e   : > { %2043 = vmatprep.subr.bf16.mxu1 %v3582_v20 }
 0xa71   : > { %2044 = vmatpush1.bf16.msra.mxu1 %v3580_v22 }
 0xa72   : > { %3200 = vmatprep.subr.bf16.mxu1 %v3586_v35 }
 0xae9   : > { %v1790_v63 = vpop.xlane.xlu0 %1789 }
 0xaea   : > { %v1791_v0 = vmul.f32 0.0078125, %v1790_v63  ;;  %v3614_v63 = vld [vmem:[%s4698_s4 + $0x78] sm:$0xff]  }
 0xaec   : > { %v1792_v1 = vsub.f32 %v5025_v49, %v1791_v0  ;;  %v3615_v0 = vld [vmem:[%s4698_s4 + $0xf8] sm:$0xff]  }
 0xaee   : > { %v1793_v2 = vmul.f32 %v1792_v1, %v1792_v1  ;;  %v1803_v29 = vmul.f32 %v3063_v27, %v1792_v1  ;;  %v3616_v1 = vld [vmem:[%s4698_s4 + $0x38] sm:$0xff]  }
 0xaf0   : > { %1794 = vadd.xlane.f32.xlu1 %v1793_v2  ;;  %v3617_v2 = vld [vmem:[%s4698_s4 + $0xb8] sm:$0xff]  }
 0xb7d   : > { %v1795_v24 = vpop.xlane.xlu1 %1794 }
 0xb7e   : > { %v1796_v25 = vmul.f32 0.0078125, %v1795_v24 }
 0xb80   : > { %v1804_v26 = vadd.f32 1e-05, %v1796_v25 }
 0xb82   : > { %3636 = vrsqrt.f32 %v1804_v26 }
 0xb8c   : > { %v3637_v30 = vpop.eup %3636 }
 0xb8d   : > { %v1806_v32 = vmul.f32 %v3637_v30, %v1803_v29 }
 0xb8f   : > { %v1813_v33 = vadd.f32 %v3064_v31, %v1806_v32 }
 0xb91   : > { %v1814_v34 = vpack.c.bf16 %v1813_v33, %v1813_v33 }
 0xb93   : > { %2062 = vmatmul.mubr.bf16.vlgmr.msra.gmra.mrb[28].mxu1 %v1814_v34  ;;  %2103 = vmatmul.mubr.bf16.vlgmr.msra.gmra.mrb[16].mxu0 %v1814_v34 }
 0xb94   : > { %3201 = vmatpush3.bf16.msra.mxu1 %v3588_v37  ;;  %3223 = vmatpush3.bf16.msra.mxu0 %v3589_v38 }
 0xb95   : > { %3202 = vmatprep.subr.bf16.mxu1 %v3590_v39  ;;  %3224 = vmatprep.subr.bf16.mxu0 %v3591_v40 }
 0xb98   : > { %3203 = vmatpush3.bf16.msra.mxu1 %v3592_v41  ;;  %3225 = vmatpush3.bf16.msra.mxu0 %v3593_v6 }
 0xb99   : > { %3204 = vmatprep.subr.bf16.mxu1 %v3594_v42  ;;  %3226 = vmatprep.subr.bf16.mxu0 %v3595_v43 }
 0xb9c   : > { %3205 = vmatpush3.bf16.msra.mxu1 %v3596_v44  ;;  %3227 = vmatpush3.bf16.msra.mxu0 %v3597_v45 }
 0xb9d   : > { %3206 = vmatprep.subr.bf16.mxu1 %v3598_v46  ;;  %3228 = vmatprep.subr.bf16.mxu0 %v3599_v47 }
 0xba0   : > { %3207 = vmatpush3.bf16.msra.mxu1 %v3600_v48  ;;  %3229 = vmatpush3.bf16.msra.mxu0 %v3601_v50 }
 0xba1   : > { %3208 = vmatprep.subr.bf16.mxu1 %v3602_v28  ;;  %3230 = vmatprep.subr.bf16.mxu0 %v3603_v51 }
 0xba4   : > { %3209 = vmatpush3.bf16.msra.mxu1 %v3604_v52  ;;  %3231 = vmatpush3.bf16.msra.mxu0 %v3605_v53 }
 0xba5   : > { %3210 = vmatprep.subr.bf16.mxu1 %v3606_v55  ;;  %3232 = vmatprep.subr.bf16.mxu0 %v3607_v56 }
 0xba8   : > { %3211 = vmatpush3.bf16.msra.mxu1 %v3608_v3  ;;  %3233 = vmatpush3.bf16.msra.mxu0 %v3609_v57 }
 0xba9   : > { %3212 = vmatprep.subr.bf16.mxu1 %v3610_v59  ;;  %3234 = vmatprep.subr.bf16.mxu0 %v3611_v60 }
 0xbac   : > { %3213 = vmatpush3.bf16.msra.mxu1 %v3612_v61  ;;  %3235 = vmatpush3.bf16.msra.mxu0 %v3613_v62 }
 0xbad   : > { %3214 = vmatprep.subr.bf16.mxu1 %v3614_v63  ;;  %3236 = vmatprep.subr.bf16.mxu0 %v3615_v0 }
 0xbb0   : > { %3215 = vmatpush3.bf16.msra.mxu1 %v3616_v1  ;;  %3237 = vmatpush3.bf16.msra.mxu0 %v3617_v2 }
 0xc66   : > { %v2063_v13 = vpop.f32.mrb[28].mxu1  ;;  %v2104_v14 = vpop.f32.mrb[16].mxu0 }
 0xc67   : > { %v2064_v15 = vadd.f32 %v2063_v13, %v1852_v10  ;;  %v2105_v16 = vadd.f32 %v2104_v14, %v1860_v11  ;;  %v2065_v17 = vpop.f32.mrb[29].mxu1  ;;  %v2106_v18 = vpop.f32.mrb[17].mxu0  ;;  %v3129_v13 = vld [vmem:[%s5307_s20] ss:$0 sm:$0xff] }
 0xc68   : > { %v2066_v19 = vadd.f32 %v2065_v17, %v1856_v12  ;;  %v2107_v20 = vadd.f32 %v2106_v18, %v1864_v54  ;;  %v2067_v21 = vpop.f32.mrb[30].mxu1  ;;  %v2108_v22 = vpop.f32.mrb[18].mxu0  ;;  %v3648_v17 = vld [vmem:[#allocation16] ss:$8 sps:$4 sm:$0xff] (!%p3130_p4)   ;;  %v3649_v18 = vld [vmem:[#allocation16 + $0x14] ss:$8 sps:$4 sm:$0xff] (!%p3130_p4)  }
 0xc69   : > { %v2115_v23 = vmul.f32 0.044715, %v2064_v15  ;;  %v2117_v24 = vmul.f32 0.044715, %v2105_v16  ;;  %v2068_v25 = vpop.f32.mrb[31].mxu1  ;;  %v2109_v26 = vpop.f32.mrb[19].mxu0 }
 0xc6a   : > { %v2116_v27 = vmul.f32 0.044715, %v2066_v19  ;;  %v2118_v58 = vmul.f32 0.044715, %v2107_v20  ;;  %v2111_v46 = vmul.f32 0.5, %v2064_v15  ;;  %v2112_v50 = vmul.f32 0.5, %v2066_v19 }
 0xc6b   : > { %v2119_v29 = vmul.f32 %v2115_v23, %v2064_v15  ;;  %v2121_v30 = vmul.f32 %v2117_v24, %v2105_v16  ;;  %v2114_v52 = vmul.f32 0.5, %v2107_v20  ;;  %v2113_v3 = vmul.f32 0.5, %v2105_v16  ;;  %v3654_v21 = vld [vmem:[#allocation16 + $0x20] ss:$8 sps:$4 sm:$0xff] (!%p3130_p4)   ;;  %v3655_v25 = vld [vmem:[#allocation16 + $0x34] ss:$8 sps:$4 sm:$0xff] (!%p3130_p4)  }
 0xc6c   : > { %v2120_v31 = vmul.f32 %v2116_v27, %v2066_v19  ;;  %v2122_v32 = vmul.f32 %v2118_v58, %v2107_v20  ;;  %v3657_v26 = vld [vmem:[#allocation16 + $0x30] ss:$8 sps:$4 sm:$0xff] (!%p3130_p4)   ;;  %v3658_v27 = vld [vmem:[#allocation16 + $0x44] ss:$8 sps:$4 sm:$0xff] (!%p3130_p4)   ;;  %v3660_v58 = vld [vmem:[#allocation16 + $0x40] ss:$8 sps:$4 sm:$0xff] (!%p3130_p4)  }
 0xc6d   : > { %v2123_v33 = vmul.f32 %v2119_v29, %v2064_v15  ;;  %v2125_v34 = vmul.f32 %v2121_v30, %v2105_v16  ;;  %v3661_v29 = vld [vmem:[#allocation16 + $0x54] ss:$8 sps:$4 sm:$0xff] (!%p3130_p4)   ;;  %v3663_v30 = vld [vmem:[#allocation16 + $0x50] ss:$8 sps:$4 sm:$0xff] (!%p3130_p4)  }
 0xc6e   : > { %v2124_v35 = vmul.f32 %v2120_v31, %v2066_v19  ;;  %v2126_v36 = vmul.f32 %v2122_v32, %v2107_v20  ;;  %v3664_v31 = vld [vmem:[#allocation16 + $0x64] ss:$8 sps:$4 sm:$0xff] (!%p3130_p4)   ;;  %v4234_v32 = vmov (!%p3130_p4), 0  }
 0xc6f   : > { %v2127_v37 = vadd.f32 %v2123_v33, %v2064_v15  ;;  %v2129_v38 = vadd.f32 %v2125_v34, %v2105_v16  ;;  %v3646_v16 = vld [vmem:[#allocation16 + $0x4] ss:$8 sps:$4 sm:$0xff] (!%p3130_p4)   ;;  %v3666_v33 = vld [vmem:[#allocation16 + $0x60] ss:$8 sps:$4 sm:$0xff] (!%p3130_p4)   ;;  %v3667_v34 = vld [vmem:[#allocation16 + $0x74] ss:$8 sps:$4 sm:$0xff] (!%p3130_p4)  }
 0xc70   : > { %v2128_v39 = vadd.f32 %v2124_v35, %v2066_v19  ;;  %v2130_v40 = vadd.f32 %v2126_v36, %v2107_v20  ;;  %2625 = vmatprep.subr.bf16.mxu0 (!%p3130_p4), %v3646_v16  ;;  %v3651_v19 = vld [vmem:[#allocation16 + $0x10] ss:$8 sps:$4 sm:$0xff] (!%p3130_p4)   ;;  %v3652_v20 = vld [vmem:[#allocation16 + $0x24] ss:$8 sps:$4 sm:$0xff] (!%p3130_p4)  }
 0xc71   : > { %v2131_v41 = vmul.f32 0.7978846, %v2127_v37  ;;  %v2133_v43 = vmul.f32 0.7978846, %v2129_v38  ;;  %v3669_v35 = vld [vmem:[#allocation16 + $0x70] ss:$8 sps:$4 sm:$0xff] (!%p3130_p4)  }
 0xc72   : > { %v2132_v6 = vmul.f32 0.7978846, %v2128_v39  ;;  %v2134_v42 = vmul.f32 0.7978846, %v2130_v40  ;;  %v3131_v39 = vld [vmem:[%s5309_s25] ss:$0 sm:$0xff] (!%p3130_p4) }
 0xc73   : > { %3638 = vtanh.f32 %v2131_v41 }
 0xc74   : > { %3640 = vtanh.f32 %v2132_v6  ;;  %v3132_v6 = vld [vmem:[%s5310_s16] ss:$0 sm:$0xff] (!%p3130_p4) }
 0xc75   : > { %3642 = vtanh.f32 %v2134_v42 }
 0xc76   : > { %3644 = vtanh.f32 %v2133_v43 }
 0xc7d   : > { %v3639_v44 = vpop.eup %3638 }
 0xc7e   : > { %v3641_v45 = vpop.eup %3640  ;;  %v2139_v47 = vadd.f32 1.0, %v3639_v44 }
 0xc7f   : > { %v3643_v48 = vpop.eup %3642  ;;  %v2140_v28 = vadd.f32 1.0, %v3641_v45 }
 0xc80   : > { %v3645_v51 = vpop.eup %3644  ;;  %v2142_v53 = vadd.f32 1.0, %v3643_v48  ;;  %v2143_v55 = vmul.f32 %v2139_v47, %v2111_v46 }
 0xc81   : > { %v2144_v56 = vmul.f32 %v2140_v28, %v2112_v50  ;;  %v2141_v57 = vadd.f32 1.0, %v3645_v51 }
 0xc82   : > { %v2146_v59 = vmul.f32 %v2142_v53, %v2114_v52  ;;  %v2147_v63 = vpack.c.bf16 %v2143_v55, %v2143_v55 }
 0xc83   : > { %v2148_v60 = vpack.c.bf16 %v2144_v56, %v2144_v56  ;;  %v2145_v61 = vmul.f32 %v2141_v57, %v2113_v3 }
 0xc84   : > { %v2150_v62 = vpack.c.bf16 %v2146_v59, %v2146_v59 }
 0xc85   : > { %2439 = vmatprep.mubr.bf16.mxu1 %v2148_v60  ;;  %v2149_v0 = vpack.c.bf16 %v2145_v61, %v2145_v61 }
 0xc86   : > { %2479 = vmatprep.mubr.bf16.mxu0 %v2150_v62  ;;  %2440 = vmatmul.mubr.bf16.vlgmr.msra.gmra.mrb[32].mxu1 %v2147_v63 }
 0xc87   : > { %2480 = vmatmul.mubr.bf16.vlgmr.msra.gmra.mrb[20].mxu0 %v2149_v0 }
 0xc88   : > { %2626 = vmatpush1.bf16.msra.mxu0 (!%p3130_p4), %v3648_v17  ;;  %2657 = vmatprep.mubr.bf16.mxu0 (!%p3130_p4), %v4234_v32 }
 0xc89   : > { %2627 = vmatprep.subr.bf16.mxu0 (!%p3130_p4), %v3649_v18 }
 0xc8c   : > { %2628 = vmatpush1.bf16.msra.mxu0 (!%p3130_p4), %v3651_v19 }
 0xc8d   : > { %2629 = vmatprep.subr.bf16.mxu0 (!%p3130_p4), %v3652_v20 }
 0xc90   : > { %2630 = vmatpush1.bf16.msra.mxu0 (!%p3130_p4), %v3654_v21 }
 0xc91   : > { %2631 = vmatprep.subr.bf16.mxu0 (!%p3130_p4), %v3655_v25 }
 0xc94   : > { %2632 = vmatpush1.bf16.msra.mxu0 (!%p3130_p4), %v3657_v26 }
 0xc95   : > { %2633 = vmatprep.subr.bf16.mxu0 (!%p3130_p4), %v3658_v27 }
 0xc98   : > { %2634 = vmatpush1.bf16.msra.mxu0 (!%p3130_p4), %v3660_v58 }
 0xc99   : > { %2635 = vmatprep.subr.bf16.mxu0 (!%p3130_p4), %v3661_v29 }
 0xc9c   : > { %2636 = vmatpush1.bf16.msra.mxu0 (!%p3130_p4), %v3663_v30 }
 0xc9d   : > { %2637 = vmatprep.subr.bf16.mxu0 (!%p3130_p4), %v3664_v31 }
 0xca0   : > { %2638 = vmatpush1.bf16.msra.mxu0 (!%p3130_p4), %v3666_v33 }
 0xca1   : > { %2639 = vmatprep.subr.bf16.mxu0 (!%p3130_p4), %v3667_v34 }
 0xca4   : > { %2640 = vmatpush1.bf16.msra.mxu0 (!%p3130_p4), %v3669_v35 }
 0xd59   : > { %v3216_v1 = vpop.f32.mrb[32].mxu1 }
 0xd5a   : > { %v3238_v2 = vpop.f32.mrb[20].mxu0  ;;  %v3217_v4 = vpop.f32.mrb[33].mxu1 }
 0xd5b   : > { %v3218_v5 = vadd.f32 %v3217_v4, %v3216_v1  ;;  %v3239_v7 = vpop.f32.mrb[21].mxu0  ;;  %v3219_v8 = vpop.f32.mrb[34].mxu1 }
 0xd5c   : > { %v3240_v9 = vadd.f32 %v3239_v7, %v3238_v2  ;;  %v3241_v10 = vpop.f32.mrb[22].mxu0  ;;  %v3220_v11 = vpop.f32.mrb[35].mxu1 }
 0xd5d   : > { %v3242_v12 = vpop.f32.mrb[23].mxu0 }
 0xd5e   : > { %v2482_v54 = vadd.f32 %v3240_v9, %v3218_v5  ;;  %2500 = sbr.rel (%p3130_p4) target bundleno = 3954 (0xf72), region = 144 }
 0xd60   : > { %v2487_v14 = vadd.f32 %v2482_v54, %v5025_v49 }
 0xd62   : > { %v2495_v15 = vadd.f32 %v3129_v13, %v2487_v14 }
 0xd64   : > { %2496 = vst [vmem:[#allocation2] sm:$0xff] %v2495_v15  ;;  %2503 = vadd.xlane.f32.xlu0 (!%p3130_p4), %v2495_v15 }
 0xdf1   : > { %v2504_v22 = vpop.xlane.xlu0 %2503 }
 0xdf2   : > { %v2505_v49 = vmul.f32 0.0078125, %v2504_v22 }
 0xdf4   : > { %v2506_v23 = vsub.f32 %v2495_v15, %v2505_v49 }
 0xdf6   : > { %v2507_v24 = vmul.f32 %v2506_v23, %v2506_v23  ;;  %v2517_v40 = vmul.f32 %v3131_v39, %v2506_v23 }
 0xdf8   : > { %2508 = vadd.xlane.f32.xlu0 %v2507_v24 }
 0xe85   : > { %v2509_v36 = vpop.xlane.xlu0 %2508 }
 0xe86   : > { %v2510_v37 = vmul.f32 0.0078125, %v2509_v36 }
 0xe88   : > { %v2518_v38 = vadd.f32 1e-05, %v2510_v37 }
 0xe8a   : > { %3670 = vrsqrt.f32 %v2518_v38 }
 0xe94   : > { %v3671_v41 = vpop.eup %3670 }
 0xe95   : > { %v2520_v42 = vmul.f32 %v3671_v41, %v2517_v40 }
 0xe97   : > { %v2527_v43 = vadd.f32 %v3132_v6, %v2520_v42 }
 0xe99   : > { %v2528_v44 = vpack.c.bf16 %v2527_v43, %v2527_v43 }
 0xe9b   : > { %2658 = vmatmul.mubr.bf16.vlgmr.msra.gmra.mrb[0].mxu0 %v2528_v44 }
 0xf6e   : > { %v2659_v45 = vpop.f32.mrb[0].mxu0 }
 0xf6f   : > { %2666 = vst [vmem:[%s4741_s29] sm:$0xff] %v2659_v45  ;;  %v2661_v46 = vpop.f32.mrb[1].mxu0 }
 0xf70   : > { %2667 = vst [vmem:[%s4741_s29 + $0x8] sm:$0xff] %v2661_v46  ;;  %v2663_v47 = vpop.f32.mrb[2].mxu0 }
 0xf71   : > { %v2664_v48 = vpop.f32.mrb[3].mxu0 }
 0xf72 PF: > { %s5311_s2 = sld [smem:[#allocation55_spill]]  ;;  %s5312_s7 = sld [smem:[#allocation81_spill]] }
 0xf73   : > { %s2683_s26 = sshll.u32 %s4741_s29, 4  ;;  %s5313_s27 = sand.u32 1, %s4166_s11   ;;  %s2684_s26 = int_to_ptr.vmem [resolvable:$true] %s2683_s26 }
 0xf74   : > { %s2669_s10 = scalar_lea.sflag [#allocation9], %s5313_s27  ;;  %s4050_s3 = scalar_lea.vmem %s2684_s26, 256 }
 0xf75   : > { %p4051_p13 = scmp.ne.s32.totalorder %s2684_s26, %s4050_s3  ;;  %p5314_p12 = scmp.ne.s32.totalorder %s5268_s8, 0 }
 0xf76   : > { %s4235_s18 = smov [#allocation18]  }
 0xf77   : > { %p4052_p9 = pnand %p4051_p13, %p5314_p12  ;;  %s4054_s15 = sshll.u32 %s4235_s18, 4  ;;  %s4055_s15 = int_to_ptr.vmem [resolvable:$false] %s4054_s15 }
 0xf78   : > { %s3165_s21 = sshll.u32 %s5311_s2, 8  ;;  %s4056_s28 = scalar_lea.vmem %s4055_s15, 512 }
 0xf79   : > { %s5127_s5 = scalar_lea.hbm %s5312_s7, %s3165_s21  ;;  %p4053_p11 = pneg %p4052_p9 }
 0xf7a   : > { %p4057_p1 = scmp.lt.s32.totalorder %s2684_s26, %s4055_s15  ;;  %p4058_p8 = scmp.lt.s32.totalorder %s4056_s28, %s4050_s3 }
 0xf7c   : > { %p4059_p5 = por %p4058_p8, %p4057_p1 }
 0xf7e   : > { %p4060_p7 = pnand %p4059_p5, %p4053_p11 }
 0xf80   : > { %4063 = shalt.err (!%p4060_p7)
}
 0xf81   : > { %s4064_s29 = scalar_lea.hbm %s5127_s5, 256  ;;  %s4068_s4 = scalar_lea.hbm %s5312_s7, 512 }
 0xf82   : > { %p4065_p6 = scmp.ne.s32.totalorder %s5127_s5, %s4064_s29  ;;  %p4069_p0 = scmp.lt.u32.totalorder %s5127_s5, %s5312_s7 }
 0xf83   : > { %p4070_p3 = scmp.lt.u32.totalorder %s4068_s4, %s4064_s29  ;;  %p4072_p13 = scmp.lt.u32.totalorder %s4064_s29, %s5127_s5 }
 0xf84   : > { %p4066_p2 = pnand %p4065_p6, %p5314_p12 }
 0xf85   : > { %p4071_p4 = por %p4070_p3, %p4069_p0 }
 0xf86   : > { %p4067_p10 = pneg %p4066_p2 }
 0xf87   : > { %p4073_p9 = por %p4072_p13, %p4071_p4 }
 0xf89   : > { %p4074_p11 = pnand %p4073_p9, %p4067_p10 }
 0xf8b   : > { %4077 = shalt.err (!%p4074_p11)
}
 0xf8c   : > { %3351 = dma.vmem_to_hbm [thread:$0]  (%p5314_p12), %s2684_s26, 256, %s5127_s5, %s2669_s10  }
 0xf8d PF: > { %s5315_s20 = sld [smem:[#allocation58_spill]]  ;;  %s5316_s6 = sld [smem:[#allocation51_spill]] }
 0xf8e   : > { %s5317_s1 = sld [smem:[#allocation62_spill]] }
 0xf93   : > { %p3382_p1 = scmp.ge.s32.totalorder %s5315_s20, 2  ;;  %s2695_s14 = sand.u32 1, %s5316_s6  }
 0xf94   : > { %p5318_p8 = scmp.ne.s32.totalorder %s5317_s1, 0  ;;  %s2696_s25 = scalar_lea.sflag [#allocation9], %s2695_s14 }
 0xf96   : > { %p3374_p5 = pnand %p3382_p1, %p5318_p8 }
 0xf98   : > { %4157 = dma.done.wait (!%p3374_p5), %s2696_s25, 256  }
 0xf99   : > { %4159 = vsyncadd (!%p3374_p5), %s2696_s25, 4294967040  ;;  %s42_s28 = sadd.s32 1, %s5315_s20   ;;  %s5319_s17 = sld [smem:[#allocation52_spill]] }
 0xf9a   : > { %p39_p7 = scmp.ge.s32.totalorder %s42_s28, 6   ;;  %s5320_s20 = sld [smem:[#allocation63_spill]] }
 0xf9b   : > { %s5321_s8 = sld [smem:[#allocation53_spill]]  ;;  %s5322_s23 = sld [smem:[#allocation60_spill]] }
 0xf9c   : > { %s5323_s24 = sld [smem:[#allocation56_spill]]  ;;  %s5324_s25 = sld [smem:[#allocation57_spill]] }
 0xf9d   : > { %s5325_s26 = sld [smem:[#allocation59_spill]]  ;;  %s5326_s27 = sld [smem:[#allocation61_spill]] }
 0xf9e   : > { %s5327_s1 = smov %s4166_s11  ;;  %s5329_s21 = smov %s4178_s22 }
 0xf9f   : > { %s5328_s11 = smov %s5319_s17  ;;  %41 = sbr.rel (!%p39_p7) target bundleno = 38 (0x26), region = 259 }
 0xfa1   : > { %s5330_s22 = smov %s5321_s8 }
 0xfa6   :  { %2701 = vsyncpa [#allocation8], 1 }
 0xfa7   :  { %2703 = vsyncpa [#allocation8 + $0x1], 1 }
 0xfa8   :  { %2704 = vsyncpa [#allocation11], 1 }
 0xfa9   :  { %2706 = vsyncpa [#allocation11 + $0x1], 1 }
 0xfaa   :  { %2707 = vsyncpa [#allocation14], 1 }
 0xfab   :  { %2709 = vsyncpa [#allocation14 + $0x1], 1 }
 0xfac   :  { %2710 = vsyncpa [#allocation17], 1 }
 0xfad   :  { %2711 = vsyncpa [#allocation9], 1 }
 0xfae   :  { %2713 = vsyncpa [#allocation9 + $0x1], 1 }
 0xfaf   :  { %2714 = vsyncmov [#allocation4] }
 0xfb2   :  { %s2715_s30 = vpop.sfrf %2714 }
 0xfb3   :  { %p3154_p12 = scmp.ne.s32.totalorder %s2715_s30, 0 }
 0xfb5   :  { %2719 = shalt.err (%p3154_p12)  }
 0xfb6   :  { %2721 = vsyncmov [#allocation4 + $0x1] }
 0xfb9   :  { %s2722_s16 = vpop.sfrf %2721 }
 0xfba   :  { %p3155_p6 = scmp.ne.s32.totalorder %s2722_s16, 0 }
 0xfbc   :  { %2726 = shalt.err (%p3155_p6)  }
 0xfbd   :  { %2728 = vsyncmov [#allocation4 + $0x2] }
 0xfc0   :  { %s2729_s2 = vpop.sfrf %2728 }
 0xfc1   :  { %p3156_p2 = scmp.ne.s32.totalorder %s2729_s2, 0 }
 0xfc3   :  { %2733 = shalt.err (%p3156_p2)  }
 0xfc4   :  { %2735 = vsyncmov [#allocation4 + $0x3] }
 0xfc7   :  { %s2736_s11 = vpop.sfrf %2735 }
 0xfc8   :  { %p3157_p10 = scmp.ne.s32.totalorder %s2736_s11, 0 }
 0xfca   :  { %2740 = shalt.err (%p3157_p10)  }
 0xfcb   :  { %2742 = vsyncmov [#allocation4 + $0x4] }
 0xfce   :  { %s2743_s22 = vpop.sfrf %2742 }
 0xfcf   :  { %p3158_p0 = scmp.ne.s32.totalorder %s2743_s22, 0 }
 0xfd1   :  { %2747 = shalt.err (%p3158_p0)  }
 0xfd2   :  { %2749 = vsyncmov [#allocation4 + $0x5] }
 0xfd5   :  { %s2750_s9 = vpop.sfrf %2749 }
 0xfd6   :  { %p3159_p3 = scmp.ne.s32.totalorder %s2750_s9, 0 }
 0xfd8   :  { %2754 = shalt.err (%p3159_p3)  }
 0xfd9   :  { %2756 = vsyncmov [#allocation4 + $0x6] }
 0xfdc   :  { %s2757_s21 = vpop.sfrf %2756 }
 0xfdd   :  { %p3160_p4 = scmp.ne.s32.totalorder %s2757_s21, 0 }
 0xfdf   :  { %2761 = shalt.err (%p3160_p4)  }
 0xfe0   :  { %2763 = vsyncmov [#allocation4 + $0x7] }
 0xfe3   :  { %s2764_s0 = vpop.sfrf %2763 }
 0xfe4   :  { %p3161_p13 = scmp.ne.s32.totalorder %s2764_s0, 0 }
 0xfe6   :  { %2768 = shalt.err (%p3161_p13)  }

</bundles_post_ra>
